<compile_context>
chip_gen: v7x
topology: tpu7x:2x2x1
jax: 0.10.0
libtpu: 0.0.40
codegen_flags: <defaults>
</compile_context>

<pallas_src>
import jax
import jax.numpy as jnp
import numpy as np
from jax import lax
from jax.experimental import pallas as pl
from jax.experimental.pallas import tpu as pltpu

_SMEM_SPEC = pl.BlockSpec(memory_space=pltpu.MemorySpace.SMEM)


def _make_helpers(H, W, Ho, Wo, Cm):
    """Tap extraction / conv-channel / maxpool-channel builders.

    xph_ref: (nb, 4, Ho+1, Wo+1) phases of the zero-padded image with
             xph[n, 2*a+b, i, j] == x_pad[n, 2*i+a, 2*j+b].
    """
    h_odd = 2 * (Ho - 1) + 2 >= H + 1   # bottom tap (dh=2) can land on padding
    w_odd = 2 * (Wo - 1) + 2 >= W + 1   # right tap (dw=2) can land on padding

    def get_taps(xph_ref):
        taps = {}
        for dh in range(3):
            for dw in range(3):
                p = (dh % 2) * 2 + (dw % 2)
                r0, c0 = dh // 2, dw // 2
                taps[(dh, dw)] = xph_ref[:, p, r0:r0 + Ho, c0:c0 + Wo]
        return taps

    def conv_channel(taps, w_ref, c):
        # 9 VPU FMAs; SMEM scalar weights (a 9-wide matmul would use <1% MXU).
        acc = taps[(0, 0)] * w_ref[c, 0]
        for dh in range(3):
            for dw in range(3):
                if dh == 0 and dw == 0:
                    continue
                acc = acc + taps[(dh, dw)] * w_ref[c, 3 * dh + dw]
        return acc

    def pool_channel(taps):
        # Exclude-padding max: build the (<=4) distinct border masks once and
        # group taps by mask so the -inf select happens once per group.
        row_idx = lax.broadcasted_iota(jnp.int32, (Ho, Wo), 0)
        col_idx = lax.broadcasted_iota(jnp.int32, (Ho, Wo), 1)
        base = {"top": row_idx == 0, "left": col_idx == 0}
        if h_odd:
            base["bot"] = row_idx == Ho - 1
        if w_odd:
            base["right"] = col_idx == Wo - 1

        groups = {}
        for (dh, dw), t in taps.items():
            key = []
            if dh == 0:
                key.append("top")
            if dh == 2 and h_odd:
                key.append("bot")
            if dw == 0:
                key.append("left")
            if dw == 2 and w_odd:
                key.append("right")
            groups.setdefault(tuple(key), []).append(t)

        neg_inf = jnp.float32(-jnp.inf)
        result = None
        for key, ts in groups.items():
            g = ts[0]
            for t in ts[1:]:
                g = jnp.maximum(g, t)
            if key:
                m = base[key[0]]
                for k2 in key[1:]:
                    m = m | base[k2]
                g = jnp.where(m[None, :, :], neg_inf, g)
            result = g if result is None else jnp.maximum(result, g)
        return result

    return get_taps, conv_channel, pool_channel


def _build_kernels(H, W, Ho, Wo, Cm):
    Cout = Cm + 1
    get_taps, conv_channel, pool_channel = _make_helpers(H, W, Ho, Wo, Cm)

    def stats_kernel(w_ref, xph_ref, stats_ref):
        # Batch-accumulated per-channel sum / sum-of-squares in a resident
        # lane-dense (2, Cout) output block (no (1,1)-tile concats).
        @pl.when(pl.program_id(0) == 0)
        def _():
            stats_ref[...] = jnp.zeros_like(stats_ref)

        taps = get_taps(xph_ref)
        planes = [conv_channel(taps, w_ref, c) for c in range(Cm)]
        planes.append(pool_channel(taps))
        stacked = jnp.stack(planes, axis=0)          # (Cout, nb, Ho, Wo)

        def reduce_all(t):                            # trailing-axis reduces
            t = jnp.sum(t, axis=3)
            t = jnp.sum(t, axis=2)
            return jnp.sum(t, axis=1)                 # (Cout,)

        s = reduce_all(stacked)
        ss = reduce_all(stacked * stacked)
        stats_ref[...] += jnp.stack([s, ss], axis=0)  # (2, Cout)

    def apply_kernel(w_ref, aff_ref, xph_ref, out_ref):
        # BN affine + ReLU + store fused into the per-channel loop; conv-channel
        # scale is pre-folded into w_ref so only the shift remains.
        taps = get_taps(xph_ref)
        for c in range(Cm):
            acc = conv_channel(taps, w_ref, c)
            out_ref[:, c, :, :] = jnp.maximum(acc + aff_ref[1, c], 0.0)
        pool = pool_channel(taps)
        out_ref[:, Cm, :, :] = jnp.maximum(
            pool * aff_ref[0, Cm] + aff_ref[1, Cm], 0.0)

    return stats_kernel, apply_kernel


def initial_block_forward(x_nchw, w_oihw, gamma, beta, eps=1e-5):
    """x_nchw: (N, 1, H, W) f32 ; w_oihw: (Cout-1, 1, 3, 3) ; gamma/beta: (Cout,)."""
    N, Cin, H, W = x_nchw.shape
    Cm = w_oihw.shape[0]
    Cout = Cm + Cin
    assert Cin == 1, "InitialBlock implies in_channels == 1 (BatchNorm2d(out_ch))"
    assert gamma.shape == (Cout,) and beta.shape == (Cout,)

    Ho = (H - 1) // 2 + 1
    Wo = (W - 1) // 2 + 1
    Hp = 2 * (Ho + 1)            # even-padded sizes so the 2x2 phase split is exact
    Wp = 2 * (Wo + 1)

    # ---- glue: zero-pad (pad=1 top/left) + 2x2 space-to-depth --------------
    x2d = x_nchw.reshape(N, H, W)
    xpad = jnp.pad(x2d, ((0, 0), (1, Hp - H - 1), (1, Wp - W - 1)))
    xph = (xpad.reshape(N, Ho + 1, 2, Wo + 1, 2)
               .transpose(0, 2, 4, 1, 3)
               .reshape(N, 4, Ho + 1, Wo + 1))

    # ---- batch blocking: several small images per grid step ----------------
    per_img = 4 * (Ho + 1) * (Wo + 1) + Cout * Ho * Wo        # f32 elems/image
    nb = int(max(1, min(N, 8, (1 << 18) // max(per_img, 1))))
    n_pad = (-N) % nb
    if n_pad:
        # zero images contribute exactly 0 to sum/sum-sq -> stats stay exact.
        xph = jnp.pad(xph, ((0, n_pad), (0, 0), (0, 0), (0, 0)))
    N_pad = N + n_pad
    steps = N_pad // nb

    w_flat = w_oihw.reshape(Cm, 9).astype(jnp.float32)        # (c, 3*dh+dw)
    stats_kernel, apply_kernel = _build_kernels(H, W, Ho, Wo, Cm)

    # ---- VMEM budget from actual block footprint ---------------------------
    blk_in = nb * 4 * (Ho + 1) * (Wo + 1) * 4
    blk_out = nb * Cout * Ho * Wo * 4
    temps = (12 + 2 * Cout) * nb * Ho * Wo * 4
    vmem_bytes = int(min(max(2 * (blk_in + blk_out) + temps + (4 << 20),
                             16 << 20), 100 << 20))

    xph_spec = pl.BlockSpec((nb, 4, Ho + 1, Wo + 1), lambda n: (n, 0, 0, 0))

    # ---- pass 1: batch stats (resident accumulator, tiny lane-dense output) -
    stats = pl.pallas_call(
        stats_kernel,
        out_shape=jax.ShapeDtypeStruct((2, Cout), jnp.float32),
        grid=(steps,),
        in_specs=[_SMEM_SPEC, xph_spec],
        out_specs=pl.BlockSpec((2, Cout), lambda n: (0, 0)),
        compiler_params=pltpu.CompilerParams(
            dimension_semantics=("arbitrary",),
            vmem_limit_bytes=vmem_bytes),
    )(w_flat, xph)

    # ---- glue: fold batch stats + gamma/beta into per-channel affine --------
    cnt = jnp.float32(N * Ho * Wo)
    mean = stats[0] / cnt
    var = jnp.maximum(stats[1] / cnt - mean * mean, 0.0)
    scale = gamma.astype(jnp.float32) * lax.rsqrt(var + eps)
    shift = beta.astype(jnp.float32) - mean * scale
    w_scaled = w_flat * scale[:Cm, None]          # fold conv-channel scale in
    aff = jnp.stack([scale, shift], axis=0)       # (2, Cout)

    # ---- pass 2: recompute pre-activation, fused affine + ReLU + store ------
    out = pl.pallas_call(
        apply_kernel,
        out_shape=jax.ShapeDtypeStruct((N_pad, Cout, Ho, Wo), jnp.float32),
        grid=(steps,),
        in_specs=[_SMEM_SPEC, _SMEM_SPEC, xph_spec],
        out_specs=pl.BlockSpec((nb, Cout, Ho, Wo), lambda n: (n, 0, 0, 0)),
        compiler_params=pltpu.CompilerParams(
            dimension_semantics=("parallel",),
            vmem_limit_bytes=vmem_bytes),
    )(w_scaled, aff, xph)

    return out[:N] if n_pad else out              # already NCHW


def reference_forward(x_nchw, w_oihw, gamma, beta, eps=1e-5):
    """Pure-JAX reference mirroring the PyTorch module (training-mode BN)."""
    main = lax.conv_general_dilated(
        x_nchw, w_oihw, window_strides=(2, 2), padding=((1, 1), (1, 1)),
        dimension_numbers=("NCHW", "OIHW", "NCHW"))
    ext = lax.reduce_window(
        x_nchw, -jnp.inf, lax.max, window_dimensions=(1, 1, 3, 3),
        window_strides=(1, 1, 2, 2), padding=((0, 0), (0, 0), (1, 1), (1, 1)))
    out = jnp.concatenate([main, ext], axis=1)
    mean = jnp.mean(out, axis=(0, 2, 3), keepdims=True)
    var = jnp.mean((out - mean) ** 2, axis=(0, 2, 3), keepdims=True)
    out = (out - mean) * lax.rsqrt(var + eps)
    out = out * gamma.reshape(1, -1, 1, 1) + beta.reshape(1, -1, 1, 1)
    return jnp.maximum(out, 0.0)


if __name__ == "__main__":
    fwd = jax.jit(initial_block_forward)

    def run_case(key, N, H, W, Cout):
        kx, kw, kg, kb = jax.random.split(key, 4)
        x = jax.random.normal(kx, (N, 1, H, W), dtype=jnp.float32)
        w = jax.random.normal(kw, (Cout - 1, 1, 3, 3), dtype=jnp.float32) * 0.1
        gamma = 1.0 + 0.1 * jax.random.normal(kg, (Cout,), dtype=jnp.float32)
        beta = 0.1 * jax.random.normal(kb, (Cout,), dtype=jnp.float32)
        out = jax.block_until_ready(fwd(x, w, gamma, beta))
        ref = jax.block_until_ready(reference_forward(x, w, gamma, beta))
        np.testing.assert_allclose(np.asarray(out), np.asarray(ref),
                                   atol=1e-4, rtol=1e-4)

    key = jax.random.PRNGKey(0)
    k1, k2 = jax.random.split(key)
    run_case(k1, N=2, H=16, W=16, Cout=8)    # even H/W
    run_case(k2, N=3, H=15, W=17, Cout=5)    # odd H/W: exercises border masks

    print("KERNEL_OK")
</pallas_src>

<mosaic_0001>
module attributes {stable_mosaic.version = 11 : i64} {
  func.func @stats_kernel(%arg0: i32, %arg1: memref<7x9xf32, #tpu.memory_space<smem>>, %arg2: memref<2x4x9x9xf32, #tpu.memory_space<vmem>>, %arg3: memref<2x8xf32, #tpu.memory_space<vmem>>) attributes {dimension_semantics = [#tpu.dimension_semantics<arbitrary>], iteration_bounds = array<i64: 1>, scalar_prefetch = 0 : i64, scratch_operands = 0 : i64, tpu.core_type = #tpu.core_type<tc>, window_params = [{transform_indices = @transform_0, window_bounds = array<i64: 7, 9>}, {transform_indices = @transform_1, window_bounds = array<i64: 2, 4, 9, 9>}, {pipeline_mode = #tpu.pipeline_mode<synchronous>, transform_indices = @transform_2, window_bounds = array<i64: 2, 8>}]} {
    %c0_i32 = arith.constant 0 : i32
    %0 = arith.cmpi eq, %arg0, %c0_i32 : i32
    %1 = arith.extui %0 : i1 to i32
    %c0_i32_0 = arith.constant 0 : i32
    %2 = arith.cmpi ne, %1, %c0_i32_0 : i32
    scf.if %2 {
      %cst_168 = arith.constant 0.000000e+00 : f32
      %318 = vector.broadcast %cst_168 : f32 to vector<2x8xf32>
      %c0_169 = arith.constant 0 : index
      %c0_170 = arith.constant 0 : index
      %319 = vector.load %arg3[%c0_169, %c0_170] : memref<2x8xf32, #tpu.memory_space<vmem>>, vector<2x8xf32>
      tpu.vector_store %arg3[%c0_169, %c0_170], %318 {strides = array<i32>} : memref<2x8xf32, #tpu.memory_space<vmem>>, vector<2x8xf32>,
    } else {
    }
    %c0 = arith.constant 0 : index
    %c0_1 = arith.constant 0 : index
    %c0_2 = arith.constant 0 : index
    %c0_3 = arith.constant 0 : index
    %3 = vector.load %arg2[%c0, %c0_1, %c0_2, %c0_3] : memref<2x4x9x9xf32, #tpu.memory_space<vmem>>, vector<2x1x8x8xf32>
    %4 = vector.shape_cast %3 : vector<2x1x8x8xf32> to vector<2x8x8xf32>
    %c0_4 = arith.constant 0 : index
    %c1 = arith.constant 1 : index
    %c0_5 = arith.constant 0 : index
    %c0_6 = arith.constant 0 : index
    %5 = vector.load %arg2[%c0_4, %c1, %c0_5, %c0_6] : memref<2x4x9x9xf32, #tpu.memory_space<vmem>>, vector<2x1x8x8xf32>
    %6 = vector.shape_cast %5 : vector<2x1x8x8xf32> to vector<2x8x8xf32>
    %c0_7 = arith.constant 0 : index
    %c0_8 = arith.constant 0 : index
    %c0_9 = arith.constant 0 : index
    %c1_10 = arith.constant 1 : index
    %7 = vector.load %arg2[%c0_7, %c0_8, %c0_9, %c1_10] : memref<2x4x9x9xf32, #tpu.memory_space<vmem>>, vector<2x1x8x8xf32>
    %8 = vector.shape_cast %7 : vector<2x1x8x8xf32> to vector<2x8x8xf32>
    %c0_11 = arith.constant 0 : index
    %c2 = arith.constant 2 : index
    %c0_12 = arith.constant 0 : index
    %c0_13 = arith.constant 0 : index
    %9 = vector.load %arg2[%c0_11, %c2, %c0_12, %c0_13] : memref<2x4x9x9xf32, #tpu.memory_space<vmem>>, vector<2x1x8x8xf32>
    %10 = vector.shape_cast %9 : vector<2x1x8x8xf32> to vector<2x8x8xf32>
    %c0_14 = arith.constant 0 : index
    %c3 = arith.constant 3 : index
    %c0_15 = arith.constant 0 : index
    %c0_16 = arith.constant 0 : index
    %11 = vector.load %arg2[%c0_14, %c3, %c0_15, %c0_16] : memref<2x4x9x9xf32, #tpu.memory_space<vmem>>, vector<2x1x8x8xf32>
    %12 = vector.shape_cast %11 : vector<2x1x8x8xf32> to vector<2x8x8xf32>
    %c0_17 = arith.constant 0 : index
    %c2_18 = arith.constant 2 : index
    %c0_19 = arith.constant 0 : index
    %c1_20 = arith.constant 1 : index
    %13 = vector.load %arg2[%c0_17, %c2_18, %c0_19, %c1_20] : memref<2x4x9x9xf32, #tpu.memory_space<vmem>>, vector<2x1x8x8xf32>
    %14 = vector.shape_cast %13 : vector<2x1x8x8xf32> to vector<2x8x8xf32>
    %c0_21 = arith.constant 0 : index
    %c0_22 = arith.constant 0 : index
    %c1_23 = arith.constant 1 : index
    %c0_24 = arith.constant 0 : index
    %15 = vector.load %arg2[%c0_21, %c0_22, %c1_23, %c0_24] : memref<2x4x9x9xf32, #tpu.memory_space<vmem>>, vector<2x1x8x8xf32>
    %16 = vector.shape_cast %15 : vector<2x1x8x8xf32> to vector<2x8x8xf32>
    %c0_25 = arith.constant 0 : index
    %c1_26 = arith.constant 1 : index
    %c1_27 = arith.constant 1 : index
    %c0_28 = arith.constant 0 : index
    %17 = vector.load %arg2[%c0_25, %c1_26, %c1_27, %c0_28] : memref<2x4x9x9xf32, #tpu.memory_space<vmem>>, vector<2x1x8x8xf32>
    %18 = vector.shape_cast %17 : vector<2x1x8x8xf32> to vector<2x8x8xf32>
    %c0_29 = arith.constant 0 : index
    %c0_30 = arith.constant 0 : index
    %c1_31 = arith.constant 1 : index
    %c1_32 = arith.constant 1 : index
    %19 = vector.load %arg2[%c0_29, %c0_30, %c1_31, %c1_32] : memref<2x4x9x9xf32, #tpu.memory_space<vmem>>, vector<2x1x8x8xf32>
    %20 = vector.shape_cast %19 : vector<2x1x8x8xf32> to vector<2x8x8xf32>
    %c0_33 = arith.constant 0 : index
    %c0_34 = arith.constant 0 : index
    %21 = memref.load %arg1[%c0_33, %c0_34] : memref<7x9xf32, #tpu.memory_space<smem>>
    %22 = vector.broadcast %21 : f32 to vector<2x8x8xf32>
    %23 = arith.mulf %4, %22 : vector<2x8x8xf32>
    %c0_35 = arith.constant 0 : index
    %c1_36 = arith.constant 1 : index
    %24 = memref.load %arg1[%c0_35, %c1_36] : memref<7x9xf32, #tpu.memory_space<smem>>
    %25 = vector.broadcast %24 : f32 to vector<2x8x8xf32>
    %26 = arith.mulf %6, %25 : vector<2x8x8xf32>
    %27 = arith.addf %23, %26 : vector<2x8x8xf32>
    %c0_37 = arith.constant 0 : index
    %c2_38 = arith.constant 2 : index
    %28 = memref.load %arg1[%c0_37, %c2_38] : memref<7x9xf32, #tpu.memory_space<smem>>
    %29 = vector.broadcast %28 : f32 to vector<2x8x8xf32>
    %30 = arith.mulf %8, %29 : vector<2x8x8xf32>
    %31 = arith.addf %27, %30 : vector<2x8x8xf32>
    %c0_39 = arith.constant 0 : index
    %c3_40 = arith.constant 3 : index
    %32 = memref.load %arg1[%c0_39, %c3_40] : memref<7x9xf32, #tpu.memory_space<smem>>
    %33 = vector.broadcast %32 : f32 to vector<2x8x8xf32>
    %34 = arith.mulf %10, %33 : vector<2x8x8xf32>
    %35 = arith.addf %31, %34 : vector<2x8x8xf32>
    %c0_41 = arith.constant 0 : index
    %c4 = arith.constant 4 : index
    %36 = memref.load %arg1[%c0_41, %c4] : memref<7x9xf32, #tpu.memory_space<smem>>
    %37 = vector.broadcast %36 : f32 to vector<2x8x8xf32>
    %38 = arith.mulf %12, %37 : vector<2x8x8xf32>
    %39 = arith.addf %35, %38 : vector<2x8x8xf32>
    %c0_42 = arith.constant 0 : index
    %c5 = arith.constant 5 : index
    %40 = memref.load %arg1[%c0_42, %c5] : memref<7x9xf32, #tpu.memory_space<smem>>
    %41 = vector.broadcast %40 : f32 to vector<2x8x8xf32>
    %42 = arith.mulf %14, %41 : vector<2x8x8xf32>
    %43 = arith.addf %39, %42 : vector<2x8x8xf32>
    %c0_43 = arith.constant 0 : index
    %c6 = arith.constant 6 : index
    %44 = memref.load %arg1[%c0_43, %c6] : memref<7x9xf32, #tpu.memory_space<smem>>
    %45 = vector.broadcast %44 : f32 to vector<2x8x8xf32>
    %46 = arith.mulf %16, %45 : vector<2x8x8xf32>
    %47 = arith.addf %43, %46 : vector<2x8x8xf32>
    %c0_44 = arith.constant 0 : index
    %c7 = arith.constant 7 : index
    %48 = memref.load %arg1[%c0_44, %c7] : memref<7x9xf32, #tpu.memory_space<smem>>
    %49 = vector.broadcast %48 : f32 to vector<2x8x8xf32>
    %50 = arith.mulf %18, %49 : vector<2x8x8xf32>
    %51 = arith.addf %47, %50 : vector<2x8x8xf32>
    %c0_45 = arith.constant 0 : index
    %c8 = arith.constant 8 : index
    %52 = memref.load %arg1[%c0_45, %c8] : memref<7x9xf32, #tpu.memory_space<smem>>
    %53 = vector.broadcast %52 : f32 to vector<2x8x8xf32>
    %54 = arith.mulf %20, %53 : vector<2x8x8xf32>
    %55 = arith.addf %51, %54 : vector<2x8x8xf32>
    %c1_46 = arith.constant 1 : index
    %c0_47 = arith.constant 0 : index
    %56 = memref.load %arg1[%c1_46, %c0_47] : memref<7x9xf32, #tpu.memory_space<smem>>
    %57 = vector.broadcast %56 : f32 to vector<2x8x8xf32>
    %58 = arith.mulf %4, %57 : vector<2x8x8xf32>
    %c1_48 = arith.constant 1 : index
    %c1_49 = arith.constant 1 : index
    %59 = memref.load %arg1[%c1_48, %c1_49] : memref<7x9xf32, #tpu.memory_space<smem>>
    %60 = vector.broadcast %59 : f32 to vector<2x8x8xf32>
    %61 = arith.mulf %6, %60 : vector<2x8x8xf32>
    %62 = arith.addf %58, %61 : vector<2x8x8xf32>
    %c1_50 = arith.constant 1 : index
    %c2_51 = arith.constant 2 : index
    %63 = memref.load %arg1[%c1_50, %c2_51] : memref<7x9xf32, #tpu.memory_space<smem>>
    %64 = vector.broadcast %63 : f32 to vector<2x8x8xf32>
    %65 = arith.mulf %8, %64 : vector<2x8x8xf32>
    %66 = arith.addf %62, %65 : vector<2x8x8xf32>
    %c1_52 = arith.constant 1 : index
    %c3_53 = arith.constant 3 : index
    %67 = memref.load %arg1[%c1_52, %c3_53] : memref<7x9xf32, #tpu.memory_space<smem>>
    %68 = vector.broadcast %67 : f32 to vector<2x8x8xf32>
    %69 = arith.mulf %10, %68 : vector<2x8x8xf32>
    %70 = arith.addf %66, %69 : vector<2x8x8xf32>
    %c1_54 = arith.constant 1 : index
    %c4_55 = arith.constant 4 : index
    %71 = memref.load %arg1[%c1_54, %c4_55] : memref<7x9xf32, #tpu.memory_space<smem>>
    %72 = vector.broadcast %71 : f32 to vector<2x8x8xf32>
    %73 = arith.mulf %12, %72 : vector<2x8x8xf32>
    %74 = arith.addf %70, %73 : vector<2x8x8xf32>
    %c1_56 = arith.constant 1 : index
    %c5_57 = arith.constant 5 : index
    %75 = memref.load %arg1[%c1_56, %c5_57] : memref<7x9xf32, #tpu.memory_space<smem>>
    %76 = vector.broadcast %75 : f32 to vector<2x8x8xf32>
    %77 = arith.mulf %14, %76 : vector<2x8x8xf32>
    %78 = arith.addf %74, %77 : vector<2x8x8xf32>
    %c1_58 = arith.constant 1 : index
    %c6_59 = arith.constant 6 : index
    %79 = memref.load %arg1[%c1_58, %c6_59] : memref<7x9xf32, #tpu.memory_space<smem>>
    %80 = vector.broadcast %79 : f32 to vector<2x8x8xf32>
    %81 = arith.mulf %16, %80 : vector<2x8x8xf32>
    %82 = arith.addf %78, %81 : vector<2x8x8xf32>
    %c1_60 = arith.constant 1 : index
    %c7_61 = arith.constant 7 : index
    %83 = memref.load %arg1[%c1_60, %c7_61] : memref<7x9xf32, #tpu.memory_space<smem>>
    %84 = vector.broadcast %83 : f32 to vector<2x8x8xf32>
    %85 = arith.mulf %18, %84 : vector<2x8x8xf32>
    %86 = arith.addf %82, %85 : vector<2x8x8xf32>
    %c1_62 = arith.constant 1 : index
    %c8_63 = arith.constant 8 : index
    %87 = memref.load %arg1[%c1_62, %c8_63] : memref<7x9xf32, #tpu.memory_space<smem>>
    %88 = vector.broadcast %87 : f32 to vector<2x8x8xf32>
    %89 = arith.mulf %20, %88 : vector<2x8x8xf32>
    %90 = arith.addf %86, %89 : vector<2x8x8xf32>
    %c2_64 = arith.constant 2 : index
    %c0_65 = arith.constant 0 : index
    %91 = memref.load %arg1[%c2_64, %c0_65] : memref<7x9xf32, #tpu.memory_space<smem>>
    %92 = vector.broadcast %91 : f32 to vector<2x8x8xf32>
    %93 = arith.mulf %4, %92 : vector<2x8x8xf32>
    %c2_66 = arith.constant 2 : index
    %c1_67 = arith.constant 1 : index
    %94 = memref.load %arg1[%c2_66, %c1_67] : memref<7x9xf32, #tpu.memory_space<smem>>
    %95 = vector.broadcast %94 : f32 to vector<2x8x8xf32>
    %96 = arith.mulf %6, %95 : vector<2x8x8xf32>
    %97 = arith.addf %93, %96 : vector<2x8x8xf32>
    %c2_68 = arith.constant 2 : index
    %c2_69 = arith.constant 2 : index
    %98 = memref.load %arg1[%c2_68, %c2_69] : memref<7x9xf32, #tpu.memory_space<smem>>
    %99 = vector.broadcast %98 : f32 to vector<2x8x8xf32>
    %100 = arith.mulf %8, %99 : vector<2x8x8xf32>
    %101 = arith.addf %97, %100 : vector<2x8x8xf32>
    %c2_70 = arith.constant 2 : index
    %c3_71 = arith.constant 3 : index
    %102 = memref.load %arg1[%c2_70, %c3_71] : memref<7x9xf32, #tpu.memory_space<smem>>
    %103 = vector.broadcast %102 : f32 to vector<2x8x8xf32>
    %104 = arith.mulf %10, %103 : vector<2x8x8xf32>
    %105 = arith.addf %101, %104 : vector<2x8x8xf32>
    %c2_72 = arith.constant 2 : index
    %c4_73 = arith.constant 4 : index
    %106 = memref.load %arg1[%c2_72, %c4_73] : memref<7x9xf32, #tpu.memory_space<smem>>
    %107 = vector.broadcast %106 : f32 to vector<2x8x8xf32>
    %108 = arith.mulf %12, %107 : vector<2x8x8xf32>
    %109 = arith.addf %105, %108 : vector<2x8x8xf32>
    %c2_74 = arith.constant 2 : index
    %c5_75 = arith.constant 5 : index
    %110 = memref.load %arg1[%c2_74, %c5_75] : memref<7x9xf32, #tpu.memory_space<smem>>
    %111 = vector.broadcast %110 : f32 to vector<2x8x8xf32>
    %112 = arith.mulf %14, %111 : vector<2x8x8xf32>
    %113 = arith.addf %109, %112 : vector<2x8x8xf32>
    %c2_76 = arith.constant 2 : index
    %c6_77 = arith.constant 6 : index
    %114 = memref.load %arg1[%c2_76, %c6_77] : memref<7x9xf32, #tpu.memory_space<smem>>
    %115 = vector.broadcast %114 : f32 to vector<2x8x8xf32>
    %116 = arith.mulf %16, %115 : vector<2x8x8xf32>
    %117 = arith.addf %113, %116 : vector<2x8x8xf32>
    %c2_78 = arith.constant 2 : index
    %c7_79 = arith.constant 7 : index
    %118 = memref.load %arg1[%c2_78, %c7_79] : memref<7x9xf32, #tpu.memory_space<smem>>
    %119 = vector.broadcast %118 : f32 to vector<2x8x8xf32>
    %120 = arith.mulf %18, %119 : vector<2x8x8xf32>
    %121 = arith.addf %117, %120 : vector<2x8x8xf32>
    %c2_80 = arith.constant 2 : index
    %c8_81 = arith.constant 8 : index
    %122 = memref.load %arg1[%c2_80, %c8_81] : memref<7x9xf32, #tpu.memory_space<smem>>
    %123 = vector.broadcast %122 : f32 to vector<2x8x8xf32>
    %124 = arith.mulf %20, %123 : vector<2x8x8xf32>
    %125 = arith.addf %121, %124 : vector<2x8x8xf32>
    %c3_82 = arith.constant 3 : index
    %c0_83 = arith.constant 0 : index
    %126 = memref.load %arg1[%c3_82, %c0_83] : memref<7x9xf32, #tpu.memory_space<smem>>
    %127 = vector.broadcast %126 : f32 to vector<2x8x8xf32>
    %128 = arith.mulf %4, %127 : vector<2x8x8xf32>
    %c3_84 = arith.constant 3 : index
    %c1_85 = arith.constant 1 : index
    %129 = memref.load %arg1[%c3_84, %c1_85] : memref<7x9xf32, #tpu.memory_space<smem>>
    %130 = vector.broadcast %129 : f32 to vector<2x8x8xf32>
    %131 = arith.mulf %6, %130 : vector<2x8x8xf32>
    %132 = arith.addf %128, %131 : vector<2x8x8xf32>
    %c3_86 = arith.constant 3 : index
    %c2_87 = arith.constant 2 : index
    %133 = memref.load %arg1[%c3_86, %c2_87] : memref<7x9xf32, #tpu.memory_space<smem>>
    %134 = vector.broadcast %133 : f32 to vector<2x8x8xf32>
    %135 = arith.mulf %8, %134 : vector<2x8x8xf32>
    %136 = arith.addf %132, %135 : vector<2x8x8xf32>
    %c3_88 = arith.constant 3 : index
    %c3_89 = arith.constant 3 : index
    %137 = memref.load %arg1[%c3_88, %c3_89] : memref<7x9xf32, #tpu.memory_space<smem>>
    %138 = vector.broadcast %137 : f32 to vector<2x8x8xf32>
    %139 = arith.mulf %10, %138 : vector<2x8x8xf32>
    %140 = arith.addf %136, %139 : vector<2x8x8xf32>
    %c3_90 = arith.constant 3 : index
    %c4_91 = arith.constant 4 : index
    %141 = memref.load %arg1[%c3_90, %c4_91] : memref<7x9xf32, #tpu.memory_space<smem>>
    %142 = vector.broadcast %141 : f32 to vector<2x8x8xf32>
    %143 = arith.mulf %12, %142 : vector<2x8x8xf32>
    %144 = arith.addf %140, %143 : vector<2x8x8xf32>
    %c3_92 = arith.constant 3 : index
    %c5_93 = arith.constant 5 : index
    %145 = memref.load %arg1[%c3_92, %c5_93] : memref<7x9xf32, #tpu.memory_space<smem>>
    %146 = vector.broadcast %145 : f32 to vector<2x8x8xf32>
    %147 = arith.mulf %14, %146 : vector<2x8x8xf32>
    %148 = arith.addf %144, %147 : vector<2x8x8xf32>
    %c3_94 = arith.constant 3 : index
    %c6_95 = arith.constant 6 : index
    %149 = memref.load %arg1[%c3_94, %c6_95] : memref<7x9xf32, #tpu.memory_space<smem>>
    %150 = vector.broadcast %149 : f32 to vector<2x8x8xf32>
    %151 = arith.mulf %16, %150 : vector<2x8x8xf32>
    %152 = arith.addf %148, %151 : vector<2x8x8xf32>
    %c3_96 = arith.constant 3 : index
    %c7_97 = arith.constant 7 : index
    %153 = memref.load %arg1[%c3_96, %c7_97] : memref<7x9xf32, #tpu.memory_space<smem>>
    %154 = vector.broadcast %153 : f32 to vector<2x8x8xf32>
    %155 = arith.mulf %18, %154 : vector<2x8x8xf32>
    %156 = arith.addf %152, %155 : vector<2x8x8xf32>
    %c3_98 = arith.constant 3 : index
    %c8_99 = arith.constant 8 : index
    %157 = memref.load %arg1[%c3_98, %c8_99] : memref<7x9xf32, #tpu.memory_space<smem>>
    %158 = vector.broadcast %157 : f32 to vector<2x8x8xf32>
    %159 = arith.mulf %20, %158 : vector<2x8x8xf32>
    %160 = arith.addf %156, %159 : vector<2x8x8xf32>
    %c4_100 = arith.constant 4 : index
    %c0_101 = arith.constant 0 : index
    %161 = memref.load %arg1[%c4_100, %c0_101] : memref<7x9xf32, #tpu.memory_space<smem>>
    %162 = vector.broadcast %161 : f32 to vector<2x8x8xf32>
    %163 = arith.mulf %4, %162 : vector<2x8x8xf32>
    %c4_102 = arith.constant 4 : index
    %c1_103 = arith.constant 1 : index
    %164 = memref.load %arg1[%c4_102, %c1_103] : memref<7x9xf32, #tpu.memory_space<smem>>
    %165 = vector.broadcast %164 : f32 to vector<2x8x8xf32>
    %166 = arith.mulf %6, %165 : vector<2x8x8xf32>
    %167 = arith.addf %163, %166 : vector<2x8x8xf32>
    %c4_104 = arith.constant 4 : index
    %c2_105 = arith.constant 2 : index
    %168 = memref.load %arg1[%c4_104, %c2_105] : memref<7x9xf32, #tpu.memory_space<smem>>
    %169 = vector.broadcast %168 : f32 to vector<2x8x8xf32>
    %170 = arith.mulf %8, %169 : vector<2x8x8xf32>
    %171 = arith.addf %167, %170 : vector<2x8x8xf32>
    %c4_106 = arith.constant 4 : index
    %c3_107 = arith.constant 3 : index
    %172 = memref.load %arg1[%c4_106, %c3_107] : memref<7x9xf32, #tpu.memory_space<smem>>
    %173 = vector.broadcast %172 : f32 to vector<2x8x8xf32>
    %174 = arith.mulf %10, %173 : vector<2x8x8xf32>
    %175 = arith.addf %171, %174 : vector<2x8x8xf32>
    %c4_108 = arith.constant 4 : index
    %c4_109 = arith.constant 4 : index
    %176 = memref.load %arg1[%c4_108, %c4_109] : memref<7x9xf32, #tpu.memory_space<smem>>
    %177 = vector.broadcast %176 : f32 to vector<2x8x8xf32>
    %178 = arith.mulf %12, %177 : vector<2x8x8xf32>
    %179 = arith.addf %175, %178 : vector<2x8x8xf32>
    %c4_110 = arith.constant 4 : index
    %c5_111 = arith.constant 5 : index
    %180 = memref.load %arg1[%c4_110, %c5_111] : memref<7x9xf32, #tpu.memory_space<smem>>
    %181 = vector.broadcast %180 : f32 to vector<2x8x8xf32>
    %182 = arith.mulf %14, %181 : vector<2x8x8xf32>
    %183 = arith.addf %179, %182 : vector<2x8x8xf32>
    %c4_112 = arith.constant 4 : index
    %c6_113 = arith.constant 6 : index
    %184 = memref.load %arg1[%c4_112, %c6_113] : memref<7x9xf32, #tpu.memory_space<smem>>
    %185 = vector.broadcast %184 : f32 to vector<2x8x8xf32>
    %186 = arith.mulf %16, %185 : vector<2x8x8xf32>
    %187 = arith.addf %183, %186 : vector<2x8x8xf32>
    %c4_114 = arith.constant 4 : index
    %c7_115 = arith.constant 7 : index
    %188 = memref.load %arg1[%c4_114, %c7_115] : memref<7x9xf32, #tpu.memory_space<smem>>
    %189 = vector.broadcast %188 : f32 to vector<2x8x8xf32>
    %190 = arith.mulf %18, %189 : vector<2x8x8xf32>
    %191 = arith.addf %187, %190 : vector<2x8x8xf32>
    %c4_116 = arith.constant 4 : index
    %c8_117 = arith.constant 8 : index
    %192 = memref.load %arg1[%c4_116, %c8_117] : memref<7x9xf32, #tpu.memory_space<smem>>
    %193 = vector.broadcast %192 : f32 to vector<2x8x8xf32>
    %194 = arith.mulf %20, %193 : vector<2x8x8xf32>
    %195 = arith.addf %191, %194 : vector<2x8x8xf32>
    %c5_118 = arith.constant 5 : index
    %c0_119 = arith.constant 0 : index
    %196 = memref.load %arg1[%c5_118, %c0_119] : memref<7x9xf32, #tpu.memory_space<smem>>
    %197 = vector.broadcast %196 : f32 to vector<2x8x8xf32>
    %198 = arith.mulf %4, %197 : vector<2x8x8xf32>
    %c5_120 = arith.constant 5 : index
    %c1_121 = arith.constant 1 : index
    %199 = memref.load %arg1[%c5_120, %c1_121] : memref<7x9xf32, #tpu.memory_space<smem>>
    %200 = vector.broadcast %199 : f32 to vector<2x8x8xf32>
    %201 = arith.mulf %6, %200 : vector<2x8x8xf32>
    %202 = arith.addf %198, %201 : vector<2x8x8xf32>
    %c5_122 = arith.constant 5 : index
    %c2_123 = arith.constant 2 : index
    %203 = memref.load %arg1[%c5_122, %c2_123] : memref<7x9xf32, #tpu.memory_space<smem>>
    %204 = vector.broadcast %203 : f32 to vector<2x8x8xf32>
    %205 = arith.mulf %8, %204 : vector<2x8x8xf32>
    %206 = arith.addf %202, %205 : vector<2x8x8xf32>
    %c5_124 = arith.constant 5 : index
    %c3_125 = arith.constant 3 : index
    %207 = memref.load %arg1[%c5_124, %c3_125] : memref<7x9xf32, #tpu.memory_space<smem>>
    %208 = vector.broadcast %207 : f32 to vector<2x8x8xf32>
    %209 = arith.mulf %10, %208 : vector<2x8x8xf32>
    %210 = arith.addf %206, %209 : vector<2x8x8xf32>
    %c5_126 = arith.constant 5 : index
    %c4_127 = arith.constant 4 : index
    %211 = memref.load %arg1[%c5_126, %c4_127] : memref<7x9xf32, #tpu.memory_space<smem>>
    %212 = vector.broadcast %211 : f32 to vector<2x8x8xf32>
    %213 = arith.mulf %12, %212 : vector<2x8x8xf32>
    %214 = arith.addf %210, %213 : vector<2x8x8xf32>
    %c5_128 = arith.constant 5 : index
    %c5_129 = arith.constant 5 : index
    %215 = memref.load %arg1[%c5_128, %c5_129] : memref<7x9xf32, #tpu.memory_space<smem>>
    %216 = vector.broadcast %215 : f32 to vector<2x8x8xf32>
    %217 = arith.mulf %14, %216 : vector<2x8x8xf32>
    %218 = arith.addf %214, %217 : vector<2x8x8xf32>
    %c5_130 = arith.constant 5 : index
    %c6_131 = arith.constant 6 : index
    %219 = memref.load %arg1[%c5_130, %c6_131] : memref<7x9xf32, #tpu.memory_space<smem>>
    %220 = vector.broadcast %219 : f32 to vector<2x8x8xf32>
    %221 = arith.mulf %16, %220 : vector<2x8x8xf32>
    %222 = arith.addf %218, %221 : vector<2x8x8xf32>
    %c5_132 = arith.constant 5 : index
    %c7_133 = arith.constant 7 : index
    %223 = memref.load %arg1[%c5_132, %c7_133] : memref<7x9xf32, #tpu.memory_space<smem>>
    %224 = vector.broadcast %223 : f32 to vector<2x8x8xf32>
    %225 = arith.mulf %18, %224 : vector<2x8x8xf32>
    %226 = arith.addf %222, %225 : vector<2x8x8xf32>
    %c5_134 = arith.constant 5 : index
    %c8_135 = arith.constant 8 : index
    %227 = memref.load %arg1[%c5_134, %c8_135] : memref<7x9xf32, #tpu.memory_space<smem>>
    %228 = vector.broadcast %227 : f32 to vector<2x8x8xf32>
    %229 = arith.mulf %20, %228 : vector<2x8x8xf32>
    %230 = arith.addf %226, %229 : vector<2x8x8xf32>
    %c6_136 = arith.constant 6 : index
    %c0_137 = arith.constant 0 : index
    %231 = memref.load %arg1[%c6_136, %c0_137] : memref<7x9xf32, #tpu.memory_space<smem>>
    %232 = vector.broadcast %231 : f32 to vector<2x8x8xf32>
    %233 = arith.mulf %4, %232 : vector<2x8x8xf32>
    %c6_138 = arith.constant 6 : index
    %c1_139 = arith.constant 1 : index
    %234 = memref.load %arg1[%c6_138, %c1_139] : memref<7x9xf32, #tpu.memory_space<smem>>
    %235 = vector.broadcast %234 : f32 to vector<2x8x8xf32>
    %236 = arith.mulf %6, %235 : vector<2x8x8xf32>
    %237 = arith.addf %233, %236 : vector<2x8x8xf32>
    %c6_140 = arith.constant 6 : index
    %c2_141 = arith.constant 2 : index
    %238 = memref.load %arg1[%c6_140, %c2_141] : memref<7x9xf32, #tpu.memory_space<smem>>
    %239 = vector.broadcast %238 : f32 to vector<2x8x8xf32>
    %240 = arith.mulf %8, %239 : vector<2x8x8xf32>
    %241 = arith.addf %237, %240 : vector<2x8x8xf32>
    %c6_142 = arith.constant 6 : index
    %c3_143 = arith.constant 3 : index
    %242 = memref.load %arg1[%c6_142, %c3_143] : memref<7x9xf32, #tpu.memory_space<smem>>
    %243 = vector.broadcast %242 : f32 to vector<2x8x8xf32>
    %244 = arith.mulf %10, %243 : vector<2x8x8xf32>
    %245 = arith.addf %241, %244 : vector<2x8x8xf32>
    %c6_144 = arith.constant 6 : index
    %c4_145 = arith.constant 4 : index
    %246 = memref.load %arg1[%c6_144, %c4_145] : memref<7x9xf32, #tpu.memory_space<smem>>
    %247 = vector.broadcast %246 : f32 to vector<2x8x8xf32>
    %248 = arith.mulf %12, %247 : vector<2x8x8xf32>
    %249 = arith.addf %245, %248 : vector<2x8x8xf32>
    %c6_146 = arith.constant 6 : index
    %c5_147 = arith.constant 5 : index
    %250 = memref.load %arg1[%c6_146, %c5_147] : memref<7x9xf32, #tpu.memory_space<smem>>
    %251 = vector.broadcast %250 : f32 to vector<2x8x8xf32>
    %252 = arith.mulf %14, %251 : vector<2x8x8xf32>
    %253 = arith.addf %249, %252 : vector<2x8x8xf32>
    %c6_148 = arith.constant 6 : index
    %c6_149 = arith.constant 6 : index
    %254 = memref.load %arg1[%c6_148, %c6_149] : memref<7x9xf32, #tpu.memory_space<smem>>
    %255 = vector.broadcast %254 : f32 to vector<2x8x8xf32>
    %256 = arith.mulf %16, %255 : vector<2x8x8xf32>
    %257 = arith.addf %253, %256 : vector<2x8x8xf32>
    %c6_150 = arith.constant 6 : index
    %c7_151 = arith.constant 7 : index
    %258 = memref.load %arg1[%c6_150, %c7_151] : memref<7x9xf32, #tpu.memory_space<smem>>
    %259 = vector.broadcast %258 : f32 to vector<2x8x8xf32>
    %260 = arith.mulf %18, %259 : vector<2x8x8xf32>
    %261 = arith.addf %257, %260 : vector<2x8x8xf32>
    %c6_152 = arith.constant 6 : index
    %c8_153 = arith.constant 8 : index
    %262 = memref.load %arg1[%c6_152, %c8_153] : memref<7x9xf32, #tpu.memory_space<smem>>
    %263 = vector.broadcast %262 : f32 to vector<2x8x8xf32>
    %264 = arith.mulf %20, %263 : vector<2x8x8xf32>
    %265 = arith.addf %261, %264 : vector<2x8x8xf32>
    %266 = tpu.iota {dimensions = array<i32: 0>} : vector<8x8xi32>
    %267 = tpu.iota {dimensions = array<i32: 1>} : vector<8x8xi32>
    %c0_i32_154 = arith.constant 0 : i32
    %268 = vector.broadcast %c0_i32_154 : i32 to vector<8x8xi32>
    %269 = arith.cmpi eq, %266, %268 : vector<8x8xi32>
    %c0_i32_155 = arith.constant 0 : i32
    %270 = vector.broadcast %c0_i32_155 : i32 to vector<8x8xi32>
    %271 = arith.cmpi eq, %267, %270 : vector<8x8xi32>
    %272 = arith.ori %269, %271 : vector<8x8xi1>
    %273 = vector.shape_cast %272 : vector<8x8xi1> to vector<1x8x8xi1>
    %cst = arith.constant 0xFF800000 : f32
    %274 = vector.shape_cast %273 : vector<1x8x8xi1> to vector<1x8x8xi1>
    %275 = vector.broadcast %274 : vector<1x8x8xi1> to vector<2x8x8xi1>
    %276 = vector.broadcast %cst : f32 to vector<2x8x8xf32>
    %277 = arith.select %275, %276, %4 : vector<2x8x8xi1>, vector<2x8x8xf32>
    %278 = arith.maximumf %6, %8 : vector<2x8x8xf32>
    %279 = vector.shape_cast %269 : vector<8x8xi1> to vector<1x8x8xi1>
    %cst_156 = arith.constant 0xFF800000 : f32
    %280 = vector.shape_cast %279 : vector<1x8x8xi1> to vector<1x8x8xi1>
    %281 = vector.broadcast %280 : vector<1x8x8xi1> to vector<2x8x8xi1>
    %282 = vector.broadcast %cst_156 : f32 to vector<2x8x8xf32>
    %283 = arith.select %281, %282, %278 : vector<2x8x8xi1>, vector<2x8x8xf32>
    %284 = arith.maximumf %277, %283 : vector<2x8x8xf32>
    %285 = arith.maximumf %10, %16 : vector<2x8x8xf32>
    %286 = vector.shape_cast %271 : vector<8x8xi1> to vector<1x8x8xi1>
    %cst_157 = arith.constant 0xFF800000 : f32
    %287 = vector.shape_cast %286 : vector<1x8x8xi1> to vector<1x8x8xi1>
    %288 = vector.broadcast %287 : vector<1x8x8xi1> to vector<2x8x8xi1>
    %289 = vector.broadcast %cst_157 : f32 to vector<2x8x8xf32>
    %290 = arith.select %288, %289, %285 : vector<2x8x8xi1>, vector<2x8x8xf32>
    %291 = arith.maximumf %284, %290 : vector<2x8x8xf32>
    %292 = arith.maximumf %12, %14 : vector<2x8x8xf32>
    %293 = arith.maximumf %292, %18 : vector<2x8x8xf32>
    %294 = arith.maximumf %293, %20 : vector<2x8x8xf32>
    %295 = arith.maximumf %291, %294 : vector<2x8x8xf32>
    %296 = vector.shape_cast %55 : vector<2x8x8xf32> to vector<1x2x8x8xf32>
    %297 = vector.shape_cast %90 : vector<2x8x8xf32> to vector<1x2x8x8xf32>
    %298 = vector.shape_cast %125 : vector<2x8x8xf32> to vector<1x2x8x8xf32>
    %299 = vector.shape_cast %160 : vector<2x8x8xf32> to vector<1x2x8x8xf32>
    %300 = vector.shape_cast %195 : vector<2x8x8xf32> to vector<1x2x8x8xf32>
    %301 = vector.shape_cast %230 : vector<2x8x8xf32> to vector<1x2x8x8xf32>
    %302 = vector.shape_cast %265 : vector<2x8x8xf32> to vector<1x2x8x8xf32>
    %303 = vector.shape_cast %295 : vector<2x8x8xf32> to vector<1x2x8x8xf32>
    %304 = tpu.concatenate %296, %297, %298, %299, %300, %301, %302, %303 in 0 : vector<1x2x8x8xf32>, vector<1x2x8x8xf32>, vector<1x2x8x8xf32>, vector<1x2x8x8xf32>, vector<1x2x8x8xf32>, vector<1x2x8x8xf32>, vector<1x2x8x8xf32>, vector<1x2x8x8xf32> -> vector<8x2x8x8xf32>
    %cst_158 = arith.constant dense<0.000000e+00> : vector<8x2x8xf32>
    %305 = vector.multi_reduction <add>, %304, %cst_158 [3] : vector<8x2x8x8xf32> to vector<8x2x8xf32>
    %cst_159 = arith.constant dense<0.000000e+00> : vector<8x2xf32>
    %306 = vector.multi_reduction <add>, %305, %cst_159 [2] : vector<8x2x8xf32> to vector<8x2xf32>
    %cst_160 = arith.constant dense<0.000000e+00> : vector<8xf32>
    %307 = vector.multi_reduction <add>, %306, %cst_160 [1] : vector<8x2xf32> to vector<8xf32>
    %308 = arith.mulf %304, %304 : vector<8x2x8x8xf32>
    %cst_161 = arith.constant dense<0.000000e+00> : vector<8x2x8xf32>
    %309 = vector.multi_reduction <add>, %308, %cst_161 [3] : vector<8x2x8x8xf32> to vector<8x2x8xf32>
    %cst_162 = arith.constant dense<0.000000e+00> : vector<8x2xf32>
    %310 = vector.multi_reduction <add>, %309, %cst_162 [2] : vector<8x2x8xf32> to vector<8x2xf32>
    %cst_163 = arith.constant dense<0.000000e+00> : vector<8xf32>
    %311 = vector.multi_reduction <add>, %310, %cst_163 [1] : vector<8x2xf32> to vector<8xf32>
    %c0_164 = arith.constant 0 : index
    %c0_165 = arith.constant 0 : index
    %312 = vector.load %arg3[%c0_164, %c0_165] : memref<2x8xf32, #tpu.memory_space<vmem>>, vector<2x8xf32>
    %313 = vector.shape_cast %307 : vector<8xf32> to vector<1x8xf32>
    %314 = vector.shape_cast %311 : vector<8xf32> to vector<1x8xf32>
    %315 = tpu.concatenate %313, %314 in 0 : vector<1x8xf32>, vector<1x8xf32> -> vector<2x8xf32>
    %316 = arith.addf %312, %315 : vector<2x8xf32>
    %c0_166 = arith.constant 0 : index
    %c0_167 = arith.constant 0 : index
    %317 = vector.load %arg3[%c0_166, %c0_167] : memref<2x8xf32, #tpu.memory_space<vmem>>, vector<2x8xf32>
    tpu.vector_store %arg3[%c0_166, %c0_167], %316 {strides = array<i32>} : memref<2x8xf32, #tpu.memory_space<vmem>>, vector<2x8xf32>,
    return
  }
  func.func @transform_0(%arg0: i32) -> (i32, i32) {
    %c0_i32 = arith.constant 0 : i32
    %c0_i32_0 = arith.constant 0 : i32
    %c0_i32_1 = arith.constant 0 : i32
    return %c0_i32, %c0_i32_0 : i32, i32
  }
  func.func @transform_1(%arg0: i32) -> (i32, i32, i32, i32) {
    %c0_i32 = arith.constant 0 : i32
    %c0_i32_0 = arith.constant 0 : i32
    %c0_i32_1 = arith.constant 0 : i32
    %c0_i32_2 = arith.constant 0 : i32
    return %arg0, %c0_i32, %c0_i32_0, %c0_i32_1 : i32, i32, i32, i32
  }
  func.func @transform_2(%arg0: i32) -> (i32, i32) {
    %c0_i32 = arith.constant 0 : i32
    %c0_i32_0 = arith.constant 0 : i32
    %c0_i32_1 = arith.constant 0 : i32
    return %c0_i32, %c0_i32_0 : i32, i32
  }
}

module attributes {stable_mosaic.version = 11 : i64} {
  func.func @apply_kernel(%arg0: i32, %arg1: memref<7x9xf32, #tpu.memory_space<smem>>, %arg2: memref<2x8xf32, #tpu.memory_space<smem>>, %arg3: memref<2x4x9x9xf32, #tpu.memory_space<vmem>>, %arg4: memref<2x8x8x8xf32, #tpu.memory_space<vmem>>) attributes {dimension_semantics = [#tpu.dimension_semantics<parallel>], iteration_bounds = array<i64: 1>, scalar_prefetch = 0 : i64, scratch_operands = 0 : i64, tpu.core_type = #tpu.core_type<tc>, window_params = [{transform_indices = @transform_0, window_bounds = array<i64: 7, 9>}, {transform_indices = @transform_1, window_bounds = array<i64: 2, 8>}, {transform_indices = @transform_2, window_bounds = array<i64: 2, 4, 9, 9>}, {transform_indices = @transform_3, window_bounds = array<i64: 2, 8, 8, 8>}]} {
    %c0 = arith.constant 0 : index
    %c0_0 = arith.constant 0 : index
    %c0_1 = arith.constant 0 : index
    %c0_2 = arith.constant 0 : index
    %0 = vector.load %arg3[%c0, %c0_0, %c0_1, %c0_2] : memref<2x4x9x9xf32, #tpu.memory_space<vmem>>, vector<2x1x8x8xf32>
    %1 = vector.shape_cast %0 : vector<2x1x8x8xf32> to vector<2x8x8xf32>
    %c0_3 = arith.constant 0 : index
    %c1 = arith.constant 1 : index
    %c0_4 = arith.constant 0 : index
    %c0_5 = arith.constant 0 : index
    %2 = vector.load %arg3[%c0_3, %c1, %c0_4, %c0_5] : memref<2x4x9x9xf32, #tpu.memory_space<vmem>>, vector<2x1x8x8xf32>
    %3 = vector.shape_cast %2 : vector<2x1x8x8xf32> to vector<2x8x8xf32>
    %c0_6 = arith.constant 0 : index
    %c0_7 = arith.constant 0 : index
    %c0_8 = arith.constant 0 : index
    %c1_9 = arith.constant 1 : index
    %4 = vector.load %arg3[%c0_6, %c0_7, %c0_8, %c1_9] : memref<2x4x9x9xf32, #tpu.memory_space<vmem>>, vector<2x1x8x8xf32>
    %5 = vector.shape_cast %4 : vector<2x1x8x8xf32> to vector<2x8x8xf32>
    %c0_10 = arith.constant 0 : index
    %c2 = arith.constant 2 : index
    %c0_11 = arith.constant 0 : index
    %c0_12 = arith.constant 0 : index
    %6 = vector.load %arg3[%c0_10, %c2, %c0_11, %c0_12] : memref<2x4x9x9xf32, #tpu.memory_space<vmem>>, vector<2x1x8x8xf32>
    %7 = vector.shape_cast %6 : vector<2x1x8x8xf32> to vector<2x8x8xf32>
    %c0_13 = arith.constant 0 : index
    %c3 = arith.constant 3 : index
    %c0_14 = arith.constant 0 : index
    %c0_15 = arith.constant 0 : index
    %8 = vector.load %arg3[%c0_13, %c3, %c0_14, %c0_15] : memref<2x4x9x9xf32, #tpu.memory_space<vmem>>, vector<2x1x8x8xf32>
    %9 = vector.shape_cast %8 : vector<2x1x8x8xf32> to vector<2x8x8xf32>
    %c0_16 = arith.constant 0 : index
    %c2_17 = arith.constant 2 : index
    %c0_18 = arith.constant 0 : index
    %c1_19 = arith.constant 1 : index
    %10 = vector.load %arg3[%c0_16, %c2_17, %c0_18, %c1_19] : memref<2x4x9x9xf32, #tpu.memory_space<vmem>>, vector<2x1x8x8xf32>
    %11 = vector.shape_cast %10 : vector<2x1x8x8xf32> to vector<2x8x8xf32>
    %c0_20 = arith.constant 0 : index
    %c0_21 = arith.constant 0 : index
    %c1_22 = arith.constant 1 : index
    %c0_23 = arith.constant 0 : index
    %12 = vector.load %arg3[%c0_20, %c0_21, %c1_22, %c0_23] : memref<2x4x9x9xf32, #tpu.memory_space<vmem>>, vector<2x1x8x8xf32>
    %13 = vector.shape_cast %12 : vector<2x1x8x8xf32> to vector<2x8x8xf32>
    %c0_24 = arith.constant 0 : index
    %c1_25 = arith.constant 1 : index
    %c1_26 = arith.constant 1 : index
    %c0_27 = arith.constant 0 : index
    %14 = vector.load %arg3[%c0_24, %c1_25, %c1_26, %c0_27] : memref<2x4x9x9xf32, #tpu.memory_space<vmem>>, vector<2x1x8x8xf32>
    %15 = vector.shape_cast %14 : vector<2x1x8x8xf32> to vector<2x8x8xf32>
    %c0_28 = arith.constant 0 : index
    %c0_29 = arith.constant 0 : index
    %c1_30 = arith.constant 1 : index
    %c1_31 = arith.constant 1 : index
    %16 = vector.load %arg3[%c0_28, %c0_29, %c1_30, %c1_31] : memref<2x4x9x9xf32, #tpu.memory_space<vmem>>, vector<2x1x8x8xf32>
    %17 = vector.shape_cast %16 : vector<2x1x8x8xf32> to vector<2x8x8xf32>
    %c0_32 = arith.constant 0 : index
    %c0_33 = arith.constant 0 : index
    %18 = memref.load %arg1[%c0_32, %c0_33] : memref<7x9xf32, #tpu.memory_space<smem>>
    %19 = vector.broadcast %18 : f32 to vector<2x8x8xf32>
    %20 = arith.mulf %1, %19 : vector<2x8x8xf32>
    %c0_34 = arith.constant 0 : index
    %c1_35 = arith.constant 1 : index
    %21 = memref.load %arg1[%c0_34, %c1_35] : memref<7x9xf32, #tpu.memory_space<smem>>
    %22 = vector.broadcast %21 : f32 to vector<2x8x8xf32>
    %23 = arith.mulf %3, %22 : vector<2x8x8xf32>
    %24 = arith.addf %20, %23 : vector<2x8x8xf32>
    %c0_36 = arith.constant 0 : index
    %c2_37 = arith.constant 2 : index
    %25 = memref.load %arg1[%c0_36, %c2_37] : memref<7x9xf32, #tpu.memory_space<smem>>
    %26 = vector.broadcast %25 : f32 to vector<2x8x8xf32>
    %27 = arith.mulf %5, %26 : vector<2x8x8xf32>
    %28 = arith.addf %24, %27 : vector<2x8x8xf32>
    %c0_38 = arith.constant 0 : index
    %c3_39 = arith.constant 3 : index
    %29 = memref.load %arg1[%c0_38, %c3_39] : memref<7x9xf32, #tpu.memory_space<smem>>
    %30 = vector.broadcast %29 : f32 to vector<2x8x8xf32>
    %31 = arith.mulf %7, %30 : vector<2x8x8xf32>
    %32 = arith.addf %28, %31 : vector<2x8x8xf32>
    %c0_40 = arith.constant 0 : index
    %c4 = arith.constant 4 : index
    %33 = memref.load %arg1[%c0_40, %c4] : memref<7x9xf32, #tpu.memory_space<smem>>
    %34 = vector.broadcast %33 : f32 to vector<2x8x8xf32>
    %35 = arith.mulf %9, %34 : vector<2x8x8xf32>
    %36 = arith.addf %32, %35 : vector<2x8x8xf32>
    %c0_41 = arith.constant 0 : index
    %c5 = arith.constant 5 : index
    %37 = memref.load %arg1[%c0_41, %c5] : memref<7x9xf32, #tpu.memory_space<smem>>
    %38 = vector.broadcast %37 : f32 to vector<2x8x8xf32>
    %39 = arith.mulf %11, %38 : vector<2x8x8xf32>
    %40 = arith.addf %36, %39 : vector<2x8x8xf32>
    %c0_42 = arith.constant 0 : index
    %c6 = arith.constant 6 : index
    %41 = memref.load %arg1[%c0_42, %c6] : memref<7x9xf32, #tpu.memory_space<smem>>
    %42 = vector.broadcast %41 : f32 to vector<2x8x8xf32>
    %43 = arith.mulf %13, %42 : vector<2x8x8xf32>
    %44 = arith.addf %40, %43 : vector<2x8x8xf32>
    %c0_43 = arith.constant 0 : index
    %c7 = arith.constant 7 : index
    %45 = memref.load %arg1[%c0_43, %c7] : memref<7x9xf32, #tpu.memory_space<smem>>
    %46 = vector.broadcast %45 : f32 to vector<2x8x8xf32>
    %47 = arith.mulf %15, %46 : vector<2x8x8xf32>
    %48 = arith.addf %44, %47 : vector<2x8x8xf32>
    %c0_44 = arith.constant 0 : index
    %c8 = arith.constant 8 : index
    %49 = memref.load %arg1[%c0_44, %c8] : memref<7x9xf32, #tpu.memory_space<smem>>
    %50 = vector.broadcast %49 : f32 to vector<2x8x8xf32>
    %51 = arith.mulf %17, %50 : vector<2x8x8xf32>
    %52 = arith.addf %48, %51 : vector<2x8x8xf32>
    %c1_45 = arith.constant 1 : index
    %c0_46 = arith.constant 0 : index
    %53 = memref.load %arg2[%c1_45, %c0_46] : memref<2x8xf32, #tpu.memory_space<smem>>
    %54 = vector.broadcast %53 : f32 to vector<2x8x8xf32>
    %55 = arith.addf %52, %54 : vector<2x8x8xf32>
    %cst = arith.constant 0.000000e+00 : f32
    %56 = vector.broadcast %cst : f32 to vector<2x8x8xf32>
    %57 = arith.maximumf %55, %56 : vector<2x8x8xf32>
    %c0_47 = arith.constant 0 : index
    %c0_48 = arith.constant 0 : index
    %c0_49 = arith.constant 0 : index
    %c0_50 = arith.constant 0 : index
    %58 = vector.load %arg4[%c0_47, %c0_48, %c0_49, %c0_50] : memref<2x8x8x8xf32, #tpu.memory_space<vmem>>, vector<2x1x8x8xf32>
    %59 = vector.shape_cast %58 : vector<2x1x8x8xf32> to vector<2x8x8xf32>
    %60 = vector.shape_cast %57 : vector<2x8x8xf32> to vector<2x1x8x8xf32>
    tpu.vector_store %arg4[%c0_47, %c0_48, %c0_49, %c0_50], %60 {strides = array<i32>} : memref<2x8x8x8xf32, #tpu.memory_space<vmem>>, vector<2x1x8x8xf32>,
    %c1_51 = arith.constant 1 : index
    %c0_52 = arith.constant 0 : index
    %61 = memref.load %arg1[%c1_51, %c0_52] : memref<7x9xf32, #tpu.memory_space<smem>>
    %62 = vector.broadcast %61 : f32 to vector<2x8x8xf32>
    %63 = arith.mulf %1, %62 : vector<2x8x8xf32>
    %c1_53 = arith.constant 1 : index
    %c1_54 = arith.constant 1 : index
    %64 = memref.load %arg1[%c1_53, %c1_54] : memref<7x9xf32, #tpu.memory_space<smem>>
    %65 = vector.broadcast %64 : f32 to vector<2x8x8xf32>
    %66 = arith.mulf %3, %65 : vector<2x8x8xf32>
    %67 = arith.addf %63, %66 : vector<2x8x8xf32>
    %c1_55 = arith.constant 1 : index
    %c2_56 = arith.constant 2 : index
    %68 = memref.load %arg1[%c1_55, %c2_56] : memref<7x9xf32, #tpu.memory_space<smem>>
    %69 = vector.broadcast %68 : f32 to vector<2x8x8xf32>
    %70 = arith.mulf %5, %69 : vector<2x8x8xf32>
    %71 = arith.addf %67, %70 : vector<2x8x8xf32>
    %c1_57 = arith.constant 1 : index
    %c3_58 = arith.constant 3 : index
    %72 = memref.load %arg1[%c1_57, %c3_58] : memref<7x9xf32, #tpu.memory_space<smem>>
    %73 = vector.broadcast %72 : f32 to vector<2x8x8xf32>
    %74 = arith.mulf %7, %73 : vector<2x8x8xf32>
    %75 = arith.addf %71, %74 : vector<2x8x8xf32>
    %c1_59 = arith.constant 1 : index
    %c4_60 = arith.constant 4 : index
    %76 = memref.load %arg1[%c1_59, %c4_60] : memref<7x9xf32, #tpu.memory_space<smem>>
    %77 = vector.broadcast %76 : f32 to vector<2x8x8xf32>
    %78 = arith.mulf %9, %77 : vector<2x8x8xf32>
    %79 = arith.addf %75, %78 : vector<2x8x8xf32>
    %c1_61 = arith.constant 1 : index
    %c5_62 = arith.constant 5 : index
    %80 = memref.load %arg1[%c1_61, %c5_62] : memref<7x9xf32, #tpu.memory_space<smem>>
    %81 = vector.broadcast %80 : f32 to vector<2x8x8xf32>
    %82 = arith.mulf %11, %81 : vector<2x8x8xf32>
    %83 = arith.addf %79, %82 : vector<2x8x8xf32>
    %c1_63 = arith.constant 1 : index
    %c6_64 = arith.constant 6 : index
    %84 = memref.load %arg1[%c1_63, %c6_64] : memref<7x9xf32, #tpu.memory_space<smem>>
    %85 = vector.broadcast %84 : f32 to vector<2x8x8xf32>
    %86 = arith.mulf %13, %85 : vector<2x8x8xf32>
    %87 = arith.addf %83, %86 : vector<2x8x8xf32>
    %c1_65 = arith.constant 1 : index
    %c7_66 = arith.constant 7 : index
    %88 = memref.load %arg1[%c1_65, %c7_66] : memref<7x9xf32, #tpu.memory_space<smem>>
    %89 = vector.broadcast %88 : f32 to vector<2x8x8xf32>
    %90 = arith.mulf %15, %89 : vector<2x8x8xf32>
    %91 = arith.addf %87, %90 : vector<2x8x8xf32>
    %c1_67 = arith.constant 1 : index
    %c8_68 = arith.constant 8 : index
    %92 = memref.load %arg1[%c1_67, %c8_68] : memref<7x9xf32, #tpu.memory_space<smem>>
    %93 = vector.broadcast %92 : f32 to vector<2x8x8xf32>
    %94 = arith.mulf %17, %93 : vector<2x8x8xf32>
    %95 = arith.addf %91, %94 : vector<2x8x8xf32>
    %c1_69 = arith.constant 1 : index
    %c1_70 = arith.constant 1 : index
    %96 = memref.load %arg2[%c1_69, %c1_70] : memref<2x8xf32, #tpu.memory_space<smem>>
    %97 = vector.broadcast %96 : f32 to vector<2x8x8xf32>
    %98 = arith.addf %95, %97 : vector<2x8x8xf32>
    %cst_71 = arith.constant 0.000000e+00 : f32
    %99 = vector.broadcast %cst_71 : f32 to vector<2x8x8xf32>
    %100 = arith.maximumf %98, %99 : vector<2x8x8xf32>
    %c0_72 = arith.constant 0 : index
    %c1_73 = arith.constant 1 : index
    %c0_74 = arith.constant 0 : index
    %c0_75 = arith.constant 0 : index
    %101 = vector.load %arg4[%c0_72, %c1_73, %c0_74, %c0_75] : memref<2x8x8x8xf32, #tpu.memory_space<vmem>>, vector<2x1x8x8xf32>
    %102 = vector.shape_cast %101 : vector<2x1x8x8xf32> to vector<2x8x8xf32>
    %103 = vector.shape_cast %100 : vector<2x8x8xf32> to vector<2x1x8x8xf32>
    tpu.vector_store %arg4[%c0_72, %c1_73, %c0_74, %c0_75], %103 {strides = array<i32>} : memref<2x8x8x8xf32, #tpu.memory_space<vmem>>, vector<2x1x8x8xf32>,
    %c2_76 = arith.constant 2 : index
    %c0_77 = arith.constant 0 : index
    %104 = memref.load %arg1[%c2_76, %c0_77] : memref<7x9xf32, #tpu.memory_space<smem>>
    %105 = vector.broadcast %104 : f32 to vector<2x8x8xf32>
    %106 = arith.mulf %1, %105 : vector<2x8x8xf32>
    %c2_78 = arith.constant 2 : index
    %c1_79 = arith.constant 1 : index
    %107 = memref.load %arg1[%c2_78, %c1_79] : memref<7x9xf32, #tpu.memory_space<smem>>
    %108 = vector.broadcast %107 : f32 to vector<2x8x8xf32>
    %109 = arith.mulf %3, %108 : vector<2x8x8xf32>
    %110 = arith.addf %106, %109 : vector<2x8x8xf32>
    %c2_80 = arith.constant 2 : index
    %c2_81 = arith.constant 2 : index
    %111 = memref.load %arg1[%c2_80, %c2_81] : memref<7x9xf32, #tpu.memory_space<smem>>
    %112 = vector.broadcast %111 : f32 to vector<2x8x8xf32>
    %113 = arith.mulf %5, %112 : vector<2x8x8xf32>
    %114 = arith.addf %110, %113 : vector<2x8x8xf32>
    %c2_82 = arith.constant 2 : index
    %c3_83 = arith.constant 3 : index
    %115 = memref.load %arg1[%c2_82, %c3_83] : memref<7x9xf32, #tpu.memory_space<smem>>
    %116 = vector.broadcast %115 : f32 to vector<2x8x8xf32>
    %117 = arith.mulf %7, %116 : vector<2x8x8xf32>
    %118 = arith.addf %114, %117 : vector<2x8x8xf32>
    %c2_84 = arith.constant 2 : index
    %c4_85 = arith.constant 4 : index
    %119 = memref.load %arg1[%c2_84, %c4_85] : memref<7x9xf32, #tpu.memory_space<smem>>
    %120 = vector.broadcast %119 : f32 to vector<2x8x8xf32>
    %121 = arith.mulf %9, %120 : vector<2x8x8xf32>
    %122 = arith.addf %118, %121 : vector<2x8x8xf32>
    %c2_86 = arith.constant 2 : index
    %c5_87 = arith.constant 5 : index
    %123 = memref.load %arg1[%c2_86, %c5_87] : memref<7x9xf32, #tpu.memory_space<smem>>
    %124 = vector.broadcast %123 : f32 to vector<2x8x8xf32>
    %125 = arith.mulf %11, %124 : vector<2x8x8xf32>
    %126 = arith.addf %122, %125 : vector<2x8x8xf32>
    %c2_88 = arith.constant 2 : index
    %c6_89 = arith.constant 6 : index
    %127 = memref.load %arg1[%c2_88, %c6_89] : memref<7x9xf32, #tpu.memory_space<smem>>
    %128 = vector.broadcast %127 : f32 to vector<2x8x8xf32>
    %129 = arith.mulf %13, %128 : vector<2x8x8xf32>
    %130 = arith.addf %126, %129 : vector<2x8x8xf32>
    %c2_90 = arith.constant 2 : index
    %c7_91 = arith.constant 7 : index
    %131 = memref.load %arg1[%c2_90, %c7_91] : memref<7x9xf32, #tpu.memory_space<smem>>
    %132 = vector.broadcast %131 : f32 to vector<2x8x8xf32>
    %133 = arith.mulf %15, %132 : vector<2x8x8xf32>
    %134 = arith.addf %130, %133 : vector<2x8x8xf32>
    %c2_92 = arith.constant 2 : index
    %c8_93 = arith.constant 8 : index
    %135 = memref.load %arg1[%c2_92, %c8_93] : memref<7x9xf32, #tpu.memory_space<smem>>
    %136 = vector.broadcast %135 : f32 to vector<2x8x8xf32>
    %137 = arith.mulf %17, %136 : vector<2x8x8xf32>
    %138 = arith.addf %134, %137 : vector<2x8x8xf32>
    %c1_94 = arith.constant 1 : index
    %c2_95 = arith.constant 2 : index
    %139 = memref.load %arg2[%c1_94, %c2_95] : memref<2x8xf32, #tpu.memory_space<smem>>
    %140 = vector.broadcast %139 : f32 to vector<2x8x8xf32>
    %141 = arith.addf %138, %140 : vector<2x8x8xf32>
    %cst_96 = arith.constant 0.000000e+00 : f32
    %142 = vector.broadcast %cst_96 : f32 to vector<2x8x8xf32>
    %143 = arith.maximumf %141, %142 : vector<2x8x8xf32>
    %c0_97 = arith.constant 0 : index
    %c2_98 = arith.constant 2 : index
    %c0_99 = arith.constant 0 : index
    %c0_100 = arith.constant 0 : index
    %144 = vector.load %arg4[%c0_97, %c2_98, %c0_99, %c0_100] : memref<2x8x8x8xf32, #tpu.memory_space<vmem>>, vector<2x1x8x8xf32>
    %145 = vector.shape_cast %144 : vector<2x1x8x8xf32> to vector<2x8x8xf32>
    %146 = vector.shape_cast %143 : vector<2x8x8xf32> to vector<2x1x8x8xf32>
    tpu.vector_store %arg4[%c0_97, %c2_98, %c0_99, %c0_100], %146 {strides = array<i32>} : memref<2x8x8x8xf32, #tpu.memory_space<vmem>>, vector<2x1x8x8xf32>,
    %c3_101 = arith.constant 3 : index
    %c0_102 = arith.constant 0 : index
    %147 = memref.load %arg1[%c3_101, %c0_102] : memref<7x9xf32, #tpu.memory_space<smem>>
    %148 = vector.broadcast %147 : f32 to vector<2x8x8xf32>
    %149 = arith.mulf %1, %148 : vector<2x8x8xf32>
    %c3_103 = arith.constant 3 : index
    %c1_104 = arith.constant 1 : index
    %150 = memref.load %arg1[%c3_103, %c1_104] : memref<7x9xf32, #tpu.memory_space<smem>>
    %151 = vector.broadcast %150 : f32 to vector<2x8x8xf32>
    %152 = arith.mulf %3, %151 : vector<2x8x8xf32>
    %153 = arith.addf %149, %152 : vector<2x8x8xf32>
    %c3_105 = arith.constant 3 : index
    %c2_106 = arith.constant 2 : index
    %154 = memref.load %arg1[%c3_105, %c2_106] : memref<7x9xf32, #tpu.memory_space<smem>>
    %155 = vector.broadcast %154 : f32 to vector<2x8x8xf32>
    %156 = arith.mulf %5, %155 : vector<2x8x8xf32>
    %157 = arith.addf %153, %156 : vector<2x8x8xf32>
    %c3_107 = arith.constant 3 : index
    %c3_108 = arith.constant 3 : index
    %158 = memref.load %arg1[%c3_107, %c3_108] : memref<7x9xf32, #tpu.memory_space<smem>>
    %159 = vector.broadcast %158 : f32 to vector<2x8x8xf32>
    %160 = arith.mulf %7, %159 : vector<2x8x8xf32>
    %161 = arith.addf %157, %160 : vector<2x8x8xf32>
    %c3_109 = arith.constant 3 : index
    %c4_110 = arith.constant 4 : index
    %162 = memref.load %arg1[%c3_109, %c4_110] : memref<7x9xf32, #tpu.memory_space<smem>>
    %163 = vector.broadcast %162 : f32 to vector<2x8x8xf32>
    %164 = arith.mulf %9, %163 : vector<2x8x8xf32>
    %165 = arith.addf %161, %164 : vector<2x8x8xf32>
    %c3_111 = arith.constant 3 : index
    %c5_112 = arith.constant 5 : index
    %166 = memref.load %arg1[%c3_111, %c5_112] : memref<7x9xf32, #tpu.memory_space<smem>>
    %167 = vector.broadcast %166 : f32 to vector<2x8x8xf32>
    %168 = arith.mulf %11, %167 : vector<2x8x8xf32>
    %169 = arith.addf %165, %168 : vector<2x8x8xf32>
    %c3_113 = arith.constant 3 : index
    %c6_114 = arith.constant 6 : index
    %170 = memref.load %arg1[%c3_113, %c6_114] : memref<7x9xf32, #tpu.memory_space<smem>>
    %171 = vector.broadcast %170 : f32 to vector<2x8x8xf32>
    %172 = arith.mulf %13, %171 : vector<2x8x8xf32>
    %173 = arith.addf %169, %172 : vector<2x8x8xf32>
    %c3_115 = arith.constant 3 : index
    %c7_116 = arith.constant 7 : index
    %174 = memref.load %arg1[%c3_115, %c7_116] : memref<7x9xf32, #tpu.memory_space<smem>>
    %175 = vector.broadcast %174 : f32 to vector<2x8x8xf32>
    %176 = arith.mulf %15, %175 : vector<2x8x8xf32>
    %177 = arith.addf %173, %176 : vector<2x8x8xf32>
    %c3_117 = arith.constant 3 : index
    %c8_118 = arith.constant 8 : index
    %178 = memref.load %arg1[%c3_117, %c8_118] : memref<7x9xf32, #tpu.memory_space<smem>>
    %179 = vector.broadcast %178 : f32 to vector<2x8x8xf32>
    %180 = arith.mulf %17, %179 : vector<2x8x8xf32>
    %181 = arith.addf %177, %180 : vector<2x8x8xf32>
    %c1_119 = arith.constant 1 : index
    %c3_120 = arith.constant 3 : index
    %182 = memref.load %arg2[%c1_119, %c3_120] : memref<2x8xf32, #tpu.memory_space<smem>>
    %183 = vector.broadcast %182 : f32 to vector<2x8x8xf32>
    %184 = arith.addf %181, %183 : vector<2x8x8xf32>
    %cst_121 = arith.constant 0.000000e+00 : f32
    %185 = vector.broadcast %cst_121 : f32 to vector<2x8x8xf32>
    %186 = arith.maximumf %184, %185 : vector<2x8x8xf32>
    %c0_122 = arith.constant 0 : index
    %c3_123 = arith.constant 3 : index
    %c0_124 = arith.constant 0 : index
    %c0_125 = arith.constant 0 : index
    %187 = vector.load %arg4[%c0_122, %c3_123, %c0_124, %c0_125] : memref<2x8x8x8xf32, #tpu.memory_space<vmem>>, vector<2x1x8x8xf32>
    %188 = vector.shape_cast %187 : vector<2x1x8x8xf32> to vector<2x8x8xf32>
    %189 = vector.shape_cast %186 : vector<2x8x8xf32> to vector<2x1x8x8xf32>
    tpu.vector_store %arg4[%c0_122, %c3_123, %c0_124, %c0_125], %189 {strides = array<i32>} : memref<2x8x8x8xf32, #tpu.memory_space<vmem>>, vector<2x1x8x8xf32>,
    %c4_126 = arith.constant 4 : index
    %c0_127 = arith.constant 0 : index
    %190 = memref.load %arg1[%c4_126, %c0_127] : memref<7x9xf32, #tpu.memory_space<smem>>
    %191 = vector.broadcast %190 : f32 to vector<2x8x8xf32>
    %192 = arith.mulf %1, %191 : vector<2x8x8xf32>
    %c4_128 = arith.constant 4 : index
    %c1_129 = arith.constant 1 : index
    %193 = memref.load %arg1[%c4_128, %c1_129] : memref<7x9xf32, #tpu.memory_space<smem>>
    %194 = vector.broadcast %193 : f32 to vector<2x8x8xf32>
    %195 = arith.mulf %3, %194 : vector<2x8x8xf32>
    %196 = arith.addf %192, %195 : vector<2x8x8xf32>
    %c4_130 = arith.constant 4 : index
    %c2_131 = arith.constant 2 : index
    %197 = memref.load %arg1[%c4_130, %c2_131] : memref<7x9xf32, #tpu.memory_space<smem>>
    %198 = vector.broadcast %197 : f32 to vector<2x8x8xf32>
    %199 = arith.mulf %5, %198 : vector<2x8x8xf32>
    %200 = arith.addf %196, %199 : vector<2x8x8xf32>
    %c4_132 = arith.constant 4 : index
    %c3_133 = arith.constant 3 : index
    %201 = memref.load %arg1[%c4_132, %c3_133] : memref<7x9xf32, #tpu.memory_space<smem>>
    %202 = vector.broadcast %201 : f32 to vector<2x8x8xf32>
    %203 = arith.mulf %7, %202 : vector<2x8x8xf32>
    %204 = arith.addf %200, %203 : vector<2x8x8xf32>
    %c4_134 = arith.constant 4 : index
    %c4_135 = arith.constant 4 : index
    %205 = memref.load %arg1[%c4_134, %c4_135] : memref<7x9xf32, #tpu.memory_space<smem>>
    %206 = vector.broadcast %205 : f32 to vector<2x8x8xf32>
    %207 = arith.mulf %9, %206 : vector<2x8x8xf32>
    %208 = arith.addf %204, %207 : vector<2x8x8xf32>
    %c4_136 = arith.constant 4 : index
    %c5_137 = arith.constant 5 : index
    %209 = memref.load %arg1[%c4_136, %c5_137] : memref<7x9xf32, #tpu.memory_space<smem>>
    %210 = vector.broadcast %209 : f32 to vector<2x8x8xf32>
    %211 = arith.mulf %11, %210 : vector<2x8x8xf32>
    %212 = arith.addf %208, %211 : vector<2x8x8xf32>
    %c4_138 = arith.constant 4 : index
    %c6_139 = arith.constant 6 : index
    %213 = memref.load %arg1[%c4_138, %c6_139] : memref<7x9xf32, #tpu.memory_space<smem>>
    %214 = vector.broadcast %213 : f32 to vector<2x8x8xf32>
    %215 = arith.mulf %13, %214 : vector<2x8x8xf32>
    %216 = arith.addf %212, %215 : vector<2x8x8xf32>
    %c4_140 = arith.constant 4 : index
    %c7_141 = arith.constant 7 : index
    %217 = memref.load %arg1[%c4_140, %c7_141] : memref<7x9xf32, #tpu.memory_space<smem>>
    %218 = vector.broadcast %217 : f32 to vector<2x8x8xf32>
    %219 = arith.mulf %15, %218 : vector<2x8x8xf32>
    %220 = arith.addf %216, %219 : vector<2x8x8xf32>
    %c4_142 = arith.constant 4 : index
    %c8_143 = arith.constant 8 : index
    %221 = memref.load %arg1[%c4_142, %c8_143] : memref<7x9xf32, #tpu.memory_space<smem>>
    %222 = vector.broadcast %221 : f32 to vector<2x8x8xf32>
    %223 = arith.mulf %17, %222 : vector<2x8x8xf32>
    %224 = arith.addf %220, %223 : vector<2x8x8xf32>
    %c1_144 = arith.constant 1 : index
    %c4_145 = arith.constant 4 : index
    %225 = memref.load %arg2[%c1_144, %c4_145] : memref<2x8xf32, #tpu.memory_space<smem>>
    %226 = vector.broadcast %225 : f32 to vector<2x8x8xf32>
    %227 = arith.addf %224, %226 : vector<2x8x8xf32>
    %cst_146 = arith.constant 0.000000e+00 : f32
    %228 = vector.broadcast %cst_146 : f32 to vector<2x8x8xf32>
    %229 = arith.maximumf %227, %228 : vector<2x8x8xf32>
    %c0_147 = arith.constant 0 : index
    %c4_148 = arith.constant 4 : index
    %c0_149 = arith.constant 0 : index
    %c0_150 = arith.constant 0 : index
    %230 = vector.load %arg4[%c0_147, %c4_148, %c0_149, %c0_150] : memref<2x8x8x8xf32, #tpu.memory_space<vmem>>, vector<2x1x8x8xf32>
    %231 = vector.shape_cast %230 : vector<2x1x8x8xf32> to vector<2x8x8xf32>
    %232 = vector.shape_cast %229 : vector<2x8x8xf32> to vector<2x1x8x8xf32>
    tpu.vector_store %arg4[%c0_147, %c4_148, %c0_149, %c0_150], %232 {strides = array<i32>} : memref<2x8x8x8xf32, #tpu.memory_space<vmem>>, vector<2x1x8x8xf32>,
    %c5_151 = arith.constant 5 : index
    %c0_152 = arith.constant 0 : index
    %233 = memref.load %arg1[%c5_151, %c0_152] : memref<7x9xf32, #tpu.memory_space<smem>>
    %234 = vector.broadcast %233 : f32 to vector<2x8x8xf32>
    %235 = arith.mulf %1, %234 : vector<2x8x8xf32>
    %c5_153 = arith.constant 5 : index
    %c1_154 = arith.constant 1 : index
    %236 = memref.load %arg1[%c5_153, %c1_154] : memref<7x9xf32, #tpu.memory_space<smem>>
    %237 = vector.broadcast %236 : f32 to vector<2x8x8xf32>
    %238 = arith.mulf %3, %237 : vector<2x8x8xf32>
    %239 = arith.addf %235, %238 : vector<2x8x8xf32>
    %c5_155 = arith.constant 5 : index
    %c2_156 = arith.constant 2 : index
    %240 = memref.load %arg1[%c5_155, %c2_156] : memref<7x9xf32, #tpu.memory_space<smem>>
    %241 = vector.broadcast %240 : f32 to vector<2x8x8xf32>
    %242 = arith.mulf %5, %241 : vector<2x8x8xf32>
    %243 = arith.addf %239, %242 : vector<2x8x8xf32>
    %c5_157 = arith.constant 5 : index
    %c3_158 = arith.constant 3 : index
    %244 = memref.load %arg1[%c5_157, %c3_158] : memref<7x9xf32, #tpu.memory_space<smem>>
    %245 = vector.broadcast %244 : f32 to vector<2x8x8xf32>
    %246 = arith.mulf %7, %245 : vector<2x8x8xf32>
    %247 = arith.addf %243, %246 : vector<2x8x8xf32>
    %c5_159 = arith.constant 5 : index
    %c4_160 = arith.constant 4 : index
    %248 = memref.load %arg1[%c5_159, %c4_160] : memref<7x9xf32, #tpu.memory_space<smem>>
    %249 = vector.broadcast %248 : f32 to vector<2x8x8xf32>
    %250 = arith.mulf %9, %249 : vector<2x8x8xf32>
    %251 = arith.addf %247, %250 : vector<2x8x8xf32>
    %c5_161 = arith.constant 5 : index
    %c5_162 = arith.constant 5 : index
    %252 = memref.load %arg1[%c5_161, %c5_162] : memref<7x9xf32, #tpu.memory_space<smem>>
    %253 = vector.broadcast %252 : f32 to vector<2x8x8xf32>
    %254 = arith.mulf %11, %253 : vector<2x8x8xf32>
    %255 = arith.addf %251, %254 : vector<2x8x8xf32>
    %c5_163 = arith.constant 5 : index
    %c6_164 = arith.constant 6 : index
    %256 = memref.load %arg1[%c5_163, %c6_164] : memref<7x9xf32, #tpu.memory_space<smem>>
    %257 = vector.broadcast %256 : f32 to vector<2x8x8xf32>
    %258 = arith.mulf %13, %257 : vector<2x8x8xf32>
    %259 = arith.addf %255, %258 : vector<2x8x8xf32>
    %c5_165 = arith.constant 5 : index
    %c7_166 = arith.constant 7 : index
    %260 = memref.load %arg1[%c5_165, %c7_166] : memref<7x9xf32, #tpu.memory_space<smem>>
    %261 = vector.broadcast %260 : f32 to vector<2x8x8xf32>
    %262 = arith.mulf %15, %261 : vector<2x8x8xf32>
    %263 = arith.addf %259, %262 : vector<2x8x8xf32>
    %c5_167 = arith.constant 5 : index
    %c8_168 = arith.constant 8 : index
    %264 = memref.load %arg1[%c5_167, %c8_168] : memref<7x9xf32, #tpu.memory_space<smem>>
    %265 = vector.broadcast %264 : f32 to vector<2x8x8xf32>
    %266 = arith.mulf %17, %265 : vector<2x8x8xf32>
    %267 = arith.addf %263, %266 : vector<2x8x8xf32>
    %c1_169 = arith.constant 1 : index
    %c5_170 = arith.constant 5 : index
    %268 = memref.load %arg2[%c1_169, %c5_170] : memref<2x8xf32, #tpu.memory_space<smem>>
    %269 = vector.broadcast %268 : f32 to vector<2x8x8xf32>
    %270 = arith.addf %267, %269 : vector<2x8x8xf32>
    %cst_171 = arith.constant 0.000000e+00 : f32
    %271 = vector.broadcast %cst_171 : f32 to vector<2x8x8xf32>
    %272 = arith.maximumf %270, %271 : vector<2x8x8xf32>
    %c0_172 = arith.constant 0 : index
    %c5_173 = arith.constant 5 : index
    %c0_174 = arith.constant 0 : index
    %c0_175 = arith.constant 0 : index
    %273 = vector.load %arg4[%c0_172, %c5_173, %c0_174, %c0_175] : memref<2x8x8x8xf32, #tpu.memory_space<vmem>>, vector<2x1x8x8xf32>
    %274 = vector.shape_cast %273 : vector<2x1x8x8xf32> to vector<2x8x8xf32>
    %275 = vector.shape_cast %272 : vector<2x8x8xf32> to vector<2x1x8x8xf32>
    tpu.vector_store %arg4[%c0_172, %c5_173, %c0_174, %c0_175], %275 {strides = array<i32>} : memref<2x8x8x8xf32, #tpu.memory_space<vmem>>, vector<2x1x8x8xf32>,
    %c6_176 = arith.constant 6 : index
    %c0_177 = arith.constant 0 : index
    %276 = memref.load %arg1[%c6_176, %c0_177] : memref<7x9xf32, #tpu.memory_space<smem>>
    %277 = vector.broadcast %276 : f32 to vector<2x8x8xf32>
    %278 = arith.mulf %1, %277 : vector<2x8x8xf32>
    %c6_178 = arith.constant 6 : index
    %c1_179 = arith.constant 1 : index
    %279 = memref.load %arg1[%c6_178, %c1_179] : memref<7x9xf32, #tpu.memory_space<smem>>
    %280 = vector.broadcast %279 : f32 to vector<2x8x8xf32>
    %281 = arith.mulf %3, %280 : vector<2x8x8xf32>
    %282 = arith.addf %278, %281 : vector<2x8x8xf32>
    %c6_180 = arith.constant 6 : index
    %c2_181 = arith.constant 2 : index
    %283 = memref.load %arg1[%c6_180, %c2_181] : memref<7x9xf32, #tpu.memory_space<smem>>
    %284 = vector.broadcast %283 : f32 to vector<2x8x8xf32>
    %285 = arith.mulf %5, %284 : vector<2x8x8xf32>
    %286 = arith.addf %282, %285 : vector<2x8x8xf32>
    %c6_182 = arith.constant 6 : index
    %c3_183 = arith.constant 3 : index
    %287 = memref.load %arg1[%c6_182, %c3_183] : memref<7x9xf32, #tpu.memory_space<smem>>
    %288 = vector.broadcast %287 : f32 to vector<2x8x8xf32>
    %289 = arith.mulf %7, %288 : vector<2x8x8xf32>
    %290 = arith.addf %286, %289 : vector<2x8x8xf32>
    %c6_184 = arith.constant 6 : index
    %c4_185 = arith.constant 4 : index
    %291 = memref.load %arg1[%c6_184, %c4_185] : memref<7x9xf32, #tpu.memory_space<smem>>
    %292 = vector.broadcast %291 : f32 to vector<2x8x8xf32>
    %293 = arith.mulf %9, %292 : vector<2x8x8xf32>
    %294 = arith.addf %290, %293 : vector<2x8x8xf32>
    %c6_186 = arith.constant 6 : index
    %c5_187 = arith.constant 5 : index
    %295 = memref.load %arg1[%c6_186, %c5_187] : memref<7x9xf32, #tpu.memory_space<smem>>
    %296 = vector.broadcast %295 : f32 to vector<2x8x8xf32>
    %297 = arith.mulf %11, %296 : vector<2x8x8xf32>
    %298 = arith.addf %294, %297 : vector<2x8x8xf32>
    %c6_188 = arith.constant 6 : index
    %c6_189 = arith.constant 6 : index
    %299 = memref.load %arg1[%c6_188, %c6_189] : memref<7x9xf32, #tpu.memory_space<smem>>
    %300 = vector.broadcast %299 : f32 to vector<2x8x8xf32>
    %301 = arith.mulf %13, %300 : vector<2x8x8xf32>
    %302 = arith.addf %298, %301 : vector<2x8x8xf32>
    %c6_190 = arith.constant 6 : index
    %c7_191 = arith.constant 7 : index
    %303 = memref.load %arg1[%c6_190, %c7_191] : memref<7x9xf32, #tpu.memory_space<smem>>
    %304 = vector.broadcast %303 : f32 to vector<2x8x8xf32>
    %305 = arith.mulf %15, %304 : vector<2x8x8xf32>
    %306 = arith.addf %302, %305 : vector<2x8x8xf32>
    %c6_192 = arith.constant 6 : index
    %c8_193 = arith.constant 8 : index
    %307 = memref.load %arg1[%c6_192, %c8_193] : memref<7x9xf32, #tpu.memory_space<smem>>
    %308 = vector.broadcast %307 : f32 to vector<2x8x8xf32>
    %309 = arith.mulf %17, %308 : vector<2x8x8xf32>
    %310 = arith.addf %306, %309 : vector<2x8x8xf32>
    %c1_194 = arith.constant 1 : index
    %c6_195 = arith.constant 6 : index
    %311 = memref.load %arg2[%c1_194, %c6_195] : memref<2x8xf32, #tpu.memory_space<smem>>
    %312 = vector.broadcast %311 : f32 to vector<2x8x8xf32>
    %313 = arith.addf %310, %312 : vector<2x8x8xf32>
    %cst_196 = arith.constant 0.000000e+00 : f32
    %314 = vector.broadcast %cst_196 : f32 to vector<2x8x8xf32>
    %315 = arith.maximumf %313, %314 : vector<2x8x8xf32>
    %c0_197 = arith.constant 0 : index
    %c6_198 = arith.constant 6 : index
    %c0_199 = arith.constant 0 : index
    %c0_200 = arith.constant 0 : index
    %316 = vector.load %arg4[%c0_197, %c6_198, %c0_199, %c0_200] : memref<2x8x8x8xf32, #tpu.memory_space<vmem>>, vector<2x1x8x8xf32>
    %317 = vector.shape_cast %316 : vector<2x1x8x8xf32> to vector<2x8x8xf32>
    %318 = vector.shape_cast %315 : vector<2x8x8xf32> to vector<2x1x8x8xf32>
    tpu.vector_store %arg4[%c0_197, %c6_198, %c0_199, %c0_200], %318 {strides = array<i32>} : memref<2x8x8x8xf32, #tpu.memory_space<vmem>>, vector<2x1x8x8xf32>,
    %319 = tpu.iota {dimensions = array<i32: 0>} : vector<8x8xi32>
    %320 = tpu.iota {dimensions = array<i32: 1>} : vector<8x8xi32>
    %c0_i32 = arith.constant 0 : i32
    %321 = vector.broadcast %c0_i32 : i32 to vector<8x8xi32>
    %322 = arith.cmpi eq, %319, %321 : vector<8x8xi32>
    %c0_i32_201 = arith.constant 0 : i32
    %323 = vector.broadcast %c0_i32_201 : i32 to vector<8x8xi32>
    %324 = arith.cmpi eq, %320, %323 : vector<8x8xi32>
    %325 = arith.ori %322, %324 : vector<8x8xi1>
    %326 = vector.shape_cast %325 : vector<8x8xi1> to vector<1x8x8xi1>
    %cst_202 = arith.constant 0xFF800000 : f32
    %327 = vector.shape_cast %326 : vector<1x8x8xi1> to vector<1x8x8xi1>
    %328 = vector.broadcast %327 : vector<1x8x8xi1> to vector<2x8x8xi1>
    %329 = vector.broadcast %cst_202 : f32 to vector<2x8x8xf32>
    %330 = arith.select %328, %329, %1 : vector<2x8x8xi1>, vector<2x8x8xf32>
    %331 = arith.maximumf %3, %5 : vector<2x8x8xf32>
    %332 = vector.shape_cast %322 : vector<8x8xi1> to vector<1x8x8xi1>
    %cst_203 = arith.constant 0xFF800000 : f32
    %333 = vector.shape_cast %332 : vector<1x8x8xi1> to vector<1x8x8xi1>
    %334 = vector.broadcast %333 : vector<1x8x8xi1> to vector<2x8x8xi1>
    %335 = vector.broadcast %cst_203 : f32 to vector<2x8x8xf32>
    %336 = arith.select %334, %335, %331 : vector<2x8x8xi1>, vector<2x8x8xf32>
    %337 = arith.maximumf %330, %336 : vector<2x8x8xf32>
    %338 = arith.maximumf %7, %13 : vector<2x8x8xf32>
    %339 = vector.shape_cast %324 : vector<8x8xi1> to vector<1x8x8xi1>
    %cst_204 = arith.constant 0xFF800000 : f32
    %340 = vector.shape_cast %339 : vector<1x8x8xi1> to vector<1x8x8xi1>
    %341 = vector.broadcast %340 : vector<1x8x8xi1> to vector<2x8x8xi1>
    %342 = vector.broadcast %cst_204 : f32 to vector<2x8x8xf32>
    %343 = arith.select %341, %342, %338 : vector<2x8x8xi1>, vector<2x8x8xf32>
    %344 = arith.maximumf %337, %343 : vector<2x8x8xf32>
    %345 = arith.maximumf %9, %11 : vector<2x8x8xf32>
    %346 = arith.maximumf %345, %15 : vector<2x8x8xf32>
    %347 = arith.maximumf %346, %17 : vector<2x8x8xf32>
    %348 = arith.maximumf %344, %347 : vector<2x8x8xf32>
    %c0_205 = arith.constant 0 : index
    %c7_206 = arith.constant 7 : index
    %349 = memref.load %arg2[%c0_205, %c7_206] : memref<2x8xf32, #tpu.memory_space<smem>>
    %350 = vector.broadcast %349 : f32 to vector<2x8x8xf32>
    %351 = arith.mulf %348, %350 : vector<2x8x8xf32>
    %c1_207 = arith.constant 1 : index
    %c7_208 = arith.constant 7 : index
    %352 = memref.load %arg2[%c1_207, %c7_208] : memref<2x8xf32, #tpu.memory_space<smem>>
    %353 = vector.broadcast %352 : f32 to vector<2x8x8xf32>
    %354 = arith.addf %351, %353 : vector<2x8x8xf32>
    %cst_209 = arith.constant 0.000000e+00 : f32
    %355 = vector.broadcast %cst_209 : f32 to vector<2x8x8xf32>
    %356 = arith.maximumf %354, %355 : vector<2x8x8xf32>
    %c0_210 = arith.constant 0 : index
    %c7_211 = arith.constant 7 : index
    %c0_212 = arith.constant 0 : index
    %c0_213 = arith.constant 0 : index
    %357 = vector.load %arg4[%c0_210, %c7_211, %c0_212, %c0_213] : memref<2x8x8x8xf32, #tpu.memory_space<vmem>>, vector<2x1x8x8xf32>
    %358 = vector.shape_cast %357 : vector<2x1x8x8xf32> to vector<2x8x8xf32>
    %359 = vector.shape_cast %356 : vector<2x8x8xf32> to vector<2x1x8x8xf32>
    tpu.vector_store %arg4[%c0_210, %c7_211, %c0_212, %c0_213], %359 {strides = array<i32>} : memref<2x8x8x8xf32, #tpu.memory_space<vmem>>, vector<2x1x8x8xf32>,
    return
  }
  func.func @transform_0(%arg0: i32) -> (i32, i32) {
    %c0_i32 = arith.constant 0 : i32
    %c0_i32_0 = arith.constant 0 : i32
    %c0_i32_1 = arith.constant 0 : i32
    return %c0_i32, %c0_i32_0 : i32, i32
  }
  func.func @transform_1(%arg0: i32) -> (i32, i32) {
    %c0_i32 = arith.constant 0 : i32
    %c0_i32_0 = arith.constant 0 : i32
    %c0_i32_1 = arith.constant 0 : i32
    return %c0_i32, %c0_i32_0 : i32, i32
  }
  func.func @transform_2(%arg0: i32) -> (i32, i32, i32, i32) {
    %c0_i32 = arith.constant 0 : i32
    %c0_i32_0 = arith.constant 0 : i32
    %c0_i32_1 = arith.constant 0 : i32
    %c0_i32_2 = arith.constant 0 : i32
    return %arg0, %c0_i32, %c0_i32_0, %c0_i32_1 : i32, i32, i32, i32
  }
  func.func @transform_3(%arg0: i32) -> (i32, i32, i32, i32) {
    %c0_i32 = arith.constant 0 : i32
    %c0_i32_0 = arith.constant 0 : i32
    %c0_i32_1 = arith.constant 0 : i32
    %c0_i32_2 = arith.constant 0 : i32
    return %arg0, %c0_i32, %c0_i32_0, %c0_i32_1 : i32, i32, i32, i32
  }
}

</mosaic_0001>

<bundles_post_ra>
// kernel: initial_block_forward.2
= control target key start
LH: loop header
LB: loop body
LE: loop exit
PB: predicated region body
PF: predicated region fallthrough
CT: control target
= control target key end

     0   :  { %7 = vsyncpa [#allocation3], 0  ;;  %s1943_s0 = inlined_call_operand.vmem [shape: f32[7,9], index: 0, kind: input, shape index: {}]   ;;  %s1944_s1 = inlined_call_operand.vmem [shape: f32[2,4,9,9], index: 1, kind: input, shape index: {}]   ;;  %s1945_s2 = inlined_call_operand.vmem [shape: f32[2,8], index: 2, kind: output, shape index: {}]  }
   0x1   :  { %s14_s11 = sshll.u32 %s1943_s0, 4  ;;  %s15_s11 = int_to_ptr.vmem [resolvable:$true] %s14_s11 }
   0x2   :  { %s1195_s12 = scalar_lea.vmem %s15_s11, 128  ;;  %p1200_p1 = scmp.lt.s32.totalorder %s15_s11, %s15_s11 }
   0x3   :  { %p1196_p0 = scmp.ne.s32.totalorder %s15_s11, %s1195_s12  ;;  %p1201_p2 = scmp.lt.s32.totalorder %s1195_s12, %s1195_s12 }
   0x5   :  { %p1202_p3 = por %p1201_p2, %p1200_p1 }
   0x7   :  { %p1203_p4 = pnand %p1202_p3, %p1196_p0 }
   0x9   :  { %1206 = shalt.err (!%p1203_p4)
}
   0xa   :  { %s1209_s13 = smov [#allocation2]  }
   0xb   :  { %17 = dma.vmem_to_smem %s15_s11, 128, %s1209_s13, [#allocation3]  }
   0xc   :  { %1207 = dma.done.wait [#allocation3], 128  }
   0xd   :  { %1208 = vsyncadd [#allocation3], 4294967168 }
   0xe   :  { %23 = sfence }
   0xf   :  { %s1140_s14 = sld [smem:[#allocation2 + $0x82]]  ;;  %v1233_v0 = vld [vmem:[%s1944_s1] sm:$0xff]  ;;  %s1210_s21 = smov 127   ;;  %v577_v42 = vlaneseq  ;;  %vm636_vm0 = vcmask 64512   ;;  %vm765_vm4 = vcmask 1041409   ;;  %vm28_vm5 = vcmask 58368  }
  0x10   :  { %s1131_s15 = sld [smem:[#allocation2 + $0x2]]  ;;  %v1238_v1 = vld [vmem:[%s1944_s1 + $0x40] sm:$0xff]  ;;  %s1134_s25 = sld [smem:[#allocation2 + $0x5]]  ;;  %vm848_vm6 = vcmask 1042434   ;;  %vm850_vm7 = vcmask 1043459   ;;  %vm852_vm8 = vcmask 1044484  }
  0x11   :  { %s1149_s16 = sld [smem:[#allocation2 + $0x102]]  ;;  %s1143_s26 = sld [smem:[#allocation2 + $0x85]]  ;;  %v1269_v23 = vld [vmem:[%s1944_s1 + $0x60] sm:$0xff]  ;;  %v1300_v45 = vshrl.u32 %v577_v42, 7  ;;  %v1302_v46 = vand.u32 127, %v577_v42  ;;  %vm854_vm9 = vcmask 1045509  }
  0x12   :  { %s1158_s20 = sld [smem:[#allocation2 + $0x182]]  ;;  %s1152_s29 = sld [smem:[#allocation2 + $0x105]]  ;;  %v1274_v25 = vld [vmem:[%s1944_s1 + $0x20] sm:$0xff]  ;;  %vm856_vm10 = vcmask 1046534   ;;  %vm858_vm11 = vcmask 1047559   ;;  %vm861_vm12 = vcmask 15360  }
  0x13   :  { %s1167_s22 = sld [smem:[#allocation2 + $0x202]]  ;;  %s1161_s4 = sld [smem:[#allocation2 + $0x185]]  ;;  %v1308_v48 = vsub.s32 %v1302_v46, %v1300_v45  ;;  %v1317_v50 = vld [vmem:[%s1944_s1 + $0x41] sm:$0xff]  ;;  %vm581_vm1 = vcmp.eq.s32.totalorder %v1300_v45, 0  ;;  %vm582_vm2 = vcmp.eq.s32.totalorder %v1302_v46, 0  ;;  %vm1113_vm13 = vcmask 1040384  }
  0x14   :  { %s1176_s23 = sld [smem:[#allocation2 + $0x282]]  ;;  %s1170_s5 = sld [smem:[#allocation2 + $0x205]]  ;;  %v1322_v52 = vld [vmem:[%s1944_s1 + $0x1] sm:$0xff]  ;;  %vm1701_vm3 = vmor %vm581_vm1, %vm582_vm2 }
  0x15   :  { %v132_v2 = vstv %s1140_s14  ;;  %s1185_s24 = sld [smem:[#allocation2 + $0x302]]  ;;  %s1179_s6 = sld [smem:[#allocation2 + $0x285]]  ;;  %1947 = vst [vmem:[#allocation5_spill] sm:$0xff] %v1308_v48 }
  0x16   :  { %v133_v3 = vmul.f32 %v132_v2, %v1233_v0  ;;  %v56_v4 = vstv %s1131_s15  ;;  %v134_v6 = vmul.f32 %v132_v2, %v1238_v1  ;;  %v82_v24 = vstv %s1134_s25  ;;  %s1188_s7 = sld [smem:[#allocation2 + $0x305]]  ;;  %s1137_s8 = sld [smem:[#allocation2 + $0x8]] }
  0x17   :  { %v57_v5 = vmul.f32 %v56_v4, %v1233_v0  ;;  %v58_v7 = vmul.f32 %v56_v4, %v1238_v1  ;;  %v208_v8 = vstv %s1149_s16  ;;  %v84_v26 = vmul.f32 %v1269_v23, %v82_v24  ;;  %s1146_s9 = sld [smem:[#allocation2 + $0x88]]  ;;  %s1157_s19 = sld [smem:[#allocation2 + $0x181]] }
  0x18   :  { %137 = vrot.lane.b32.xlu1 %v133_v3, %s1210_s21  ;;  %v210_v9 = vmul.f32 %v208_v8, %v1238_v1  ;;  %v209_v10 = vmul.f32 %v208_v8, %v1233_v0  ;;  %v284_v11 = vstv %s1158_s20  ;;  %v83_v27 = vmul.f32 %v1274_v25, %v82_v24  ;;  %s1155_s14 = sld [smem:[#allocation2 + $0x108]]  ;;  %s1130_s3 = sld [smem:[#allocation2 + $0x1]] }
  0x19   :  { %61 = vrot.lane.b32.xlu0 %v57_v5, %s1210_s21  ;;  %v286_v12 = vmul.f32 %v284_v11, %v1238_v1  ;;  %v285_v13 = vmul.f32 %v284_v11, %v1233_v0  ;;  %v360_v14 = vstv %s1167_s22  ;;  %v158_v28 = vstv %s1143_s26  ;;  %s1164_s15 = sld [smem:[#allocation2 + $0x188]]  ;;  %s1166_s22 = sld [smem:[#allocation2 + $0x201]] }
  0x1a   :  { %v362_v15 = vmul.f32 %v360_v14, %v1238_v1  ;;  %v361_v16 = vmul.f32 %v360_v14, %v1233_v0  ;;  %v436_v17 = vstv %s1176_s23  ;;  %v160_v29 = vmul.f32 %v1269_v23, %v158_v28  ;;  %s1173_s16 = sld [smem:[#allocation2 + $0x208]]  ;;  %s1450_s10 = sld [smem:[#allocation2 + $0x4]] }
  0x1b   :  { %v438_v18 = vmul.f32 %v436_v17, %v1238_v1  ;;  %v437_v19 = vmul.f32 %v436_v17, %v1233_v0  ;;  %v512_v20 = vstv %s1185_s24  ;;  %v159_v30 = vmul.f32 %v1274_v25, %v158_v28  ;;  %s1182_s17 = sld [smem:[#allocation2 + $0x288]]  ;;  %s1370_s24 = sld [smem:[#allocation2 + $0x281]]  ;;  %v1382_v17 = vld [vmem:[%s1944_s1 + $0x10] sm:$0xff] }
  0x1c   :  { %139 = vrot.lane.b32.xlu1 %v134_v6, %s1210_s21  ;;  %v514_v21 = vmul.f32 %v512_v20, %v1238_v1  ;;  %v513_v22 = vmul.f32 %v512_v20, %v1233_v0  ;;  %v234_v31 = vstv %s1152_s29  ;;  %v310_v34 = vstv %s1161_s4  ;;  %s1191_s18 = sld [smem:[#allocation2 + $0x308]]  ;;  %s1392_s29 = sld [smem:[#allocation2 + $0x301]] }
  0x1d   :  { %63 = vrot.lane.b32.xlu0 %v58_v7, %s1210_s21  ;;  %v236_v32 = vmul.f32 %v1269_v23, %v234_v31  ;;  %v235_v33 = vmul.f32 %v1274_v25, %v234_v31  ;;  %v312_v35 = vmul.f32 %v1269_v23, %v310_v34  ;;  %v311_v36 = vmul.f32 %v1274_v25, %v310_v34  ;;  %s1156_s0 = sld [smem:[#allocation2 + $0x180]]  ;;  %s1459_s11 = sld [smem:[#allocation2 + $0x84]] }
  0x1e   :  { %v386_v37 = vstv %s1170_s5  ;;  %v462_v40 = vstv %s1179_s6  ;;  %v538_v44 = vstv %s1188_s7  ;;  %v108_v51 = vstv %s1137_s8  ;;  %s1165_s20 = sld [smem:[#allocation2 + $0x200]]  ;;  %s1139_s5 = sld [smem:[#allocation2 + $0x81]] }
  0x1f   :  { %v388_v38 = vmul.f32 %v1269_v23, %v386_v37  ;;  %v387_v39 = vmul.f32 %v1274_v25, %v386_v37  ;;  %v464_v41 = vmul.f32 %v1269_v23, %v462_v40  ;;  %v463_v43 = vmul.f32 %v1274_v25, %v462_v40  ;;  %s1368_s23 = sld [smem:[#allocation2 + $0x280]]  ;;  %s1434_s6 = sld [smem:[#allocation2 + $0x3]] }
  0x20   :  { %215 = vrot.lane.b32.xlu1 %v210_v9, %s1210_s21  ;;  %v540_v47 = vmul.f32 %v1269_v23, %v538_v44  ;;  %v539_v49 = vmul.f32 %v1274_v25, %v538_v44  ;;  %v110_v53 = vmul.f32 %v108_v51, %v1317_v50  ;;  %v109_v54 = vmul.f32 %v108_v51, %v1322_v52  ;;  %s1390_s28 = sld [smem:[#allocation2 + $0x300]]  ;;  %s1438_s7 = sld [smem:[#allocation2 + $0x83]] }
  0x21   :  { %213 = vrot.lane.b32.xlu0 %v209_v10, %s1210_s21  ;;  %v184_v55 = vstv %s1146_s9  ;;  %v260_v58 = vstv %s1155_s14  ;;  %v336_v61 = vstv %s1164_s15  ;;  %s45_s30 = sld [smem:[#allocation2]]  ;;  %s1448_s9 = sld [smem:[#allocation2 + $0x101]] }
  0x22   :  { %v186_v56 = vmul.f32 %v184_v55, %v1317_v50  ;;  %v185_v57 = vmul.f32 %v184_v55, %v1322_v52  ;;  %v262_v59 = vmul.f32 %v260_v58, %v1317_v50  ;;  %v261_v60 = vmul.f32 %v260_v58, %v1322_v52  ;;  %s1138_s4 = sld [smem:[#allocation2 + $0x80]]  ;;  %s1463_s12 = sld [smem:[#allocation2 + $0x6]] }
  0x23   :  { %v338_v62 = vmul.f32 %v336_v61, %v1317_v50  ;;  %v337_v63 = vmul.f32 %v336_v61, %v1322_v52  ;;  %v412_v2 = vstv %s1173_s16  ;;  %v488_v5 = vstv %s1182_s17  ;;  %s1446_s8 = sld [smem:[#allocation2 + $0x100]]  ;;  %s1470_s13 = sld [smem:[#allocation2 + $0x103]] }
  0x24   :  { %291 = vrot.lane.b32.xlu1 %v286_v12, %s1210_s21  ;;  %v414_v3 = vmul.f32 %v412_v2, %v1317_v50  ;;  %v413_v4 = vmul.f32 %v412_v2, %v1322_v52  ;;  %v490_v6 = vmul.f32 %v488_v5, %v1317_v50  ;;  %v489_v7 = vmul.f32 %v488_v5, %v1322_v52  ;;  %s1529_s25 = sld [smem:[#allocation2 + $0x106]]  ;;  %s1543_s27 = sld [smem:[#allocation2 + $0x303]] }
  0x25   :  { %289 = vrot.lane.b32.xlu0 %v285_v13, %s1210_s21  ;;  %v564_v8 = vstv %s1191_s18  ;;  %v274_v13 = vstv %s1156_s0  ;;  %v278_v14 = vstv %s1157_s19  ;;  %s1489_s18 = sld [smem:[#allocation2 + $0x86]]  ;;  %s1493_s0 = sld [smem:[#allocation2 + $0x7]] }
  0x26   :  { %v566_v9 = vmul.f32 %v564_v8, %v1317_v50  ;;  %v565_v10 = vmul.f32 %v564_v8, %v1322_v52  ;;  %v350_v24 = vstv %s1165_s20  ;;  %v502_v51 = vstv %s1390_s28  ;;  %s1497_s19 = sld [smem:[#allocation2 + $0x183]] }
  0x27   :  { %v504_v58 = vmul.f32 %v502_v51, %v1238_v1  ;;  %s1504_s20 = sld [smem:[#allocation2 + $0x203]] }
  0x28   :  { %367 = vrot.lane.b32.xlu1 %v362_v15, %s1210_s21  ;;  %v1375_v15 = vld [vmem:[%s1944_s1 + $0x50] sm:$0xff] }
  0x29   :  { %365 = vrot.lane.b32.xlu0 %v361_v16, %s1210_s21  ;;  %v280_v20 = vmul.f32 %v1375_v15, %v278_v14 }
  0x2a   :  { %v526_v48 = vstv %s1543_s27 }
  0x2c   :  { %443 = vrot.lane.b32.xlu1 %v438_v18, %s1210_s21 }
  0x2d   :  { %441 = vrot.lane.b32.xlu0 %v437_v19, %s1210_s21  ;;  %v276_v19 = vmul.f32 %v274_v13, %v1238_v1 }
  0x30   :  { %519 = vrot.lane.b32.xlu1 %v514_v21, %s1210_s21  ;;  %v275_v21 = vmul.f32 %v274_v13, %v1233_v0 }
  0x31   :  { %517 = vrot.lane.b32.xlu0 %v513_v22, %s1210_s21  ;;  %v279_v22 = vmul.f32 %v1382_v17, %v278_v14 }
  0x34   :  { %89 = vrot.lane.b32.xlu1 %v84_v26, %s1210_s21  ;;  %v354_v26 = vstv %s1166_s22  ;;  %s1508_s22 = sld [smem:[#allocation2 + $0x104]] }
  0x35   :  { %87 = vrot.lane.b32.xlu0 %v83_v27, %s1210_s21  ;;  %v356_v31 = vmul.f32 %v1375_v15, %v354_v26  ;;  %v355_v34 = vmul.f32 %v1382_v17, %v354_v26 }
  0x38   :  { %165 = vrot.lane.b32.xlu1 %v160_v29, %s1210_s21  ;;  %v282_v29 = vadd.f32 %v280_v20, %v276_v19  ;;  %v46_v20 = vstv %s45_s30  ;;  %s1558_s30 = sld [smem:[#allocation2 + $0x107]] }
  0x39   :  { %163 = vrot.lane.b32.xlu0 %v159_v30, %s1210_s21  ;;  %v352_v30 = vmul.f32 %v350_v24, %v1238_v1 }
  0x3b   :  { %v358_v40 = vadd.f32 %v356_v31, %v352_v30  ;;  %v47_v31 = vmul.f32 %v46_v20, %v1233_v0 }
  0x3c   :  { %241 = vrot.lane.b32.xlu1 %v236_v32, %s1210_s21  ;;  %v281_v32 = vadd.f32 %v279_v22, %v275_v21  ;;  %v50_v21 = vstv %s1130_s3  ;;  %s1581_s3 = sld [smem:[#allocation2 + $0x186]] }
  0x3d   :  { %239 = vrot.lane.b32.xlu0 %v235_v33, %s1210_s21  ;;  %v351_v33 = vmul.f32 %v350_v24, %v1233_v0  ;;  %v48_v24 = vmul.f32 %v46_v20, %v1238_v1  ;;  %v52_v26 = vmul.f32 %v1375_v15, %v50_v21  ;;  %v51_v30 = vmul.f32 %v1382_v17, %v50_v21 }
  0x3f   :  { %v357_v44 = vadd.f32 %v355_v34, %v351_v33  ;;  %v126_v33 = vstv %s1139_s5  ;;  %s1587_s5 = sld [smem:[#allocation2 + $0x206]] }
  0x40   :  { %317 = vrot.lane.b32.xlu1 %v312_v35, %s1210_s21  ;;  %v426_v35 = vstv %s1368_s23  ;;  %s1510_s23 = sld [smem:[#allocation2 + $0x87]] }
  0x41   :  { %315 = vrot.lane.b32.xlu0 %v311_v36, %s1210_s21  ;;  %v430_v36 = vstv %s1370_s24  ;;  %s1523_s24 = sld [smem:[#allocation2 + $0x283]] }
  0x42   :  { %v432_v42 = vmul.f32 %v1375_v15, %v430_v36 }
  0x44   :  { %393 = vrot.lane.b32.xlu1 %v388_v38, %s1210_s21 }
  0x45   :  { %391 = vrot.lane.b32.xlu0 %v387_v39, %s1210_s21 }
  0x48   :  { %469 = vrot.lane.b32.xlu1 %v464_v41, %s1210_s21  ;;  %v428_v41 = vmul.f32 %v426_v35, %v1238_v1 }
  0x49   :  { %467 = vrot.lane.b32.xlu0 %v463_v43, %s1210_s21 }
  0x4c   :  { %545 = vrot.lane.b32.xlu1 %v540_v47, %s1210_s21  ;;  %v427_v47 = vmul.f32 %v426_v35, %v1233_v0  ;;  %v54_v35 = vadd.f32 %v52_v26, %v48_v24 }
  0x4d   :  { %543 = vrot.lane.b32.xlu0 %v539_v49, %s1210_s21  ;;  %v431_v49 = vmul.f32 %v1382_v17, %v430_v36 }
  0x4f   :  { %v433_v61 = vadd.f32 %v431_v49, %v427_v47  ;;  %v146_v49 = vstv %s1438_s7  ;;  %s1600_s7 = sld [smem:[#allocation2 + $0x286]] }
  0x50   :  { %592 = vrot.lane.b32.xlu1 %v1238_v1, %s1210_s21 }
  0x51   :  { %590 = vrot.lane.b32.xlu0 %v1233_v0, %s1210_s21 }
  0x54   :  { %115 = vrot.lane.b32.xlu1 %v110_v53, %s1210_s21  ;;  %v506_v53 = vstv %s1392_s29 }
  0x55   :  { %113 = vrot.lane.b32.xlu0 %v109_v54, %s1210_s21 }
  0x58   :  { %191 = vrot.lane.b32.xlu1 %v186_v56, %s1210_s21 }
  0x59   :  { %189 = vrot.lane.b32.xlu0 %v185_v57, %s1210_s21  ;;  %v434_v57 = vadd.f32 %v432_v42, %v428_v41  ;;  %v70_v41 = vstv %s1434_s6  ;;  %s1598_s6 = sld [smem:[#allocation2 + $0x284]] }
  0x5c   :  { %616 = vrot.lane.b32.xlu1 %v1269_v23, %s1210_s21 }
  0x5d   :  { %614 = vrot.lane.b32.xlu0 %v1274_v25, %s1210_s21 }
  0x60   :  { %267 = vrot.lane.b32.xlu1 %v262_v59, %s1210_s21  ;;  %v508_v59 = vmul.f32 %v1375_v15, %v506_v53 }
  0x61   :  { %265 = vrot.lane.b32.xlu0 %v261_v60, %s1210_s21 }
  0x62   :  { %v510_v5 = vadd.f32 %v508_v59, %v504_v58  ;;  %v198_v59 = vstv %s1446_s8  ;;  %s1622_s8 = sld [smem:[#allocation2 + $0x304]] }
  0x64   :  { %343 = vrot.lane.b32.xlu1 %v338_v62, %s1210_s21  ;;  %v503_v62 = vmul.f32 %v502_v51, %v1233_v0  ;;  %v72_v51 = vmul.f32 %v1269_v23, %v70_v41 }
  0x65   :  { %341 = vrot.lane.b32.xlu0 %v337_v63, %s1210_s21  ;;  %v507_v63 = vmul.f32 %v1382_v17, %v506_v53 }
  0x68   :  { %419 = vrot.lane.b32.xlu1 %v414_v3, %s1210_s21 }
  0x69   :  { %417 = vrot.lane.b32.xlu0 %v413_v4, %s1210_s21 }
  0x6c   :  { %495 = vrot.lane.b32.xlu1 %v490_v6, %s1210_s21 }
  0x6d   :  { %493 = vrot.lane.b32.xlu0 %v489_v7, %s1210_s21  ;;  %v509_v7 = vadd.f32 %v507_v63, %v503_v62  ;;  %v202_v62 = vstv %s1448_s9  ;;  %v76_v63 = vstv %s1450_s10  ;;  %s1628_s9 = sld [smem:[#allocation2 + $0x187]] }
  0x6e   :  { %v203_v24 = vmul.f32 %v1382_v17, %v202_v62  ;;  %s1648_s10 = sld [smem:[#allocation2 + $0x207]] }
  0x70   :  { %628 = vrot.lane.b32.xlu1 %v1317_v50, %s1210_s21 }
  0x71   :  { %626 = vrot.lane.b32.xlu0 %v1322_v52, %s1210_s21 }
  0x74   :  { %571 = vrot.lane.b32.xlu1 %v566_v9, %s1210_s21 }
  0x75   :  { %569 = vrot.lane.b32.xlu0 %v565_v10, %s1210_s21 }
  0x8a   :  { %v1364_v11 = vpop.permute.xlu1 %137 }
  0x8b   :  { %v1366_v12 = vpop.permute.xlu0 %61 }
  0x8e   :  { %v1377_v16 = vpop.permute.xlu1 %139 }
  0x8f   :  { %v1384_v18 = vpop.permute.xlu0 %63 }
  0x90   :  { %v68_v53 = vadd.f32 %v1384_v18, %v54_v35  ;;  %v1487_v18 = vld [vmem:[%s1944_s1 + $0x30] sm:$0xff] }
  0x91   :  { %v77_v26 = vmul.f32 %v1487_v18, %v76_v63 }
  0x92   :  { %v1394_v27 = vpop.permute.xlu1 %215 }
  0x93   :  { %v1396_v28 = vpop.permute.xlu0 %213 }
  0x96   :  { %v292_v37 = vpop.permute.xlu1 %291 }
  0x97   :  { %v1404_v38 = vadd.f32 %v292_v37, %v282_v29  ;;  %v290_v39 = vpop.permute.xlu0 %289  ;;  %v127_v37 = vmul.f32 %v1382_v17, %v126_v33 }
  0x98   :  { %v1408_v43 = vadd.f32 %v290_v39, %v281_v32  ;;  %v122_v32 = vstv %s1138_s4  ;;  %s1585_s4 = sld [smem:[#allocation2 + $0x204]] }
  0x99   :  { %v123_v39 = vmul.f32 %v122_v32, %v1233_v0  ;;  %v124_v42 = vmul.f32 %v122_v32, %v1238_v1 }
  0x9a   :  { %v368_v54 = vpop.permute.xlu1 %367 }
  0x9b   :  { %v1414_v55 = vadd.f32 %v368_v54, %v358_v40  ;;  %v366_v56 = vpop.permute.xlu0 %365  ;;  %v53_v40 = vadd.f32 %v51_v30, %v47_v31  ;;  %v152_v30 = vstv %s1459_s11  ;;  %v148_v31 = vmul.f32 %v1269_v23, %v146_v49  ;;  %s1748_s11 = sld [smem:[#allocation2 + $0x287]] }
  0x9c   :  { %v1418_v60 = vadd.f32 %v366_v56, %v357_v44  ;;  %v128_v44 = vmul.f32 %v1375_v15, %v126_v33  ;;  %v129_v56 = vadd.f32 %v127_v37, %v123_v39  ;;  %v96_v33 = vstv %s1463_s12  ;;  %s1766_s12 = sld [smem:[#allocation2 + $0x306]] }
  0x9d   :  { %v67_v58 = vadd.f32 %v1366_v12, %v53_v40  ;;  %v147_v12 = vmul.f32 %v1274_v25, %v146_v49  ;;  %v204_v37 = vmul.f32 %v1375_v15, %v202_v62  ;;  %v222_v39 = vstv %s1470_s13  ;;  %s1795_s13 = sld [smem:[#allocation2 + $0x307]] }
  0x9e   :  { %v444_v2 = vpop.permute.xlu1 %443  ;;  %v143_v20 = vadd.f32 %v1364_v11, %v129_v56  ;;  %v200_v11 = vmul.f32 %v198_v59, %v1238_v1  ;;  %v153_v49 = vmul.f32 %v1487_v18, %v152_v30  ;;  %v97_v56 = vmul.f32 %v96_v33, %v1322_v52 }
  0x9f   :  { %v1422_v3 = vadd.f32 %v444_v2, %v434_v57  ;;  %v442_v4 = vpop.permute.xlu0 %441  ;;  %v71_v57 = vmul.f32 %v1274_v25, %v70_v41  ;;  %v130_v2 = vadd.f32 %v128_v44, %v124_v42 }
  0xa0   :  { %v1424_v6 = vadd.f32 %v442_v4, %v433_v61  ;;  %v1480_v61 = vld [vmem:[%s1944_s1 + $0x70] sm:$0xff]  ;;  %v149_v42 = vadd.f32 %v147_v12, %v143_v20  ;;  %v206_v12 = vadd.f32 %v204_v37, %v200_v11 }
  0xa1   :  { %v73_v21 = vadd.f32 %v71_v57, %v67_v58  ;;  %v144_v32 = vadd.f32 %v1377_v16, %v130_v2  ;;  %v98_v16 = vmul.f32 %v96_v33, %v1317_v50  ;;  %v172_v57 = vstv %s1489_s18  ;;  %v1538_v2 = vld [vmem:[%s1944_s1 + $0x51] sm:$0xff] }
  0xa2   :  { %v520_v8 = vpop.permute.xlu1 %519  ;;  %v154_v62 = vmul.f32 %v1480_v61, %v152_v30  ;;  %v178_v33 = vstv %s1510_s23 }
  0xa3   :  { %v1426_v9 = vadd.f32 %v520_v8, %v510_v5  ;;  %v518_v10 = vpop.permute.xlu0 %517  ;;  %v74_v5 = vadd.f32 %v72_v51, %v68_v53  ;;  %v78_v8 = vmul.f32 %v1480_v61, %v76_v63  ;;  %v79_v51 = vadd.f32 %v77_v26, %v73_v21 }
  0xa4   :  { %v1428_v13 = vadd.f32 %v518_v10, %v509_v7  ;;  %v199_v7 = vmul.f32 %v198_v59, %v1233_v0  ;;  %v150_v58 = vadd.f32 %v148_v31, %v144_v32  ;;  %v374_v21 = vstv %s1504_s20 }
  0xa5   :  { %1948 = vst [vmem:[#allocation6_spill] sm:$0xff] %v1426_v9  ;;  %v80_v40 = vadd.f32 %v78_v8, %v74_v5  ;;  %v223_v5 = vmul.f32 %v1274_v25, %v222_v39  ;;  %v173_v26 = vmul.f32 %v172_v57, %v1322_v52  ;;  %v228_v31 = vstv %s1508_s22 }
  0xa6   :  { %1949 = vst [vmem:[#allocation7_spill] sm:$0xff] %v1428_v13  ;;  %v1430_v14 = vpop.permute.xlu1 %89  ;;  %v205_v44 = vadd.f32 %v203_v24, %v199_v7  ;;  %v298_v7 = vstv %s1497_s19  ;;  %v155_v24 = vadd.f32 %v153_v49, %v149_v42  ;;  %v156_v37 = vadd.f32 %v154_v62, %v150_v58 }
  0xa7   :  { %v1432_v19 = vpop.permute.xlu0 %87  ;;  %v94_v53 = vadd.f32 %v1430_v14, %v80_v40  ;;  %v102_v14 = vstv %s1493_s0  ;;  %v224_v42 = vmul.f32 %v1269_v23, %v222_v39  ;;  %v1569_v49 = vmul.f32 %v1274_v25, %v298_v7 }
  0xa8   :  { %v93_v59 = vadd.f32 %v1432_v19, %v79_v51  ;;  %v1550_v19 = vld [vmem:[%s1944_s1 + $0x11] sm:$0xff]  ;;  %v219_v20 = vadd.f32 %v1396_v28, %v205_v44  ;;  %v104_v32 = vmul.f32 %v1538_v2, %v102_v14  ;;  %v1566_v44 = vmul.f32 %v1269_v23, %v298_v7  ;;  %s1574_s1 = sld [smem:[#allocation2 + $0x184]] }
  0xa9   :  { %v100_v30 = vadd.f32 %v98_v16, %v94_v53  ;;  %v103_v28 = vmul.f32 %v1550_v19, %v102_v14  ;;  %v1572_v16 = vmul.f32 %v1269_v23, %v374_v21  ;;  %v229_v39 = vmul.f32 %v1487_v18, %v228_v31 }
  0xaa   :  { %v1436_v22 = vpop.permute.xlu1 %165  ;;  %v99_v11 = vadd.f32 %v97_v56, %v93_v59  ;;  %v174_v56 = vmul.f32 %v172_v57, %v1317_v50  ;;  %v450_v59 = vstv %s1523_s24  ;;  %v248_v62 = vstv %s1529_s25 }
  0xab   :  { %v1442_v29 = vpop.permute.xlu0 %163  ;;  %v170_v58 = vadd.f32 %v1436_v22, %v156_v37  ;;  %v106_v14 = vadd.f32 %v104_v32, %v100_v30  ;;  %v179_v7 = vmul.f32 %v1550_v19, %v178_v33  ;;  %v1592_v22 = vmul.f32 %v1274_v25, %v374_v21 }
  0xac   :  { %v169_v40 = vadd.f32 %v1442_v29, %v155_v24  ;;  %v225_v29 = vadd.f32 %v223_v5, %v219_v20  ;;  %v220_v5 = vadd.f32 %v1394_v27, %v206_v12  ;;  %v105_v24 = vadd.f32 %v103_v28, %v99_v11 }
  0xad   :  { %v1595_v37 = vmul.f32 %v1269_v23, %v450_v59  ;;  %v176_v13 = vadd.f32 %v174_v56, %v170_v58  ;;  %v180_v12 = vmul.f32 %v1538_v2, %v178_v33  ;;  %v230_v21 = vmul.f32 %v1480_v61, %v228_v31 }
  0xae   :  { %v1452_v34 = vpop.permute.xlu1 %241  ;;  %v175_v20 = vadd.f32 %v173_v26, %v169_v40  ;;  %v231_v30 = vadd.f32 %v229_v39, %v225_v29  ;;  %v249_v26 = vmul.f32 %v248_v62, %v1322_v52  ;;  %v254_v11 = vstv %s1558_s30 }
  0xaf   :  { %v1454_v36 = vpop.permute.xlu0 %239  ;;  %v226_v40 = vadd.f32 %v224_v42, %v220_v5  ;;  %v1613_v33 = vmul.f32 %v1274_v25, %v450_v59  ;;  %v1616_v31 = vmul.f32 %v1269_v23, %v526_v48  ;;  %v1619_v58 = vmul.f32 %v1274_v25, %v526_v48 }
  0xb0   :  { %v245_v28 = vadd.f32 %v1454_v36, %v231_v30  ;;  %v181_v56 = vadd.f32 %v179_v7, %v175_v20  ;;  %v304_v42 = vstv %s1574_s1  ;;  %v250_v39 = vmul.f32 %v248_v62, %v1317_v50 }
  0xb1   :  { %1954 = vst [vmem:[#allocation12_spill] sm:$0xff] %v1616_v31  ;;  %1955 = vst [vmem:[#allocation13_spill] sm:$0xff] %v1619_v58  ;;  %v182_v7 = vadd.f32 %v180_v12, %v176_v13  ;;  %v306_v59 = vmul.f32 %v1480_v61, %v304_v42  ;;  %v380_v20 = vstv %s1585_s4  ;;  %v255_v48 = vmul.f32 %v1550_v19, %v254_v11 }
  0xb2   :  { %v1465_v47 = vpop.permute.xlu1 %317  ;;  %v251_v30 = vadd.f32 %v249_v26, %v245_v28  ;;  %v305_v12 = vmul.f32 %v1487_v18, %v304_v42  ;;  %v476_v28 = vstv %s1600_s7  ;;  %v301_v42 = vadd.f32 %v1569_v49, %v1408_v43 }
  0xb3   :  { %v1472_v54 = vpop.permute.xlu0 %315  ;;  %v1675_v43 = vmul.f32 %v476_v28, %v1322_v52 }
  0xb6   :  { %v1491_v4 = vpop.permute.xlu1 %393 }
  0xb7   :  { %v1500_v10 = vpop.permute.xlu0 %391 }
  0xba   :  { %v1515_v35 = vpop.permute.xlu1 %469 }
  0xbb   :  { %1950 = vst [vmem:[#allocation8_spill] sm:$0xff] %v1515_v35  ;;  %v1520_v41 = vpop.permute.xlu0 %467  ;;  %v307_v35 = vadd.f32 %v305_v12, %v301_v42  ;;  %v378_v42 = vadd.f32 %v1572_v16, %v1414_v55  ;;  %v587_v55 = vsel %vm1701_vm3, -inf, %v1238_v1  ;;  %v586_v1 = vsel %vm1701_vm3, -inf, %v1233_v0 }
  0xbc   :  { %1951 = vst [vmem:[#allocation9_spill] sm:$0xff] %v1520_v41  ;;  %v1669_v41 = vmul.f32 %v476_v28, %v1317_v50  ;;  %v605_v0 = vmax.f32 %v1269_v23, %v1317_v50 }
  0xbe   :  { %v1533_v63 = vpop.permute.xlu1 %545 }
  0xbf   :  { %1952 = vst [vmem:[#allocation10_spill] sm:$0xff] %v1533_v63  ;;  %v1545_v8 = vpop.permute.xlu0 %543 }
  0xc0   :  { %1953 = vst [vmem:[#allocation11_spill] sm:$0xff] %v1545_v8 }
  0xc2   :  { %v1561_v51 = vpop.permute.xlu1 %592 }
  0xc3   :  { %v1576_v53 = vpop.permute.xlu0 %590 }
  0xc6   :  { %v116_v57 = vpop.permute.xlu1 %115 }
  0xc7   :  { %v120_v8 = vadd.f32 %v116_v57, %v106_v14  ;;  %v114_v63 = vpop.permute.xlu0 %113  ;;  %v324_v14 = vstv %s1581_s3  ;;  %v400_v57 = vstv %s1587_s5 }
  0xc8   :  { %v1602_v27 = vadd.f32 %v114_v63, %v105_v24  ;;  %v232_v24 = vadd.f32 %v230_v21, %v226_v40  ;;  %v326_v62 = vmul.f32 %v324_v14, %v1317_v50  ;;  %v1652_v26 = vmul.f32 %v400_v57, %v1317_v50 }
  0xc9   :  { %v640_v32 = vsel %vm636_vm0, %v120_v8, 0.0  ;;  %v456_v40 = vstv %s1598_s6  ;;  %v866_v9 = vmul.f32 %v120_v8, %v120_v8 }
  0xca   :  { %v192_v29 = vpop.permute.xlu1 %191  ;;  %641 = vadd.xlane.f32.xlu1 %v640_v32  ;;  %v637_v63 = vsel %vm636_vm0, %v1602_v27, 0.0  ;;  %v246_v21 = vadd.f32 %v1452_v34, %v232_v24  ;;  %v1665_v34 = vmul.f32 %v1480_v61, %v456_v40 }
  0xcb   :  { %v190_v36 = vpop.permute.xlu0 %189  ;;  %638 = vadd.xlane.f32.xlu0 %v637_v63  ;;  %v196_v32 = vadd.f32 %v192_v29, %v182_v7  ;;  %v302_v29 = vadd.f32 %v1566_v44, %v1404_v38  ;;  %v1662_v7 = vmul.f32 %v400_v57, %v1322_v52  ;;  %v1672_v38 = vmul.f32 %v1487_v18, %v456_v40 }
  0xcc   :  { %v1626_v5 = vadd.f32 %v190_v36, %v181_v56  ;;  %v1641_v56 = vmul.f32 %v324_v14, %v1322_v52  ;;  %v1644_v36 = vmul.f32 %v1480_v61, %v380_v20  ;;  %v381_v14 = vmul.f32 %v1487_v18, %v380_v20 }
  0xcd   :  { %v646_v31 = vsel %vm636_vm0, %v196_v32, 0.0  ;;  %v252_v20 = vadd.f32 %v250_v39, %v246_v21  ;;  %v256_v57 = vmul.f32 %v1538_v2, %v254_v11  ;;  %v308_v8 = vadd.f32 %v306_v59, %v302_v29 }
  0xce   :  { %v1634_v63 = vpop.permute.xlu1 %616  ;;  %v643_v13 = vsel %vm636_vm0, %v1626_v5, 0.0  ;;  %v884_v44 = vsel %vm636_vm0, %v866_v9, 0.0  ;;  %v868_v39 = vmul.f32 %v196_v32, %v196_v32  ;;  %v1956_v21 = vstv %s1622_s8 }
  0xcf   :  { %v1646_v58 = vpop.permute.xlu0 %614  ;;  %644 = vadd.xlane.f32.xlu0 %v643_v13  ;;  %v257_v13 = vadd.f32 %v255_v48, %v251_v30  ;;  %v330_v30 = vstv %s1628_s9  ;;  %v322_v11 = vadd.f32 %v1465_v47, %v308_v8  ;;  %v406_v29 = vstv %s1648_s10 }
  0xd0   :  { %v332_v59 = vmul.f32 %v1538_v2, %v330_v30  ;;  %v321_v9 = vadd.f32 %v1472_v54, %v307_v35  ;;  %v258_v32 = vadd.f32 %v256_v57, %v252_v20  ;;  %v596_v54 = vmax.f32 %v1382_v17, %v1576_v53 }
  0xd1   :  { %v331_v35 = vmul.f32 %v1550_v19, %v330_v30  ;;  %v408_v17 = vmul.f32 %v1538_v2, %v406_v29  ;;  %v384_v20 = vadd.f32 %v1644_v36, %v378_v42  ;;  %v621_v30 = vmax.f32 %v1480_v61, %v1634_v63 }
  0xd2   :  { %v268_v24 = vpop.permute.xlu1 %267  ;;  %v600_v57 = vsel %vm581_vm1, -inf, %v596_v54 }
  0xd3   :  { %v266_v49 = vpop.permute.xlu0 %265  ;;  %647 = vadd.xlane.f32.xlu0 %v646_v31  ;;  %v865_v31 = vmul.f32 %v1602_v27, %v1602_v27  ;;  %v597_v27 = vmax.f32 %v1375_v15, %v1561_v51  ;;  %v272_v16 = vadd.f32 %v268_v24, %v258_v32  ;;  %v890_v15 = vsel %vm636_vm0, %v868_v39, 0.0 }
  0xd4   :  { %v271_v48 = vadd.f32 %v266_v49, %v257_v13  ;;  %v1690_v13 = vmul.f32 %v1480_v61, %v1956_v21  ;;  %v867_v51 = vmul.f32 %v1626_v5, %v1626_v5  ;;  %v327_v24 = vadd.f32 %v1641_v56, %v321_v9 }
  0xd5   :  { %v881_v8 = vsel %vm636_vm0, %v865_v31, 0.0  ;;  %v601_v5 = vsel %vm581_vm1, -inf, %v597_v27  ;;  %v652_v36 = vsel %vm636_vm0, %v272_v16, 0.0  ;;  %v870_v39 = vmul.f32 %v272_v16, %v272_v16 }
  0xd6   :  { %v344_v40 = vpop.permute.xlu1 %343  ;;  %v649_v28 = vsel %vm636_vm0, %v271_v48, 0.0  ;;  %v887_v56 = vsel %vm636_vm0, %v867_v51, 0.0  ;;  %v869_v31 = vmul.f32 %v271_v48, %v271_v48  ;;  %v398_v23 = vadd.f32 %v1491_v4, %v384_v20  ;;  %v1961_v20 = vld [vmem:[#allocation9_spill] sm:$0xff] }
  0xd7   :  { %650 = vadd.xlane.f32.xlu1 %v649_v28  ;;  %v342_v12 = vpop.permute.xlu0 %341  ;;  %885 = vadd.xlane.f32.xlu0 %v884_v44  ;;  %v377_v44 = vadd.f32 %v1592_v22, %v1418_v60  ;;  %v328_v60 = vadd.f32 %v326_v62, %v322_v11  ;;  %v604_v22 = vmax.f32 %v1274_v25, %v1322_v52  ;;  %v609_v48 = vsel %vm582_vm2, -inf, %v605_v0 }
  0xd8   :  { %v620_v25 = vmax.f32 %v1487_v18, %v1646_v58  ;;  %v602_v63 = vmax.f32 %v586_v1, %v600_v57  ;;  %v333_v21 = vadd.f32 %v331_v35, %v327_v24  ;;  %v454_v4 = vadd.f32 %v1595_v37, %v1422_v3  ;;  %v1962_v57 = vld [vmem:[#allocation6_spill] sm:$0xff] }
  0xd9   :  { %v383_v62 = vadd.f32 %v381_v14, %v377_v44  ;;  %v603_v14 = vmax.f32 %v587_v55, %v601_v5  ;;  %v334_v11 = vadd.f32 %v332_v59, %v328_v60  ;;  %v608_v61 = vsel %vm582_vm2, -inf, %v604_v22 }
  0xda   :  { %v1715_v49 = vpop.permute.xlu1 %419  ;;  %v453_v59 = vadd.f32 %v1613_v33, %v1424_v6  ;;  %v623_v9 = vmax.f32 %v621_v30, %v1538_v2  ;;  %v347_v47 = vadd.f32 %v342_v12, %v333_v21  ;;  %v622_v32 = vmax.f32 %v620_v25, %v1550_v19  ;;  %v1963_v30 = vld [vmem:[#allocation12_spill] sm:$0xff] }
  0xdb   :  { %v1727_v53 = vpop.permute.xlu0 %417  ;;  %882 = vadd.xlane.f32.xlu1 %v881_v8  ;;  %891 = vadd.xlane.f32.xlu0 %v890_v15  ;;  %v397_v58 = vadd.f32 %v1500_v10, %v383_v62  ;;  %v348_v42 = vadd.f32 %v344_v40, %v334_v11  ;;  %v893_v10 = vsel %vm636_vm0, %v869_v31, 0.0  ;;  %v896_v44 = vsel %vm636_vm0, %v870_v39, 0.0 }
  0xdc   :  { %v404_v46 = vadd.f32 %v1652_v26, %v398_v23  ;;  %v611_v6 = vmax.f32 %v603_v14, %v609_v48  ;;  %v407_v40 = vmul.f32 %v1550_v19, %v406_v29  ;;  %v610_v55 = vmax.f32 %v602_v63, %v608_v61 }
  0xdd   :  { %v403_v33 = vadd.f32 %v1662_v7, %v397_v58  ;;  %v460_v54 = vadd.f32 %v1665_v34, %v454_v4  ;;  %v459_v26 = vadd.f32 %v1672_v38, %v453_v59  ;;  %v658_v35 = vsel %vm636_vm0, %v348_v42, 0.0  ;;  %v1960_v38 = vld [vmem:[#allocation8_spill] sm:$0xff] }
  0xde   :  { %v1743_v28 = vpop.permute.xlu1 %495  ;;  %v655_v8 = vsel %vm636_vm0, %v347_v47, 0.0  ;;  %v871_v15 = vmul.f32 %v347_v47, %v347_v47  ;;  %v872_v51 = vmul.f32 %v348_v42, %v348_v42  ;;  %v1959_v7 = vstv %s1622_s8 }
  0xdf   :  { %v1750_v45 = vpop.permute.xlu0 %493  ;;  %888 = vadd.xlane.f32.xlu1 %v887_v56  ;;  %653 = vadd.xlane.f32.xlu0 %v652_v36  ;;  %v533_v1 = vmul.f32 %v1487_v18, %v1959_v7  ;;  %v410_v29 = vadd.f32 %v408_v17, %v404_v46  ;;  %v482_v22 = vstv %s1748_s11  ;;  %v474_v24 = vadd.f32 %v1960_v38, %v460_v54  ;;  %v1964_v18 = vld [vmem:[#allocation7_spill] sm:$0xff]  ;;  %v1965_v17 = vld [vmem:[#allocation13_spill] sm:$0xff] }
  0xe0   :  { %v473_v5 = vadd.f32 %v1961_v20, %v459_v26  ;;  %v409_v0 = vadd.f32 %v407_v40, %v403_v33  ;;  %v530_v25 = vadd.f32 %v1963_v30, %v1962_v57  ;;  %v529_v56 = vadd.f32 %v1965_v17, %v1964_v18 }
  0xe1   :  { %v424_v36 = vadd.f32 %v1715_v49, %v410_v29  ;;  %v899_v23 = vsel %vm636_vm0, %v871_v15, 0.0  ;;  %v902_v14 = vsel %vm636_vm0, %v872_v51, 0.0  ;;  %v552_v61 = vstv %s1766_s12 }
  0xe2   :  { %v629_v27 = vpop.permute.xlu1 %628  ;;  %v423_v39 = vadd.f32 %v1727_v53, %v409_v0  ;;  %v480_v58 = vadd.f32 %v1669_v41, %v474_v24  ;;  %v479_v49 = vadd.f32 %v1675_v43, %v473_v5  ;;  %v484_v63 = vmul.f32 %v1538_v2, %v482_v22  ;;  %v1966_v43 = vld [vmem:[#allocation10_spill] sm:$0xff] }
  0xe3   :  { %v633_v3 = vmax.f32 %v623_v9, %v629_v27  ;;  %v627_v37 = vpop.permute.xlu0 %626  ;;  %894 = vadd.xlane.f32.xlu1 %v893_v10  ;;  %897 = vadd.xlane.f32.xlu0 %v896_v44  ;;  %v483_v21 = vmul.f32 %v1550_v19, %v482_v22  ;;  %v536_v53 = vadd.f32 %v1690_v13, %v530_v25  ;;  %v664_v59 = vsel %vm636_vm0, %v424_v36, 0.0 }
  0xe4   :  { %v632_v12 = vmax.f32 %v622_v32, %v627_v37  ;;  %v535_v48 = vadd.f32 %v533_v1, %v529_v56  ;;  %v661_v4 = vsel %vm636_vm0, %v423_v39, 0.0  ;;  %v873_v42 = vmul.f32 %v423_v39, %v423_v39  ;;  %v1967_v32 = vld [vmem:[#allocation11_spill] sm:$0xff] }
  0xe5   :  { %v1775_v16 = vmax.f32 %v611_v6, %v633_v3  ;;  %v874_v9 = vmul.f32 %v424_v36, %v424_v36  ;;  %v554_v47 = vmul.f32 %v552_v61, %v1317_v50  ;;  %v553_v41 = vmul.f32 %v552_v61, %v1322_v52 }
  0xe6   :  { %v1778_v60 = vmax.f32 %v610_v55, %v632_v12  ;;  %v550_v27 = vadd.f32 %v1966_v43, %v536_v53  ;;  %v549_v10 = vadd.f32 %v1967_v32, %v535_v48  ;;  %v486_v44 = vadd.f32 %v484_v63, %v480_v58 }
  0xe7   :  { %656 = vadd.xlane.f32.xlu1 %v655_v8  ;;  %659 = vadd.xlane.f32.xlu0 %v658_v35  ;;  %v880_v34 = vmul.f32 %v1775_v16, %v1775_v16  ;;  %v485_v46 = vadd.f32 %v483_v21, %v479_v49  ;;  %v558_v13 = vstv %s1795_s13  ;;  %v905_v6 = vsel %vm636_vm0, %v873_v42, 0.0  ;;  %v572_v35 = vpop.permute.xlu1 %571 }
  0xe8   :  { %v879_v62 = vmul.f32 %v1778_v60, %v1778_v60  ;;  %v500_v3 = vadd.f32 %v1743_v28, %v486_v44  ;;  %v908_v33 = vsel %vm636_vm0, %v874_v9, 0.0  ;;  %v556_v50 = vadd.f32 %v554_v47, %v550_v27 }
  0xe9   :  { %v1798_v31 = vsel %vm636_vm0, %v880_v34, 0.0  ;;  %v499_v37 = vadd.f32 %v1750_v45, %v485_v46  ;;  %v555_v52 = vadd.f32 %v553_v41, %v549_v10  ;;  %v560_v40 = vmul.f32 %v1538_v2, %v558_v13  ;;  %v570_v45 = vpop.permute.xlu0 %569 }
  0xea   :  { %v923_v11 = vsel %vm636_vm0, %v879_v62, 0.0  ;;  %v559_v12 = vmul.f32 %v1550_v19, %v558_v13  ;;  %v670_v54 = vsel %vm636_vm0, %v500_v3, 0.0  ;;  %v876_v28 = vmul.f32 %v500_v3, %v500_v3  ;;  %v1968_v62 = vld [vmem:[#allocation5_spill] sm:$0xff] }
  0xeb   :  { %900 = vadd.xlane.f32.xlu1 %v899_v23  ;;  %903 = vadd.xlane.f32.xlu0 %v902_v14  ;;  %v667_v55 = vsel %vm636_vm0, %v499_v37, 0.0  ;;  %v875_v26 = vmul.f32 %v499_v37, %v499_v37  ;;  %v562_v8 = vadd.f32 %v560_v40, %v556_v50  ;;  %v679_v20 = vsel %vm636_vm0, %v1778_v60, 0.0 }
  0xec   :  { %v561_v15 = vadd.f32 %v559_v12, %v555_v52  ;;  %v914_v2 = vsel %vm636_vm0, %v876_v28, 0.0  ;;  %v682_v5 = vsel %vm636_vm0, %v1775_v16, 0.0 }
  0xed   :  { %v576_v51 = vadd.f32 %v572_v35, %v562_v8  ;;  %v911_v1 = vsel %vm636_vm0, %v875_v26, 0.0 }
  0xee   :  { %v575_v7 = vadd.f32 %v570_v45, %v561_v15 }
  0xef   :  { %662 = vadd.xlane.f32.xlu1 %v661_v4  ;;  %665 = vadd.xlane.f32.xlu0 %v664_v59  ;;  %v676_v29 = vsel %vm636_vm0, %v576_v51, 0.0  ;;  %v878_v34 = vmul.f32 %v576_v51, %v576_v51 }
  0xf0   :  { %v673_v19 = vsel %vm636_vm0, %v575_v7, 0.0  ;;  %v877_v22 = vmul.f32 %v575_v7, %v575_v7 }
  0xf1   :  { %v920_v24 = vsel %vm636_vm0, %v878_v34, 0.0 }
  0xf2   :  { %v917_v38 = vsel %vm636_vm0, %v877_v22, 0.0 }
  0xf3   :  { %906 = vadd.xlane.f32.xlu1 %v905_v6  ;;  %909 = vadd.xlane.f32.xlu0 %v908_v33 }
  0xf7   :  { %668 = vadd.xlane.f32.xlu1 %v667_v55  ;;  %671 = vadd.xlane.f32.xlu0 %v670_v54 }
  0xfb   :  { %912 = vadd.xlane.f32.xlu1 %v911_v1  ;;  %915 = vadd.xlane.f32.xlu0 %v914_v2 }
  0xff   :  { %674 = vadd.xlane.f32.xlu1 %v673_v19  ;;  %677 = vadd.xlane.f32.xlu0 %v676_v29 }
 0x103   :  { %918 = vadd.xlane.f32.xlu1 %v917_v38  ;;  %921 = vadd.xlane.f32.xlu0 %v920_v24 }
 0x107   :  { %680 = vadd.xlane.f32.xlu1 %v679_v20  ;;  %683 = vadd.xlane.f32.xlu0 %v682_v5 }
 0x10b   :  { %924 = vadd.xlane.f32.xlu1 %v923_v11  ;;  %927 = vadd.xlane.f32.xlu0 %v1798_v31 }
 0x157   :  { %v642_v0 = vpop.xlane.xlu1 %641 }
 0x158   :  { %v708_v57 = vrot.slane %v642_v0, %v1968_v62  ;;  %v639_v30 = vpop.xlane.xlu0 %638 }
 0x159   :  { %v704_v25 = vrot.slane %v639_v30, %v1968_v62 }
 0x15b   :  { %v766_v18 = vsel %vm765_vm4, %v708_v57, %v704_v25 }
 0x15c   :  { %v645_v17 = vpop.xlane.xlu0 %644  ;;  %v783_v60 = vsel %vm28_vm5, %v766_v18, 0.0 }
 0x15d   :  { %784 = vadd.xlane.f32.xlu1 %v783_v60  ;;  %v712_v56 = vrot.slane %v645_v17, %v1968_v62 }
 0x160   :  { %v648_v16 = vpop.xlane.xlu0 %647 }
 0x161   :  { %v716_v36 = vrot.slane %v648_v16, %v1968_v62 }
 0x163   :  { %v767_v31 = vsel %vm765_vm4, %v716_v36, %v712_v56 }
 0x164   :  { %v651_v39 = vpop.xlane.xlu1 %650  ;;  %v1843_v23 = vpop.xlane.xlu0 %885  ;;  %v786_v14 = vsel %vm28_vm5, %v767_v31, 0.0 }
 0x165   :  { %787 = vadd.xlane.f32.xlu0 %v786_v14  ;;  %v720_v63 = vrot.slane %v651_v39, %v1968_v62  ;;  %v952_v20 = vrot.slane %v1843_v23, %v1968_v62 }
 0x168   :  { %v1846_v11 = vpop.xlane.xlu1 %882  ;;  %v892_v61 = vpop.xlane.xlu0 %891 }
 0x169   :  { %v960_v21 = vrot.slane %v892_v61, %v1968_v62  ;;  %v948_v34 = vrot.slane %v1846_v11, %v1968_v62 }
 0x16b   :  { %v1009_v17 = vsel %vm765_vm4, %v952_v20, %v948_v34 }
 0x16c   :  { %v889_v58 = vpop.xlane.xlu1 %888  ;;  %v654_v49 = vpop.xlane.xlu0 %653  ;;  %v1025_v31 = vsel %vm28_vm5, %v1009_v17, 0.0 }
 0x16d   :  { %v956_v53 = vrot.slane %v889_v58, %v1968_v62  ;;  %v724_v48 = vrot.slane %v654_v49, %v1968_v62 }
 0x16f   :  { %v1010_v4 = vsel %vm765_vm4, %v960_v21, %v956_v53  ;;  %v768_v59 = vsel %vm765_vm4, %v724_v48, %v720_v63 }
 0x170   :  { %v895_v42 = vpop.xlane.xlu1 %894  ;;  %v898_v9 = vpop.xlane.xlu0 %897  ;;  %v1028_v47 = vsel %vm28_vm5, %v1010_v4, 0.0  ;;  %v789_v41 = vsel %vm28_vm5, %v768_v59, 0.0 }
 0x171   :  { %v964_v43 = vrot.slane %v895_v42, %v1968_v62  ;;  %v968_v27 = vrot.slane %v898_v9, %v1968_v62  ;;  %1029 = vadd.xlane.f32.xlu0 %v1028_v47  ;;  %790 = vadd.xlane.f32.xlu1 %v789_v41 }
 0x173   :  { %v1011_v32 = vsel %vm765_vm4, %v968_v27, %v964_v43 }
 0x174   :  { %v657_v10 = vpop.xlane.xlu1 %656  ;;  %v660_v44 = vpop.xlane.xlu0 %659  ;;  %v1031_v46 = vsel %vm28_vm5, %v1011_v32, 0.0 }
 0x175   :  { %v728_v13 = vrot.slane %v657_v10, %v1968_v62  ;;  %v732_v3 = vrot.slane %v660_v44, %v1968_v62  ;;  %1032 = vadd.xlane.f32.xlu0 %v1031_v46 }
 0x177   :  { %v769_v37 = vsel %vm765_vm4, %v732_v3, %v728_v13 }
 0x178   :  { %v901_v6 = vpop.xlane.xlu1 %900  ;;  %v904_v33 = vpop.xlane.xlu0 %903  ;;  %v792_v50 = vsel %vm28_vm5, %v769_v37, 0.0 }
 0x179   :  { %v972_v52 = vrot.slane %v901_v6, %v1968_v62  ;;  %v976_v40 = vrot.slane %v904_v33, %v1968_v62  ;;  %793 = vadd.xlane.f32.xlu1 %v792_v50 }
 0x17b   :  { %v1012_v12 = vsel %vm765_vm4, %v976_v40, %v972_v52 }
 0x17c   :  { %v663_v55 = vpop.xlane.xlu1 %662  ;;  %v666_v54 = vpop.xlane.xlu0 %665  ;;  %v1034_v26 = vsel %vm28_vm5, %v1012_v12, 0.0 }
 0x17d   :  { %v736_v28 = vrot.slane %v663_v55, %v1968_v62  ;;  %v740_v35 = vrot.slane %v666_v54, %v1968_v62  ;;  %1035 = vadd.xlane.f32.xlu0 %v1034_v26 }
 0x17f   :  { %v770_v45 = vsel %vm765_vm4, %v740_v35, %v736_v28 }
 0x180   :  { %v907_v8 = vpop.xlane.xlu1 %906  ;;  %v910_v15 = vpop.xlane.xlu0 %909  ;;  %v795_v51 = vsel %vm28_vm5, %v770_v45, 0.0 }
 0x181   :  { %v980_v7 = vrot.slane %v907_v8, %v1968_v62  ;;  %v984_v1 = vrot.slane %v910_v15, %v1968_v62  ;;  %796 = vadd.xlane.f32.xlu1 %v795_v51 }
 0x183   :  { %v1013_v2 = vsel %vm765_vm4, %v984_v1, %v980_v7 }
 0x184   :  { %v669_v19 = vpop.xlane.xlu1 %668  ;;  %v672_v29 = vpop.xlane.xlu0 %671  ;;  %v1037_v22 = vsel %vm28_vm5, %v1013_v2, 0.0 }
 0x185   :  { %v744_v38 = vrot.slane %v669_v19, %v1968_v62  ;;  %v748_v24 = vrot.slane %v672_v29, %v1968_v62  ;;  %1038 = vadd.xlane.f32.xlu0 %v1037_v22 }
 0x187   :  { %v771_v5 = vsel %vm765_vm4, %v748_v24, %v744_v38 }
 0x188   :  { %v913_v0 = vpop.xlane.xlu1 %912  ;;  %v916_v57 = vpop.xlane.xlu0 %915  ;;  %v798_v30 = vsel %vm28_vm5, %v771_v5, 0.0 }
 0x189   :  { %v988_v25 = vrot.slane %v913_v0, %v1968_v62  ;;  %v992_v18 = vrot.slane %v916_v57, %v1968_v62  ;;  %799 = vadd.xlane.f32.xlu1 %v798_v30 }
 0x18b   :  { %v1014_v60 = vsel %vm765_vm4, %v992_v18, %v988_v25 }
 0x18c   :  { %v675_v16 = vpop.xlane.xlu1 %674  ;;  %v678_v56 = vpop.xlane.xlu0 %677  ;;  %v1040_v36 = vsel %vm28_vm5, %v1014_v60, 0.0 }
 0x18d   :  { %v752_v39 = vrot.slane %v675_v16, %v1968_v62  ;;  %v756_v23 = vrot.slane %v678_v56, %v1968_v62  ;;  %1041 = vadd.xlane.f32.xlu0 %v1040_v36  ;;  %1026 = vadd.xlane.f32.xlu1 %v1025_v31 }
 0x18f   :  { %v772_v14 = vsel %vm765_vm4, %v756_v23, %v752_v39 }
 0x190   :  { %v919_v11 = vpop.xlane.xlu1 %918  ;;  %v922_v61 = vpop.xlane.xlu0 %921  ;;  %v801_v58 = vsel %vm28_vm5, %v772_v14, 0.0 }
 0x191   :  { %v996_v49 = vrot.slane %v919_v11, %v1968_v62  ;;  %v1000_v63 = vrot.slane %v922_v61, %v1968_v62  ;;  %802 = vadd.xlane.f32.xlu1 %v801_v58 }
 0x193   :  { %v1015_v21 = vsel %vm765_vm4, %v1000_v63, %v996_v49  ;;  %v1211_v63 = vmov 0.0  }
 0x194   :  { %v681_v53 = vpop.xlane.xlu1 %680  ;;  %v684_v48 = vpop.xlane.xlu0 %683  ;;  %v1043_v4 = vsel %vm28_vm5, %v1015_v21, 0.0  ;;  %29 = vst.msk [vmem:[%s1945_s2] sm:$0x3] %vm28_vm5, %v1211_v63 }
 0x195   :  { %v760_v59 = vrot.slane %v681_v53, %v1968_v62  ;;  %v764_v42 = vrot.slane %v684_v48, %v1968_v62  ;;  %1044 = vadd.xlane.f32.xlu0 %v1043_v4 }
 0x197   :  { %v773_v9 = vsel %vm765_vm4, %v764_v42, %v760_v59 }
 0x198   :  { %v925_v47 = vpop.xlane.xlu1 %924  ;;  %v928_v41 = vpop.xlane.xlu0 %927  ;;  %v804_v43 = vsel %vm28_vm5, %v773_v9, 0.0 }
 0x199   :  { %v1004_v27 = vrot.slane %v925_v47, %v1968_v62  ;;  %v1008_v32 = vrot.slane %v928_v41, %v1968_v62  ;;  %805 = vadd.xlane.f32.xlu1 %v804_v43 }
 0x19b   :  { %v1016_v10 = vsel %vm765_vm4, %v1008_v32, %v1004_v27  ;;  %v1100_v4 = vld [vmem:[%s1945_s2] sm:$0x3] }
 0x19c   :  { %v1046_v44 = vsel %vm28_vm5, %v1016_v10, 0.0 }
 0x19d   :  { %1047 = vadd.xlane.f32.xlu0 %v1046_v44 }
 0x1ea   :  { %v785_v46 = vpop.xlane.xlu1 %784 }
 0x1eb   :  { %v818_v15 = vrot.slane %v785_v46, %v1968_v62 }
 0x1f2   :  { %v788_v3 = vpop.xlane.xlu0 %787 }
 0x1f3   :  { %v822_v28 = vrot.slane %v788_v3, %v1968_v62 }
 0x1f5   :  { %v847_v29 = vsel %vm765_vm4, %v822_v28, %v818_v15 }
 0x1fe   :  { %v791_v13 = vpop.xlane.xlu1 %790  ;;  %v1030_v6 = vpop.xlane.xlu0 %1029 }
 0x1ff   :  { %v1064_v54 = vrot.slane %v1030_v6, %v1968_v62  ;;  %v826_v45 = vrot.slane %v791_v13, %v1968_v62 }
 0x201   :  { %v849_v38 = vsel %vm848_vm6, %v826_v45, %v847_v29 }
 0x202   :  { %v1033_v50 = vpop.xlane.xlu0 %1032 }
 0x203   :  { %v1068_v8 = vrot.slane %v1033_v50, %v1968_v62 }
 0x206   :  { %v794_v37 = vpop.xlane.xlu1 %793 }
 0x207   :  { %v830_v51 = vrot.slane %v794_v37, %v1968_v62 }
 0x209   :  { %v851_v20 = vsel %vm850_vm7, %v830_v51, %v849_v38 }
 0x20a   :  { %v1036_v40 = vpop.xlane.xlu0 %1035 }
 0x20b   :  { %v1072_v22 = vrot.slane %v1036_v40, %v1968_v62 }
 0x20e   :  { %v797_v33 = vpop.xlane.xlu1 %796 }
 0x20f   :  { %v834_v2 = vrot.slane %v797_v33, %v1968_v62 }
 0x211   :  { %v853_v57 = vsel %vm852_vm8, %v834_v2, %v851_v20 }
 0x212   :  { %v1039_v26 = vpop.xlane.xlu0 %1038 }
 0x213   :  { %v1076_v30 = vrot.slane %v1039_v26, %v1968_v62 }
 0x216   :  { %v800_v52 = vpop.xlane.xlu1 %799 }
 0x217   :  { %v838_v34 = vrot.slane %v800_v52, %v1968_v62 }
 0x219   :  { %v855_v18 = vsel %vm854_vm9, %v838_v34, %v853_v57 }
 0x21a   :  { %v1027_v12 = vpop.xlane.xlu1 %1026  ;;  %v1042_v7 = vpop.xlane.xlu0 %1041 }
 0x21b   :  { %v1060_v55 = vrot.slane %v1027_v12, %v1968_v62  ;;  %v1080_v36 = vrot.slane %v1042_v7, %v1968_v62 }
 0x21d   :  { %v1089_v35 = vsel %vm765_vm4, %v1064_v54, %v1060_v55 }
 0x21e   :  { %v803_v1 = vpop.xlane.xlu1 %802  ;;  %v1090_v19 = vsel %vm848_vm6, %v1068_v8, %v1089_v35 }
 0x21f   :  { %v842_v24 = vrot.slane %v803_v1, %v1968_v62  ;;  %v1091_v5 = vsel %vm850_vm7, %v1072_v22, %v1090_v19 }
 0x220   :  { %v1092_v56 = vsel %vm852_vm8, %v1076_v30, %v1091_v5 }
 0x221   :  { %v857_v16 = vsel %vm856_vm10, %v842_v24, %v855_v18  ;;  %v1093_v11 = vsel %vm854_vm9, %v1080_v36, %v1092_v56 }
 0x222   :  { %v1045_v0 = vpop.xlane.xlu0 %1044 }
 0x223   :  { %v1084_v60 = vrot.slane %v1045_v0, %v1968_v62 }
 0x225   :  { %v1094_v61 = vsel %vm856_vm10, %v1084_v60, %v1093_v11 }
 0x226   :  { %v806_v25 = vpop.xlane.xlu1 %805 }
 0x227   :  { %v846_v17 = vrot.slane %v806_v25, %v1968_v62 }
 0x229   :  { %v859_v31 = vsel %vm858_vm11, %v846_v17, %v857_v16 }
 0x22a   :  { %v1048_v39 = vpop.xlane.xlu0 %1047  ;;  %v862_v23 = vsel %vm861_vm12, %v859_v31, 0.0 }
 0x22b   :  { %v1088_v14 = vrot.slane %v1048_v39, %v1968_v62  ;;  %863 = vadd.xlane.f32.xlu1 %v862_v23 }
 0x22d   :  { %v1095_v58 = vsel %vm858_vm11, %v1088_v14, %v1094_v61 }
 0x22e   :  { %v1097_v49 = vsel %vm861_vm12, %v1095_v58, 0.0 }
 0x22f   :  { %1098 = vadd.xlane.f32.xlu0 %v1097_v49 }
 0x2b8   :  { %v864_v21 = vpop.xlane.xlu1 %863 }
 0x2b9   :  { %v1105_v48 = vrot.slane %v864_v21, %v1968_v62 }
 0x2bc   :  { %v1099_v53 = vpop.xlane.xlu0 %1098 }
 0x2bd   :  { %v1111_v59 = vrot.slane %v1099_v53, %v1968_v62 }
 0x2bf   :  { %v1114_v42 = vsel %vm1113_vm13, %v1105_v48, %v1111_v59 }
 0x2c0   :  { %v1115_v9 = vadd.f32 %v1114_v42, %v1100_v4 }
 0x2c2   :  { %1116 = vst.msk [vmem:[%s1945_s2] sm:$0x3] %vm28_vm5, %v1115_v9 }
 0x2c3   :  { %1121 = vsyncpa [#allocation3], 1 }

// kernel: initial_block_forward.3
= control target key start
LH: loop header
LB: loop body
LE: loop exit
PB: predicated region body
PF: predicated region fallthrough
CT: control target
= control target key end

     0   :  { %8 = vsyncpa [#allocation4], 0  ;;  %s1521_s0 = inlined_call_operand.vmem [shape: f32[7,9], index: 0, kind: input, shape index: {}]   ;;  %s1522_s1 = inlined_call_operand.vmem [shape: f32[2,8], index: 1, kind: input, shape index: {}]   ;;  %s1523_s2 = inlined_call_operand.vmem [shape: f32[2,4,9,9], index: 2, kind: input, shape index: {}]   ;;  %s1524_s3 = inlined_call_operand.hbm [shape: f32[2,8,8,8], index: 3, kind: output, shape index: {}]  }
   0x1   :  { %9 = vsyncpa [#allocation6], 0 }
   0x2   :  { %10 = vsyncpa [#allocation3], 0  ;;  %s17_s14 = sshll.u32 %s1521_s0, 4  ;;  %s27_s17 = sshll.u32 %s1522_s1, 4  ;;  %s18_s14 = int_to_ptr.vmem [resolvable:$true] %s17_s14  ;;  %s28_s17 = int_to_ptr.vmem [resolvable:$true] %s27_s17 }
   0x3   :  { %s825_s18 = scalar_lea.vmem %s18_s14, 128  ;;  %p830_p1 = scmp.lt.s32.totalorder %s18_s14, %s18_s14 }
   0x4   :  { %p826_p0 = scmp.ne.s32.totalorder %s18_s14, %s825_s18  ;;  %p831_p2 = scmp.lt.s32.totalorder %s825_s18, %s825_s18 }
   0x6   :  { %p832_p3 = por %p831_p2, %p830_p1 }
   0x8   :  { %p833_p4 = pnand %p832_p3, %p826_p0 }
   0xa   :  { %836 = shalt.err (!%p833_p4)
}
   0xb   :  { %s877_s19 = smov [#allocation2]   ;;  %s837_s20 = scalar_lea.vmem %s28_s17, 32 }
   0xc   :  { %20 = dma.vmem_to_smem %s18_s14, 128, %s877_s19, [#allocation4]  }
   0xd   :  { %p838_p5 = scmp.ne.s32.totalorder %s28_s17, %s837_s20  ;;  %p842_p6 = scmp.lt.s32.totalorder %s28_s17, %s28_s17 }
   0xe   :  { %p843_p7 = scmp.lt.s32.totalorder %s837_s20, %s837_s20 }
  0x10   :  { %p844_p8 = por %p843_p7, %p842_p6 }
  0x12   :  { %p845_p9 = pnand %p844_p8, %p838_p5 }
  0x14   :  { %848 = shalt.err (!%p845_p9)
}
  0x15   :  { %s878_s0 = smov [#allocation5]  }
  0x16   :  { %30 = dma.vmem_to_smem %s28_s17, 32, %s878_s0, [#allocation6]  }
  0x17   :  { %871 = dma.done.wait [#allocation4], 128  }
  0x18   :  { %872 = vsyncadd [#allocation4], 4294967168 }
  0x19   :  { %873 = dma.done.wait [#allocation6], 32  }
  0x1a   :  { %874 = vsyncadd [#allocation6], 4294967264 }
  0x1b   :  { %39 = sfence }
  0x1c   :  { %s752_s1 = sld [smem:[#allocation2 + $0x5]]  ;;  %s749_s21 = sld [smem:[#allocation2 + $0x2]]  ;;  %v912_v0 = vld [vmem:[%s1523_s2 + $0x20] sm:$0xff]  ;;  %vm137_vm0 = vcmask 64512  }
  0x1d   :  { %s755_s22 = sld [smem:[#allocation2 + $0x8]]  ;;  %v917_v1 = vld [vmem:[%s1523_s2] sm:$0xff]  ;;  %s759_s29 = sld [smem:[#allocation2 + $0x82]] }
  0x1e   :  { %v922_v2 = vld [vmem:[%s1523_s2 + $0x60] sm:$0xff]  ;;  %s879_s5 = smov 127   ;;  %s762_s8 = sld [smem:[#allocation2 + $0x85]] }
  0x1f   :  { %v928_v5 = vld [vmem:[%s1523_s2 + $0x40] sm:$0xff]  ;;  %s769_s11 = sld [smem:[#allocation2 + $0x102]]  ;;  %s772_s16 = sld [smem:[#allocation2 + $0x105]] }
  0x20   :  { %v938_v10 = vld [vmem:[%s1523_s2 + $0x41] sm:$0xff]  ;;  %s779_s12 = sld [smem:[#allocation2 + $0x182]]  ;;  %s782_s17 = sld [smem:[#allocation2 + $0x185]] }
  0x21   :  { %v943_v12 = vld [vmem:[%s1523_s2 + $0x1] sm:$0xff]  ;;  %s789_s13 = sld [smem:[#allocation2 + $0x202]]  ;;  %s792_s18 = sld [smem:[#allocation2 + $0x205]] }
  0x22   :  { %v92_v3 = vstv %s752_s1  ;;  %v66_v6 = vstv %s749_s21  ;;  %s799_s14 = sld [smem:[#allocation2 + $0x282]]  ;;  %s802_s19 = sld [smem:[#allocation2 + $0x285]] }
  0x23   :  { %v93_v4 = vmul.f32 %v912_v0, %v92_v3  ;;  %v67_v7 = vmul.f32 %v66_v6, %v917_v1  ;;  %v94_v8 = vmul.f32 %v922_v2, %v92_v3  ;;  %v68_v9 = vmul.f32 %v66_v6, %v928_v5  ;;  %s809_s15 = sld [smem:[#allocation2 + $0x302]]  ;;  %s812_s20 = sld [smem:[#allocation2 + $0x305]] }
  0x24   :  { %v118_v11 = vstv %s755_s22  ;;  %v151_v15 = vstv %s759_s29  ;;  %v177_v18 = vstv %s762_s8  ;;  %s765_s0 = sld [smem:[#allocation2 + $0x88]]  ;;  %s748_s26 = sld [smem:[#allocation2 + $0x1]] }
  0x25   :  { %97 = vrot.lane.b32.xlu1 %v93_v4, %s879_s5  ;;  %71 = vrot.lane.b32.xlu0 %v67_v7, %s879_s5  ;;  %v120_v13 = vmul.f32 %v118_v11, %v938_v10  ;;  %v119_v14 = vmul.f32 %v118_v11, %v943_v12  ;;  %v153_v16 = vmul.f32 %v151_v15, %v928_v5  ;;  %v236_v21 = vstv %s769_s11  ;;  %s775_s1 = sld [smem:[#allocation2 + $0x108]]  ;;  %s1035_s27 = sld [smem:[#allocation2 + $0x3]] }
  0x26   :  { %v152_v17 = vmul.f32 %v151_v15, %v917_v1  ;;  %v179_v19 = vmul.f32 %v922_v2, %v177_v18  ;;  %v178_v20 = vmul.f32 %v912_v0, %v177_v18  ;;  %v238_v22 = vmul.f32 %v236_v21, %v928_v5  ;;  %s785_s21 = sld [smem:[#allocation2 + $0x188]]  ;;  %s1037_s28 = sld [smem:[#allocation2 + $0x4]]  ;;  %v1063_v18 = vld [vmem:[%s1523_s2 + $0x30] sm:$0xff] }
  0x27   :  { %v237_v23 = vmul.f32 %v236_v21, %v917_v1  ;;  %v321_v24 = vstv %s779_s12  ;;  %v406_v27 = vstv %s789_s13  ;;  %v262_v36 = vstv %s772_s16  ;;  %s795_s22 = sld [smem:[#allocation2 + $0x208]]  ;;  %s1044_s4 = sld [smem:[#allocation2 + $0x6]] }
  0x28   :  { %v323_v25 = vmul.f32 %v321_v24, %v928_v5  ;;  %v322_v26 = vmul.f32 %v321_v24, %v917_v1  ;;  %v408_v28 = vmul.f32 %v406_v27, %v928_v5  ;;  %v407_v29 = vmul.f32 %v406_v27, %v917_v1  ;;  %s805_s23 = sld [smem:[#allocation2 + $0x288]]  ;;  %s1050_s6 = sld [smem:[#allocation2 + $0x81]] }
  0x29   :  { %99 = vrot.lane.b32.xlu1 %v94_v8, %s879_s5  ;;  %73 = vrot.lane.b32.xlu0 %v68_v9, %s879_s5  ;;  %v491_v30 = vstv %s799_s14  ;;  %v576_v33 = vstv %s809_s15  ;;  %v264_v37 = vmul.f32 %v922_v2, %v262_v36  ;;  %v263_v38 = vmul.f32 %v912_v0, %v262_v36  ;;  %s815_s24 = sld [smem:[#allocation2 + $0x308]]  ;;  %s1057_s9 = sld [smem:[#allocation2 + $0x7]] }
  0x2a   :  { %v493_v31 = vmul.f32 %v491_v30, %v928_v5  ;;  %v492_v32 = vmul.f32 %v491_v30, %v917_v1  ;;  %v578_v34 = vmul.f32 %v576_v33, %v928_v5  ;;  %v577_v35 = vmul.f32 %v576_v33, %v917_v1  ;;  %s55_s25 = sld [smem:[#allocation2]]  ;;  %v1042_v9 = vld [vmem:[%s1523_s2 + $0x10] sm:$0xff]  ;;  %s1068_s12 = sld [smem:[#allocation2 + $0x83]] }
  0x2b   :  { %v347_v39 = vstv %s782_s17  ;;  %v432_v42 = vstv %s792_s18  ;;  %v517_v45 = vstv %s802_s19  ;;  %v602_v48 = vstv %s812_s20  ;;  %s1071_s13 = sld [smem:[#allocation2 + $0x100]]  ;;  %s1073_s14 = sld [smem:[#allocation2 + $0x101]] }
  0x2c   :  { %v349_v40 = vmul.f32 %v922_v2, %v347_v39  ;;  %v348_v41 = vmul.f32 %v912_v0, %v347_v39  ;;  %v434_v43 = vmul.f32 %v922_v2, %v432_v42  ;;  %v433_v44 = vmul.f32 %v912_v0, %v432_v42  ;;  %s1091_s19 = sld [smem:[#allocation2 + $0x180]]  ;;  %s1154_s29 = sld [smem:[#allocation2 + $0x301]] }
  0x2d   :  { %125 = vrot.lane.b32.xlu1 %v120_v13, %s879_s5  ;;  %123 = vrot.lane.b32.xlu0 %v119_v14, %s879_s5  ;;  %v519_v46 = vmul.f32 %v922_v2, %v517_v45  ;;  %v518_v47 = vmul.f32 %v912_v0, %v517_v45  ;;  %v604_v49 = vmul.f32 %v922_v2, %v602_v48  ;;  %v203_v51 = vstv %s765_s0  ;;  %s1094_s20 = sld [smem:[#allocation5 + $0x80]]  ;;  %s1101_s0 = sld [smem:[#allocation2 + $0x181]] }
  0x2e   :  { %v603_v50 = vmul.f32 %v912_v0, %v602_v48  ;;  %v205_v52 = vmul.f32 %v203_v51, %v938_v10  ;;  %v204_v53 = vmul.f32 %v203_v51, %v943_v12  ;;  %v288_v54 = vstv %s775_s1  ;;  %s1105_s1 = sld [smem:[#allocation2 + $0x103]]  ;;  %s1243_s7 = sld [smem:[#allocation2 + $0x104]] }
  0x2f   :  { %v290_v55 = vmul.f32 %v288_v54, %v938_v10  ;;  %v289_v56 = vmul.f32 %v288_v54, %v943_v12  ;;  %v373_v57 = vstv %s785_s21  ;;  %v458_v60 = vstv %s795_s22  ;;  %s1164_s30 = sld [smem:[#allocation2 + $0x283]]  ;;  %s1245_s8 = sld [smem:[#allocation2 + $0x106]] }
  0x30   :  { %v375_v58 = vmul.f32 %v373_v57, %v938_v10  ;;  %v374_v59 = vmul.f32 %v373_v57, %v943_v12  ;;  %v460_v61 = vmul.f32 %v458_v60, %v938_v10  ;;  %v459_v62 = vmul.f32 %v458_v60, %v943_v12  ;;  %s1256_s10 = sld [smem:[#allocation2 + $0x186]]  ;;  %s1260_s11 = sld [smem:[#allocation2 + $0x204]] }
  0x31   :  { %158 = vrot.lane.b32.xlu1 %v153_v16, %s879_s5  ;;  %156 = vrot.lane.b32.xlu0 %v152_v17, %s879_s5  ;;  %v543_v63 = vstv %s805_s23  ;;  %v628_v6 = vstv %s815_s24  ;;  %s1114_s23 = sld [smem:[#allocation2 + $0x200]]  ;;  %s1116_s24 = sld [smem:[#allocation2 + $0x201]] }
  0x32   :  { %v545_v3 = vmul.f32 %v543_v63, %v938_v10  ;;  %v544_v4 = vmul.f32 %v543_v63, %v943_v12  ;;  %v630_v7 = vmul.f32 %v628_v6, %v938_v10  ;;  %v629_v8 = vmul.f32 %v628_v6, %v943_v12  ;;  %v1055_v16 = vld [vmem:[%s1523_s2 + $0x50] sm:$0xff]  ;;  %s1275_s15 = sld [smem:[#allocation2 + $0x87]]  ;;  %s1278_s16 = sld [smem:[#allocation2 + $0x286]] }
  0x33   :  { %v56_v11 = vstv %s55_s25  ;;  %v60_v13 = vstv %s748_s26  ;;  %v80_v17 = vstv %s1035_s27  ;;  %v106_v27 = vstv %s1044_s4  ;;  %s1131_s25 = sld [smem:[#allocation2 + $0x280]]  ;;  %s1133_s26 = sld [smem:[#allocation2 + $0x281]] }
  0x34   :  { %v61_v14 = vmul.f32 %v1042_v9, %v60_v13  ;;  %v57_v15 = vmul.f32 %v56_v11, %v917_v1  ;;  %v58_v21 = vmul.f32 %v56_v11, %v928_v5  ;;  %v81_v24 = vmul.f32 %v912_v0, %v80_v17  ;;  %s1144_s27 = sld [smem:[#allocation2 + $0x203]]  ;;  %s1280_s17 = sld [smem:[#allocation2 + $0x107]] }
  0x35   :  { %184 = vrot.lane.b32.xlu1 %v179_v19, %s879_s5  ;;  %182 = vrot.lane.b32.xlu0 %v178_v20, %s879_s5  ;;  %v86_v19 = vstv %s1037_s28  ;;  %v112_v36 = vstv %s1057_s9  ;;  %s1152_s28 = sld [smem:[#allocation2 + $0x300]]  ;;  %s1176_s4 = sld [smem:[#allocation2 + $0x303]] }
  0x36   :  { %v63_v20 = vadd.f32 %v61_v14, %v57_v15  ;;  %v165_v48 = vstv %s1068_s12  ;;  %v230_v54 = vstv %s1073_s14  ;;  %v311_v11 = vstv %s1091_s19  ;;  %s1254_s9 = sld [smem:[#allocation2 + $0x184]]  ;;  %s1290_s18 = sld [smem:[#allocation2 + $0x187]] }
  0x37   :  { %s1262_s12 = sld [smem:[#allocation2 + $0x284]]  ;;  %s1292_s19 = sld [smem:[#allocation2 + $0x207]] }
  0x38   :  { %s1272_s14 = sld [smem:[#allocation2 + $0x304]]  ;;  %s1367_s21 = sld [smem:[#allocation5 + $0x87]] }
  0x39   :  { %243 = vrot.lane.b32.xlu1 %v238_v22, %s879_s5  ;;  %241 = vrot.lane.b32.xlu0 %v237_v23, %s879_s5  ;;  %v62_v22 = vmul.f32 %v1055_v16, %v60_v13  ;;  %v132_v13 = vstv %s1094_s20  ;;  %s1308_s20 = sld [smem:[#allocation2 + $0x306]]  ;;  %s1370_s22 = sld [smem:[#allocation5 + $0x81]] }
  0x3b   :  { %v64_v30 = vadd.f32 %v62_v22, %v58_v21 }
  0x3d   :  { %328 = vrot.lane.b32.xlu1 %v323_v25, %s879_s5  ;;  %326 = vrot.lane.b32.xlu0 %v322_v26, %s879_s5  ;;  %v87_v25 = vmul.f32 %v1063_v18, %v86_v19 }
  0x41   :  { %413 = vrot.lane.b32.xlu1 %v408_v28, %s879_s5  ;;  %411 = vrot.lane.b32.xlu0 %v407_v29, %s879_s5  ;;  %v1080_v29 = vld [vmem:[%s1523_s2 + $0x70] sm:$0xff] }
  0x45   :  { %498 = vrot.lane.b32.xlu1 %v493_v31, %s879_s5  ;;  %496 = vrot.lane.b32.xlu0 %v492_v32, %s879_s5  ;;  %v145_v32 = vstv %s1050_s6  ;;  %s1232_s6 = sld [smem:[#allocation2 + $0x86]] }
  0x49   :  { %583 = vrot.lane.b32.xlu1 %v578_v34, %s879_s5  ;;  %581 = vrot.lane.b32.xlu0 %v577_v35, %s879_s5  ;;  %v82_v35 = vmul.f32 %v922_v2, %v80_v17 }
  0x4d   :  { %665 = vrot.lane.b32.xlu1 %v928_v5, %s879_s5  ;;  %663 = vrot.lane.b32.xlu0 %v917_v1, %s879_s5 }
  0x51   :  { %689 = vrot.lane.b32.xlu1 %v922_v2, %s879_s5  ;;  %687 = vrot.lane.b32.xlu0 %v912_v0, %s879_s5 }
  0x55   :  { %269 = vrot.lane.b32.xlu1 %v264_v37, %s879_s5  ;;  %267 = vrot.lane.b32.xlu0 %v263_v38, %s879_s5  ;;  %v1089_v37 = vld [vmem:[%s1523_s2 + $0x11] sm:$0xff]  ;;  %v88_v38 = vmul.f32 %v1080_v29, %v86_v19  ;;  %v231_v19 = vmul.f32 %v1042_v9, %v230_v54 }
  0x59   :  { %354 = vrot.lane.b32.xlu1 %v349_v40, %s879_s5  ;;  %352 = vrot.lane.b32.xlu0 %v348_v41, %s879_s5  ;;  %v107_v40 = vmul.f32 %v106_v27, %v943_v12  ;;  %v147_v41 = vmul.f32 %v1055_v16, %v145_v32 }
  0x5d   :  { %439 = vrot.lane.b32.xlu1 %v434_v43, %s879_s5  ;;  %437 = vrot.lane.b32.xlu0 %v433_v44, %s879_s5 }
  0x61   :  { %524 = vrot.lane.b32.xlu1 %v519_v46, %s879_s5  ;;  %522 = vrot.lane.b32.xlu0 %v518_v47, %s879_s5  ;;  %v146_v46 = vmul.f32 %v1042_v9, %v145_v32  ;;  %v113_v47 = vmul.f32 %v1089_v37, %v112_v36 }
  0x65   :  { %609 = vrot.lane.b32.xlu1 %v604_v49, %s879_s5  ;;  %607 = vrot.lane.b32.xlu0 %v603_v50, %s879_s5  ;;  %v1110_v50 = vld [vmem:[%s1523_s2 + $0x51] sm:$0xff]  ;;  %s1123_s2 = sld [smem:[#allocation2 + $0x183]] }
  0x69   :  { %701 = vrot.lane.b32.xlu1 %v938_v10, %s879_s5  ;;  %699 = vrot.lane.b32.xlu0 %v943_v12, %s879_s5 }
  0x6d   :  { %210 = vrot.lane.b32.xlu1 %v205_v52, %s879_s5  ;;  %208 = vrot.lane.b32.xlu0 %v204_v53, %s879_s5  ;;  %v226_v53 = vstv %s1071_s13  ;;  %s1268_s13 = sld [smem:[#allocation2 + $0x206]] }
  0x6e   :  { %v228_v63 = vmul.f32 %v226_v53, %v928_v5  ;;  %v227_v17 = vmul.f32 %v226_v53, %v917_v1 }
  0x71   :  { %295 = vrot.lane.b32.xlu1 %v290_v55, %s879_s5  ;;  %293 = vrot.lane.b32.xlu0 %v289_v56, %s879_s5 }
  0x75   :  { %380 = vrot.lane.b32.xlu1 %v375_v58, %s879_s5  ;;  %378 = vrot.lane.b32.xlu0 %v374_v59, %s879_s5  ;;  %v108_v58 = vmul.f32 %v106_v27, %v938_v10  ;;  %v313_v27 = vmul.f32 %v311_v11, %v928_v5 }
  0x79   :  { %465 = vrot.lane.b32.xlu1 %v460_v61, %s879_s5  ;;  %463 = vrot.lane.b32.xlu0 %v459_v62, %s879_s5  ;;  %v114_v61 = vmul.f32 %v1110_v50, %v112_v36  ;;  %v167_v62 = vmul.f32 %v922_v2, %v165_v48  ;;  %v312_v36 = vmul.f32 %v311_v11, %v917_v1 }
  0x7d   :  { %550 = vrot.lane.b32.xlu1 %v545_v3, %s879_s5  ;;  %548 = vrot.lane.b32.xlu0 %v544_v4, %s879_s5  ;;  %v232_v3 = vmul.f32 %v1055_v16, %v230_v54 }
  0x81   :  { %635 = vrot.lane.b32.xlu1 %v630_v7, %s879_s5  ;;  %633 = vrot.lane.b32.xlu0 %v629_v8, %s879_s5  ;;  %s1048_s5 = sld [smem:[#allocation2 + $0x80]]  ;;  %v166_v8 = vmul.f32 %v912_v0, %v165_v48 }
  0x87   :  { %v141_v31 = vstv %s1048_s5  ;;  %s1226_s5 = sld [smem:[#allocation2 + $0x84]] }
  0x88   :  { %v143_v42 = vmul.f32 %v141_v31, %v928_v5  ;;  %v142_v45 = vmul.f32 %v141_v31, %v917_v1 }
  0x8a   :  { %v149_v56 = vadd.f32 %v147_v41, %v143_v42  ;;  %v148_v60 = vadd.f32 %v146_v46, %v142_v45  ;;  %v233_v42 = vadd.f32 %v231_v19, %v227_v17  ;;  %v335_v45 = vstv %s1123_s2  ;;  %s1453_s2 = sld [smem:[#allocation2 + $0x307]] }
  0x97   :  { %v98_v23 = vpop.permute.xlu1 %97  ;;  %v72_v26 = vpop.permute.xlu0 %71 }
  0x98   :  { %v77_v28 = vadd.f32 %v72_v26, %v63_v20  ;;  %v250_v26 = vstv %s1105_s1  ;;  %s1360_s1 = sld [smem:[#allocation5 + $0x7]] }
  0x9a   :  { %v83_v33 = vadd.f32 %v81_v24, %v77_v28 }
  0x9b   :  { %v100_v34 = vpop.permute.xlu1 %99  ;;  %v74_v39 = vpop.permute.xlu0 %73 }
  0x9c   :  { %v89_v43 = vadd.f32 %v87_v25, %v83_v33  ;;  %v78_v44 = vadd.f32 %v74_v39, %v64_v30  ;;  %v234_v25 = vadd.f32 %v232_v3, %v228_v63  ;;  %v396_v33 = vstv %s1114_s23  ;;  %s1386_s23 = sld [smem:[#allocation5 + $0x82]] }
  0x9d   :  { %v400_v39 = vstv %s1116_s24  ;;  %v398_v46 = vmul.f32 %v396_v33, %v928_v5  ;;  %v336_v63 = vmul.f32 %v912_v0, %v335_v45  ;;  %s1396_s24 = sld [smem:[#allocation5 + $0x83]] }
  0x9e   :  { %v84_v49 = vadd.f32 %v82_v35, %v78_v44  ;;  %v103_v52 = vadd.f32 %v98_v23, %v89_v43  ;;  %v315_v23 = vstv %s1101_s0  ;;  %v252_v43 = vmul.f32 %v922_v2, %v250_v26  ;;  %s1310_s0 = sld [smem:[#allocation2 + $0x287]] }
  0x9f   :  { %v126_v51 = vpop.permute.xlu1 %125  ;;  %v124_v55 = vpop.permute.xlu0 %123  ;;  %v317_v35 = vmul.f32 %v1055_v16, %v315_v23  ;;  %v251_v44 = vmul.f32 %v912_v0, %v250_v26  ;;  %v650_v26 = vlaneseq }
  0xa0   :  { %v90_v57 = vadd.f32 %v88_v38, %v84_v49  ;;  %v109_v59 = vadd.f32 %v107_v40, %v103_v52  ;;  %v316_v38 = vmul.f32 %v1042_v9, %v315_v23  ;;  %v402_v49 = vmul.f32 %v1055_v16, %v400_v39 }
  0xa1   :  { %v401_v52 = vmul.f32 %v1042_v9, %v400_v39 }
  0xa2   :  { %v104_v4 = vadd.f32 %v100_v34, %v90_v57  ;;  %v115_v6 = vadd.f32 %v113_v47, %v109_v59  ;;  %v481_v59 = vstv %s1131_s25  ;;  %s1455_s25 = sld [smem:[#allocation5 + $0x84]] }
  0xa3   :  { %v159_v7 = vpop.permute.xlu1 %158  ;;  %v157_v15 = vpop.permute.xlu0 %156  ;;  %v482_v17 = vmul.f32 %v481_v59, %v917_v1 }
  0xa4   :  { %v163_v14 = vadd.f32 %v159_v7, %v149_v56  ;;  %v110_v20 = vadd.f32 %v108_v58, %v104_v4  ;;  %v129_v21 = vadd.f32 %v124_v55, %v115_v6  ;;  %v162_v22 = vadd.f32 %v157_v15, %v148_v60 }
  0xa5   :  { %v319_v55 = vadd.f32 %v317_v35, %v313_v27  ;;  %v318_v56 = vadd.f32 %v316_v38, %v312_v36  ;;  %v485_v60 = vstv %s1133_s26  ;;  %v404_v6 = vadd.f32 %v402_v49, %v398_v46  ;;  %s1475_s26 = sld [smem:[#allocation5 + $0x85]] }
  0xa6   :  { %v1135_v24 = vadd.f32 %v167_v62, %v163_v14  ;;  %v116_v28 = vadd.f32 %v114_v61, %v110_v20  ;;  %v133_v30 = vadd.f32 %v132_v13, %v129_v21  ;;  %v1139_v31 = vadd.f32 %v166_v8, %v162_v22 }
  0xa7   :  { %v1141_v32 = vpop.permute.xlu1 %184  ;;  %v1146_v34 = vpop.permute.xlu0 %182  ;;  %v337_v62 = vmul.f32 %v922_v2, %v335_v45  ;;  %v420_v7 = vstv %s1144_s27  ;;  %v483_v14 = vmul.f32 %v481_v59, %v928_v5  ;;  %v487_v15 = vmul.f32 %v1055_v16, %v485_v60  ;;  %s1491_s27 = sld [smem:[#allocation5 + $0x86]] }
  0xa8   :  { %v130_v40 = vadd.f32 %v126_v51, %v116_v28  ;;  %v135_v41 = vmax.f32 %v133_v30, 0.0  ;;  %v397_v51 = vmul.f32 %v396_v33, %v917_v1  ;;  %v486_v20 = vmul.f32 %v1042_v9, %v485_v60 }
  0xa9   :  { %v566_v21 = vstv %s1152_s28  ;;  %v570_v22 = vstv %s1154_s29  ;;  %v421_v30 = vmul.f32 %v912_v0, %v420_v7  ;;  %v505_v33 = vstv %s1164_s30  ;;  %s880_s28 = smov [#allocation7]  }
  0xaa   :  { %v134_v47 = vadd.f32 %v132_v13, %v130_v40  ;;  %138 = vst.msk [vmem:[#allocation7] sm:$0xff] %vm137_vm0, %v135_v41  ;;  %v403_v8 = vadd.f32 %v401_v52, %v397_v51  ;;  %v489_v38 = vadd.f32 %v487_v15, %v483_v14  ;;  %v568_v39 = vmul.f32 %v566_v21, %v928_v5  ;;  %s727_s29 = sshll.u32 %s880_s28, 4  ;;  %s728_s29 = int_to_ptr.vmem [resolvable:$true] %s727_s29 }
  0xab   :  { %v244_v48 = vpop.permute.xlu1 %243  ;;  %v242_v54 = vpop.permute.xlu0 %241  ;;  %v572_v40 = vmul.f32 %v1055_v16, %v570_v22  ;;  %v507_v46 = vmul.f32 %v922_v2, %v505_v33  ;;  %v506_v52 = vmul.f32 %v912_v0, %v505_v33  ;;  %v678_v14 = vmax.f32 %v922_v2, %v938_v10  ;;  %s849_s30 = scalar_lea.vmem %s728_s29, 2048  ;;  %p854_p11 = scmp.lt.s32.totalorder %s728_s29, %s728_s29 }
  0xac   :  { %v248_v53 = vadd.f32 %v244_v48, %v234_v25  ;;  %v136_v57 = vmax.f32 %v134_v47, 0.0  ;;  %v247_v58 = vadd.f32 %v242_v54, %v233_v42  ;;  %v422_v25 = vmul.f32 %v922_v2, %v420_v7  ;;  %p850_p10 = scmp.ne.s32.totalorder %s728_s29, %s849_s30  ;;  %p855_p12 = scmp.lt.s32.totalorder %s849_s30, %s849_s30 }
  0xad   :  { %v488_v42 = vadd.f32 %v486_v20, %v482_v17  ;;  %v651_v47 = vshrl.u32 %v650_v26, 7  ;;  %v653_v48 = vand.u32 127, %v650_v26 }
  0xae   :  { %v1168_v61 = vadd.f32 %v252_v43, %v248_v53  ;;  %139 = vst.msk [vmem:[#allocation7 + $0x40] sm:$0xff] %vm137_vm0, %v136_v57  ;;  %v1173_v3 = vadd.f32 %v251_v44, %v247_v58  ;;  %v567_v43 = vmul.f32 %v566_v21, %v917_v1  ;;  %v571_v44 = vmul.f32 %v1042_v9, %v570_v22  ;;  %p856_p13 = por %p855_p12, %p854_p11 }
  0xaf   :  { %v329_v4 = vpop.permute.xlu1 %328  ;;  %v327_v13 = vpop.permute.xlu0 %326  ;;  %v590_v53 = vstv %s1176_s4  ;;  %vm654_vm1 = vcmp.eq.s32.totalorder %v651_v47, 0  ;;  %vm655_vm2 = vcmp.eq.s32.totalorder %v653_v48, 0 }
  0xb0   :  { %v333_v11 = vadd.f32 %v329_v4, %v319_v55  ;;  %v332_v19 = vadd.f32 %v327_v13, %v318_v56  ;;  %v574_v56 = vadd.f32 %v572_v40, %v568_v39  ;;  %v573_v58 = vadd.f32 %v571_v44, %v567_v43  ;;  %vm1210_vm3 = vmor %vm654_vm1, %vm655_vm2  ;;  %p857_p0 = pnand %p856_p13, %p850_p10 }
  0xb1   :  { %v592_v60 = vmul.f32 %v922_v2, %v590_v53  ;;  %v591_v4 = vmul.f32 %v912_v0, %v590_v53  ;;  %v660_v20 = vsel %vm1210_vm3, -inf, %v928_v5  ;;  %v171_v39 = vstv %s1226_s5 }
  0xb2   :  { %v1184_v23 = vadd.f32 %v337_v62, %v333_v11  ;;  %v1187_v27 = vadd.f32 %v336_v63, %v332_v19  ;;  %v677_v19 = vmax.f32 %v912_v0, %v943_v12  ;;  %v1236_v0 = vsel %vm655_vm2, -inf, %v678_v14 }
  0xb3   :  { %v414_v28 = vpop.permute.xlu1 %413  ;;  %v412_v36 = vpop.permute.xlu0 %411  ;;  %v191_v40 = vstv %s1232_s6  ;;  %v173_v44 = vmul.f32 %v1080_v29, %v171_v39  ;;  %v361_v53 = vstv %s1256_s10 }
  0xb4   :  { %v418_v35 = vadd.f32 %v414_v28, %v404_v6  ;;  %v417_v41 = vadd.f32 %v412_v36, %v403_v8  ;;  %v1295_v48 = vmul.f32 %v191_v40, %v938_v10  ;;  %v1327_v11 = vmul.f32 %v361_v53, %v943_v12 }
  0xb6   :  { %v1195_v45 = vadd.f32 %v422_v25, %v418_v35  ;;  %v1198_v49 = vadd.f32 %v421_v30, %v417_v41  ;;  %v659_v25 = vsel %vm1210_vm3, -inf, %v917_v1  ;;  %v1248_v1 = vsel %vm655_vm2, -inf, %v677_v19 }
  0xb7   :  { %v499_v51 = vpop.permute.xlu1 %498  ;;  %v497_v55 = vpop.permute.xlu0 %496  ;;  %v256_v41 = vstv %s1243_s7 }
  0xb8   :  { %v503_v54 = vadd.f32 %v499_v51, %v489_v38  ;;  %v502_v57 = vadd.f32 %v497_v55, %v488_v42  ;;  %v276_v42 = vstv %s1245_s8  ;;  %v172_v51 = vmul.f32 %v1063_v18, %v171_v39 }
  0xb9   :  { %v1304_v55 = vmul.f32 %v276_v42, %v938_v10 }
  0xba   :  { %v1202_v59 = vadd.f32 %v507_v46, %v503_v54  ;;  %v1205_v62 = vadd.f32 %v506_v52, %v502_v57  ;;  %v341_v46 = vstv %s1254_s9  ;;  %v1299_v52 = vmul.f32 %v191_v40, %v943_v12 }
  0xbb   :  { %v584_v63 = vpop.permute.xlu1 %583  ;;  %v582_v7 = vpop.permute.xlu0 %581  ;;  %v258_v54 = vmul.f32 %v1080_v29, %v256_v41  ;;  %v511_v57 = vstv %s1262_s12  ;;  %v174_v39 = vadd.f32 %v172_v51, %v1139_v31  ;;  %v367_v51 = vstv %s1290_s18 }
  0xbc   :  { %v588_v6 = vadd.f32 %v584_v63, %v574_v56  ;;  %v587_v8 = vadd.f32 %v582_v7, %v573_v58  ;;  %v426_v56 = vstv %s1260_s11  ;;  %v257_v58 = vmul.f32 %v1063_v18, %v256_v41 }
  0xbd   :  { %v343_v63 = vmul.f32 %v1080_v29, %v341_v46  ;;  %v1321_v7 = vmul.f32 %v361_v53, %v938_v10  ;;  %v1333_v19 = vmul.f32 %v1080_v29, %v426_v56  ;;  %v452_v53 = vstv %s1292_s19 }
  0xbe   :  { %v1214_v13 = vadd.f32 %v592_v60, %v588_v6  ;;  %v1218_v15 = vadd.f32 %v591_v4, %v587_v8  ;;  %v1314_v60 = vmul.f32 %v276_v42, %v943_v12  ;;  %v446_v4 = vstv %s1268_s13 }
  0xbf   :  { %v666_v17 = vpop.permute.xlu1 %665  ;;  %v664_v22 = vpop.permute.xlu0 %663  ;;  %v1324_v8 = vmul.f32 %v1063_v18, %v341_v46  ;;  %v1350_v40 = vmul.f32 %v446_v4, %v943_v12  ;;  %v1355_v42 = vmul.f32 %v1063_v18, %v511_v57 }
  0xc0   :  { %1527 = vst [vmem:[#allocation11_spill] sm:$0xff] %v1218_v15  ;;  %v670_v21 = vmax.f32 %v1055_v16, %v666_v17  ;;  %v669_v2 = vmax.f32 %v1042_v9, %v664_v22  ;;  %v596_v17 = vstv %s1272_s14  ;;  %v197_v22 = vstv %s1275_s15 }
  0xc1   :  { %v1358_v46 = vmul.f32 %v1080_v29, %v596_v17  ;;  %v199_v31 = vmul.f32 %v1110_v50, %v197_v22  ;;  %v537_v15 = vstv %s1310_s0 }
  0xc2   :  { %v674_v26 = vsel %vm654_vm1, -inf, %v670_v21  ;;  %v673_v5 = vsel %vm654_vm1, -inf, %v669_v2  ;;  %v1339_v21 = vmul.f32 %v1080_v29, %v511_v57  ;;  %v1344_v2 = vmul.f32 %v446_v4, %v938_v10 }
  0xc3   :  { %v1238_v28 = vmax.f32 %v660_v20, %v674_v26  ;;  %v1241_v16 = vpop.permute.xlu1 %689  ;;  %v1250_v9 = vmax.f32 %v659_v25, %v673_v5  ;;  %v1252_v30 = vpop.permute.xlu0 %687  ;;  %v1336_v20 = vmul.f32 %v1063_v18, %v426_v56  ;;  %v175_v25 = vadd.f32 %v173_v44, %v1135_v24  ;;  %1528 = vst [vmem:[#allocation12_spill] sm:$0xff] %v1358_v46 }
  0xc4   :  { %v531_v26 = vstv %s1278_s16  ;;  %v282_v5 = vstv %s1280_s17  ;;  %v1365_v44 = vmul.f32 %v1063_v18, %v596_v17  ;;  %v198_v4 = vmul.f32 %v1089_v37, %v197_v22 }
  0xc5   :  { %v1375_v56 = vmul.f32 %v531_v26, %v938_v10  ;;  %v1378_v57 = vmul.f32 %v531_v26, %v943_v12  ;;  %v284_v35 = vmul.f32 %v1110_v50, %v282_v5  ;;  %v189_v17 = vadd.f32 %v1141_v32, %v175_v25 }
  0xc6   :  { %1529 = vst [vmem:[#allocation13_spill] sm:$0xff] %v1365_v44  ;;  %v694_v33 = vmax.f32 %v1080_v29, %v1241_v16  ;;  %v616_v44 = vstv %s1308_s20  ;;  %v188_v46 = vadd.f32 %v1146_v34, %v174_v39  ;;  %v260_v26 = vadd.f32 %v258_v54, %v1168_v61 }
  0xc7   :  { %v1266_v36 = vpop.permute.xlu1 %269  ;;  %v1270_v38 = vpop.permute.xlu0 %267  ;;  %1530 = vst [vmem:[#allocation14_spill] sm:$0xff] %v1375_v56  ;;  %1531 = vst [vmem:[#allocation15_spill] sm:$0xff] %v1378_v57  ;;  %v693_v56 = vmax.f32 %v1063_v18, %v1252_v30  ;;  %v259_v22 = vadd.f32 %v257_v58, %v1173_v3  ;;  %v283_v29 = vmul.f32 %v1089_v37, %v282_v5 }
  0xc8   :  { %v1402_v16 = vmul.f32 %v1110_v50, %v367_v51  ;;  %v1405_v34 = vmul.f32 %v1089_v37, %v367_v51  ;;  %v1408_v18 = vmul.f32 %v1110_v50, %v452_v53  ;;  %v274_v61 = vadd.f32 %v1266_v36, %v260_v26 }
  0xc9   :  { %v273_v3 = vadd.f32 %v1270_v38, %v259_v22  ;;  %v1413_v30 = vmul.f32 %v1089_v37, %v452_v53  ;;  %v1416_v54 = vmul.f32 %v1110_v50, %v537_v15  ;;  %v195_v58 = vadd.f32 %v1295_v48, %v189_v17 }
  0xca   :  { %v1420_v25 = vmul.f32 %v616_v44, %v938_v10  ;;  %v696_v5 = vmax.f32 %v694_v33, %v1110_v50  ;;  %v1424_v39 = vmul.f32 %v1089_v37, %v537_v15  ;;  %v194_v36 = vadd.f32 %v1299_v52, %v188_v46 }
  0xcb   :  { %v1284_v43 = vpop.permute.xlu1 %354  ;;  %v1288_v47 = vpop.permute.xlu0 %352  ;;  %v1428_v38 = vmul.f32 %v616_v44, %v943_v12  ;;  %v710_v51 = vstv %s1360_s1  ;;  %v695_v26 = vmax.f32 %v693_v56, %v1089_v37  ;;  %v345_v48 = vadd.f32 %v343_v63, %v1184_v23 }
  0xcc   :  { %1532 = vst [vmem:[#allocation16_spill] sm:$0xff] %v1424_v39  ;;  %v714_v17 = vstv %s1367_s21  ;;  %v217_v33 = vstv %s1370_s22  ;;  %v280_v15 = vadd.f32 %v1304_v55, %v274_v61  ;;  %v279_v39 = vadd.f32 %v1314_v60, %v273_v3 }
  0xcd   :  { %v344_v12 = vadd.f32 %v1324_v8, %v1187_v27  ;;  %v359_v46 = vadd.f32 %v1284_v43, %v345_v48  ;;  %v1533_v44 = vmax.f32 %v1238_v28, %v1236_v0  ;;  %v201_v23 = vadd.f32 %v199_v31, %v195_v58 }
  0xce   :  { %v302_v63 = vstv %s1386_s23  ;;  %v200_v60 = vadd.f32 %v198_v4, %v194_v36  ;;  %v387_v3 = vstv %s1396_s24  ;;  %v430_v27 = vadd.f32 %v1333_v19, %v1195_v45 }
  0xcf   :  { %v1318_v6 = vpop.permute.xlu1 %439  ;;  %v1329_v14 = vpop.permute.xlu0 %437  ;;  %v429_v43 = vadd.f32 %v1336_v20, %v1198_v49  ;;  %v286_v58 = vadd.f32 %v284_v35, %v280_v15 }
  0xd1   :  { %v443_v49 = vadd.f32 %v1329_v14, %v429_v43 }
  0xd3   :  { %v1352_v41 = vpop.permute.xlu1 %524  ;;  %v1362_v24 = vpop.permute.xlu0 %522 }
  0xd7   :  { %v1394_v57 = vpop.permute.xlu1 %609  ;;  %v1398_v32 = vpop.permute.xlu0 %607 }
  0xdb   :  { %v702_v53 = vpop.permute.xlu1 %701  ;;  %v700_v22 = vpop.permute.xlu0 %699 }
  0xdc   :  { %v706_v10 = vmax.f32 %v696_v5, %v702_v53  ;;  %v705_v52 = vmax.f32 %v695_v26, %v700_v22  ;;  %v358_v5 = vadd.f32 %v1288_v47, %v344_v12  ;;  %v1534_v53 = vmax.f32 %v1250_v9, %v1248_v1 }
  0xdd   :  { %v285_v26 = vadd.f32 %v283_v29, %v279_v39  ;;  %v365_v1 = vadd.f32 %v1321_v7, %v359_v46  ;;  %v444_v9 = vadd.f32 %v1318_v6, %v430_v27  ;;  %v514_v7 = vadd.f32 %v1355_v42, %v1205_v62 }
  0xde   :  { %v708_v56 = vmax.f32 %v1533_v44, %v706_v10  ;;  %v707_v55 = vmax.f32 %v1534_v53, %v705_v52  ;;  %v364_v19 = vadd.f32 %v1327_v11, %v358_v5  ;;  %v1536_v44 = vld [vmem:[#allocation11_spill] sm:$0xff]  ;;  %v472_v53 = vstv %s1455_s25 }
  0xdf   :  { %v211_v61 = vpop.permute.xlu1 %210  ;;  %v209_v28 = vpop.permute.xlu0 %208  ;;  %v450_v11 = vadd.f32 %v1344_v2, %v444_v9  ;;  %v528_v62 = vadd.f32 %v1362_v24, %v514_v7 }
  0xe0   :  { %v712_v8 = vmul.f32 %v710_v51, %v708_v56  ;;  %v215_v0 = vadd.f32 %v211_v61, %v201_v23  ;;  %v711_v31 = vmul.f32 %v710_v51, %v707_v55  ;;  %v214_v47 = vadd.f32 %v209_v28, %v200_v60  ;;  %v1537_v56 = vld [vmem:[#allocation13_spill] sm:$0xff]  ;;  %v1538_v55 = vld [vmem:[#allocation14_spill] sm:$0xff] }
  0xe1   :  { %v515_v51 = vadd.f32 %v1339_v21, %v1202_v59  ;;  %v371_v21 = vadd.f32 %v1402_v16, %v365_v1  ;;  %v599_v24 = vadd.f32 %v1537_v56, %v1536_v44  ;;  %v456_v60 = vadd.f32 %v1408_v18, %v450_v11 }
  0xe2   :  { %v716_v4 = vadd.f32 %v714_v17, %v712_v8  ;;  %v219_v45 = vadd.f32 %v217_v33, %v215_v0  ;;  %v715_v20 = vadd.f32 %v714_v17, %v711_v31  ;;  %v218_v36 = vadd.f32 %v217_v33, %v214_v47  ;;  %v1535_v33 = vld [vmem:[#allocation12_spill] sm:$0xff] }
  0xe3   :  { %v296_v48 = vpop.permute.xlu1 %295  ;;  %v294_v10 = vpop.permute.xlu0 %293  ;;  %v529_v14 = vadd.f32 %v1352_v41, %v515_v51  ;;  %v449_v17 = vadd.f32 %v1350_v40, %v443_v49  ;;  %v370_v41 = vadd.f32 %v1405_v34, %v364_v19  ;;  %v600_v12 = vadd.f32 %v1535_v33, %v1214_v13  ;;  %v1539_v13 = vld [vmem:[#allocation15_spill] sm:$0xff]  ;;  %v1540_v49 = vld [vmem:[#allocation16_spill] sm:$0xff] }
  0xe4   :  { %v718_v35 = vmax.f32 %v716_v4, 0.0  ;;  %v221_v29 = vmax.f32 %v219_v45, 0.0  ;;  %v300_v39 = vadd.f32 %v296_v48, %v286_v58  ;;  %v717_v6 = vmax.f32 %v715_v20, 0.0 }
  0xe5   :  { %v220_v22 = vmax.f32 %v218_v36, 0.0  ;;  %v299_v15 = vadd.f32 %v294_v10, %v285_v26  ;;  %v622_v40 = vstv %s1453_s2  ;;  %v614_v61 = vadd.f32 %v1394_v57, %v600_v12 }
  0xe6   :  { %721 = vst.msk [vmem:[#allocation7 + $0x78] sm:$0xff] %vm137_vm0, %v718_v35  ;;  %224 = vst.msk [vmem:[#allocation7 + $0x48] sm:$0xff] %vm137_vm0, %v221_v29  ;;  %v304_v59 = vadd.f32 %v302_v63, %v300_v39  ;;  %v534_v27 = vadd.f32 %v1539_v13, %v528_v62  ;;  %v613_v43 = vadd.f32 %v1398_v32, %v599_v24  ;;  %v557_v45 = vstv %s1475_s26 }
  0xe7   :  { %720 = vst.msk [vmem:[#allocation7 + $0x38] sm:$0xff] %vm137_vm0, %v717_v6  ;;  %223 = vst.msk [vmem:[#allocation7 + $0x8] sm:$0xff] %vm137_vm0, %v220_v22  ;;  %v303_v2 = vadd.f32 %v302_v63, %v299_v15  ;;  %v381_v42 = vpop.permute.xlu1 %380  ;;  %v379_v46 = vpop.permute.xlu0 %378  ;;  %v535_v63 = vadd.f32 %v1538_v55, %v529_v14  ;;  %v455_v28 = vadd.f32 %v1413_v30, %v449_v17 }
  0xe8   :  { %v306_v52 = vmax.f32 %v304_v59, 0.0  ;;  %v385_v16 = vadd.f32 %v381_v42, %v371_v21  ;;  %v384_v5 = vadd.f32 %v379_v46, %v370_v41  ;;  %v624_v18 = vmul.f32 %v1110_v50, %v622_v40 }
  0xe9   :  { %v305_v23 = vmax.f32 %v303_v2, 0.0  ;;  %v620_v1 = vadd.f32 %v1420_v25, %v614_v61  ;;  %v623_v9 = vmul.f32 %v1089_v37, %v622_v40  ;;  %v619_v30 = vadd.f32 %v1428_v38, %v613_v43 }
  0xea   :  { %309 = vst.msk [vmem:[#allocation7 + $0x50] sm:$0xff] %vm137_vm0, %v306_v52  ;;  %v389_v34 = vadd.f32 %v387_v3, %v385_v16  ;;  %v388_v8 = vadd.f32 %v387_v3, %v384_v5  ;;  %v541_v3 = vadd.f32 %v1416_v54, %v535_v63  ;;  %v540_v20 = vadd.f32 %v1540_v49, %v534_v27 }
  0xeb   :  { %308 = vst.msk [vmem:[#allocation7 + $0x10] sm:$0xff] %vm137_vm0, %v305_v23  ;;  %v466_v0 = vpop.permute.xlu1 %465  ;;  %v464_v47 = vpop.permute.xlu0 %463  ;;  %v626_v35 = vadd.f32 %v624_v18, %v620_v1  ;;  %v642_v38 = vstv %s1491_s27  ;;  %v625_v39 = vadd.f32 %v623_v9, %v619_v30 }
  0xec   :  { %v391_v31 = vmax.f32 %v389_v34, 0.0  ;;  %v470_v57 = vadd.f32 %v466_v0, %v456_v60  ;;  %v390_v58 = vmax.f32 %v388_v8, 0.0  ;;  %v469_v26 = vadd.f32 %v464_v47, %v455_v28 }
  0xee   :  { %394 = vst.msk [vmem:[#allocation7 + $0x58] sm:$0xff] %vm137_vm0, %v391_v31  ;;  %v474_v32 = vadd.f32 %v472_v53, %v470_v57  ;;  %393 = vst.msk [vmem:[#allocation7 + $0x18] sm:$0xff] %vm137_vm0, %v390_v58  ;;  %v473_v4 = vadd.f32 %v472_v53, %v469_v26 }
  0xef   :  { %v551_v19 = vpop.permute.xlu1 %550  ;;  %v549_v25 = vpop.permute.xlu0 %548 }
  0xf0   :  { %v476_v50 = vmax.f32 %v474_v32, 0.0  ;;  %v555_v36 = vadd.f32 %v551_v19, %v541_v3  ;;  %v475_v48 = vmax.f32 %v473_v4, 0.0  ;;  %v554_v51 = vadd.f32 %v549_v25, %v540_v20 }
  0xf2   :  { %479 = vst.msk [vmem:[#allocation7 + $0x60] sm:$0xff] %vm137_vm0, %v476_v50  ;;  %v559_v54 = vadd.f32 %v557_v45, %v555_v36  ;;  %478 = vst.msk [vmem:[#allocation7 + $0x20] sm:$0xff] %vm137_vm0, %v475_v48  ;;  %v558_v37 = vadd.f32 %v557_v45, %v554_v51 }
  0xf3   :  { %v636_v29 = vpop.permute.xlu1 %635  ;;  %v634_v6 = vpop.permute.xlu0 %633 }
  0xf4   :  { %v561_v10 = vmax.f32 %v559_v54, 0.0  ;;  %v640_v7 = vadd.f32 %v636_v29, %v626_v35  ;;  %v560_v22 = vmax.f32 %v558_v37, 0.0  ;;  %v639_v15 = vadd.f32 %v634_v6, %v625_v39 }
  0xf6   :  { %564 = vst.msk [vmem:[#allocation7 + $0x68] sm:$0xff] %vm137_vm0, %v561_v10  ;;  %v644_v11 = vadd.f32 %v642_v38, %v640_v7  ;;  %563 = vst.msk [vmem:[#allocation7 + $0x28] sm:$0xff] %vm137_vm0, %v560_v22  ;;  %v643_v14 = vadd.f32 %v642_v38, %v639_v15 }
  0xf8   :  { %v646_v59 = vmax.f32 %v644_v11, 0.0  ;;  %v645_v21 = vmax.f32 %v643_v14, 0.0 }
  0xfa   :  { %649 = vst.msk [vmem:[#allocation7 + $0x70] sm:$0xff] %vm137_vm0, %v646_v59  ;;  %648 = vst.msk [vmem:[#allocation7 + $0x30] sm:$0xff] %vm137_vm0, %v645_v21 }
  0xfb   :  { %860 = shalt.err (!%p857_p0)
}
  0xfc   :  { %s861_s6 = scalar_lea.hbm %s1524_s3, 2048 }
  0xfd   :  { %p862_p1 = scmp.ne.s32.totalorder %s1524_s3, %s861_s6  ;;  %p865_p2 = scmp.lt.u32.totalorder %s861_s6, %s1524_s3 }
  0xff   :  { %p867_p3 = pnand %p865_p2, %p862_p1 }
 0x101   :  { %870 = shalt.err (!%p867_p3)
}
 0x102   :  { %s881_s11 = smov 128   ;;  %s882_s12 = smov 8  }
 0x103   :  { %733 = dma.vmem_to_hbm [thread:$0]  %s728_s29, 2048, %s1524_s3, [#allocation3], %s881_s11, %s881_s11, %s882_s12  }
 0x104   :  { %875 = dma.done.wait [#allocation3], 2048  }
 0x105   :  { %876 = vsyncadd [#allocation3], 4294965248 }
 0x106   :  { %737 = vsyncpa [#allocation3], 1 }
 0x107   :  { %738 = vsyncpa [#allocation4], 1 }
 0x108   :  { %739 = vsyncpa [#allocation6], 1 }

</bundles_post_ra>
